<compile_context>
chip_gen: v5e
topology: v5e:2x2
jax: 0.10.0
libtpu: 0.0.40
codegen_flags: <defaults>
</compile_context>

<pallas_src>
import functools

import jax
import jax.numpy as jnp
import numpy as np
from jax.experimental import pallas as pl
from jax.experimental.pallas import tpu as pltpu

LN_EPS = 1e-5


# ----------------------------------------------------------------------------
# in-kernel helpers
# ----------------------------------------------------------------------------
def _layernorm(x, g, b, eps):
    mu = jnp.mean(x, axis=-1, keepdims=True)
    xc = x - mu
    var = jnp.mean(xc * xc, axis=-1, keepdims=True)
    return xc * jax.lax.rsqrt(var + eps) * g + b


# ----------------------------------------------------------------------------
# Pallas kernels
# ----------------------------------------------------------------------------
def _attn_kernel(x_ref, whb_ref, bg_ref, wo_ref, bo_ref, lng_ref, lnb_ref,
                 o_ref, *, heads, dim_head, eps, compute_dtype):
    """Softmax attention (tied=False), head-major layout.

    Block: x (TB, N, D).  whb (heads, D, 4*dh) = per-head [Wq*scale | Wk | Wv | Wg],
    wo (heads, dh, D).  Head separation happens on leading (major) dims plus four
    static lane slices of the per-head projection — no per-head lane-slice loop and
    no lane-axis concatenation.
    """
    x = x_ref[...]                                    # (TB, N, D) f32
    TB, N, D = x.shape
    dh = dim_head
    M = TB * N

    # single bulk f32 -> bf16 cast of the activations
    xm = x.reshape(M, D).astype(compute_dtype)        # (M, D)
    xb = jnp.broadcast_to(xm[None], (heads, M, D))    # (H, M, D)

    # fused per-head projection [q*scale | k | v | g] -> (H, M, 4*dh), f32 accumulation
    proj = jnp.einsum('hmd,hdf->hmf', xb, whb_ref[...],
                      preferred_element_type=jnp.float32)

    qkv = proj[:, :, :3 * dh].astype(compute_dtype)   # one bulk cast for q, k, v
    gates = proj[:, :, 3 * dh:] + bg_ref[...]         # (H, M, dh) f32

    # fold heads into the leading batch dim -> single batched (N, N) attention
    q = qkv[:, :, 0 * dh:1 * dh].reshape(heads * TB, N, dh)
    k = qkv[:, :, 1 * dh:2 * dh].reshape(heads * TB, N, dh)
    v = qkv[:, :, 2 * dh:3 * dh].reshape(heads * TB, N, dh)

    # TODO(synk): for production N (hundreds+), add a KV-tile grid axis with online
    # softmax (flash-style, "arbitrary" axis + VMEM accumulator) instead of
    # materializing the full (H*TB, N, N) score tensor.
    dots = jnp.einsum('bid,bjd->bij', q, k, preferred_element_type=jnp.float32)
    mx = jnp.max(dots, axis=-1, keepdims=True)
    e = jnp.exp(dots - mx)
    inv = pl.reciprocal(jnp.sum(e, axis=-1, keepdims=True), approx=True)
    p = (e * inv).astype(compute_dtype)
    ho = jnp.einsum('bij,bjd->bid', p, v, preferred_element_type=jnp.float32)

    # gating + output projection: sum_h (M, dh) @ (dh, D); only leading-dim slices
    og = (ho.reshape(heads, M, dh) * jax.nn.sigmoid(gates)).astype(compute_dtype)
    out = jnp.dot(og[0], wo_ref[0], preferred_element_type=jnp.float32)
    for h in range(1, heads):
        out = out + jnp.dot(og[h], wo_ref[h], preferred_element_type=jnp.float32)

    out = out.reshape(TB, N, D) + bo_ref[...]
    out = x + out
    o_ref[...] = _layernorm(out, lng_ref[...], lnb_ref[...], eps).astype(o_ref.dtype)


def _attn_tied_kernel(x_ref, wv_ref, wg_ref, bg_ref, wo_ref, bo_ref, lng_ref,
                      lnb_ref, o_ref, *, heads, dim_head, eps, compute_dtype):
    """Tied-row attention: literal PyTorch collapse => out_h[i] = sum_j v_h[j].
    Since v is linear in x, sum_j v[j] = (sum_j x[j]) @ Wv; Wq/Wk are never needed."""
    del heads, dim_head
    x = x_ref[...]                                    # (TB, N, D) f32
    TB, N, D = x.shape
    inner = wv_ref.shape[1]

    xm = x.reshape(TB * N, D).astype(compute_dtype)
    gates = jnp.dot(xm, wg_ref[...],
                    preferred_element_type=jnp.float32).reshape(TB, N, inner)
    gates = gates + bg_ref[...]

    xsum = jnp.sum(x, axis=1).astype(compute_dtype)               # (TB, D)
    vsum = jnp.dot(xsum, wv_ref[...],
                   preferred_element_type=jnp.float32)            # (TB, inner)
    out = jnp.broadcast_to(vsum[:, None, :], (TB, N, inner))

    out = out * jax.nn.sigmoid(gates)
    out = jnp.dot(out.reshape(TB * N, inner).astype(compute_dtype), wo_ref[...],
                  preferred_element_type=jnp.float32).reshape(TB, N, D)
    out = out + bo_ref[...]
    out = x + out
    o_ref[...] = _layernorm(out, lng_ref[...], lnb_ref[...], eps).astype(o_ref.dtype)


# ----------------------------------------------------------------------------
# VMEM budgeting + block-size heuristic
# ----------------------------------------------------------------------------
def _vmem_estimate(block_b, N, D, heads, dim_head, out_bytes=4):
    """Rough per-step VMEM footprint (bytes): double-buffered x/out blocks, resident
    weights, and the kernel intermediates (proj, qkv, gates, dots/e/p, ho, og, out)."""
    inner = heads * dim_head
    M = block_b * N
    io = 2 * M * D * 4 + 2 * M * D * out_bytes
    weights = 2 * (D * 4 * inner + inner * D) * 2 + 4 * (inner + 3 * D) * 4
    interm = (M * 4 * inner * 4            # proj f32
              + M * 3 * inner * 2          # qkv bf16
              + 2 * M * inner * 4          # gates f32 + ho f32
              + M * inner * 2              # og bf16
              + heads * block_b * N * N * 10   # dots f32 + e f32 + p bf16
              + heads * M * D * 2          # broadcast activations bf16
              + 2 * M * D * 4)             # out f32 + pre-LN sum
    return io + weights + interm


def _choose_block_b(B, N, D, heads, dim_head, *, rows_target=1024, min_steps=4,
                    vmem_budget=20 * 2**20):
    """Largest batch-block such that rows/step <= rows_target, the VMEM estimate fits
    a conservative budget (safe for v7x's 64 MiB VMEM), the grid keeps >= min_steps
    steps for pipelining, and the grid count stays even (v7x megacore sharding).
    On single-TC chips (v5e/v6e) pass block_b explicitly to bias toward bigger blocks."""
    best = 1
    for d in range(2, B + 1):
        if B % d:
            continue
        steps = B // d
        if d * N > rows_target:
            continue
        if _vmem_estimate(d, N, D, heads, dim_head) > vmem_budget:
            continue
        if steps < min(min_steps, B):
            continue
        if steps > 1 and steps % 2:
            continue
        best = d
    return best


# ----------------------------------------------------------------------------
# Host-side parameter preparation (done ONCE, not per forward call)
# ----------------------------------------------------------------------------
def prepare_attention_params(p, *, heads, dim_head, compute_dtype=jnp.bfloat16):
    """Fuse + cast weights once. PyTorch column/row order for the inner dim is
    (head, dim_head), so reshapes below are exact relabelings."""
    D = p['wq'].shape[0]
    dh = dim_head
    scale = dh ** -0.5

    def per_head(w):                       # (D, inner) -> (heads, D, dh)
        return jnp.transpose(w.reshape(D, heads, dh), (1, 0, 2))

    whb = jnp.concatenate([per_head(p['wq'] * scale), per_head(p['wk']),
                           per_head(p['wv']), per_head(p['wg'])], axis=-1)

    return dict(
        # tied=False path (head-major fused weights)
        whb=whb.astype(compute_dtype),                       # (heads, D, 4*dh)
        bg_h=p['bg'].reshape(heads, 1, dh),                  # (heads, 1, dh) f32
        wo_h=p['wo'].reshape(heads, dh, D).astype(compute_dtype),
        # tied=True path (wide layouts; Wq/Wk never needed)
        wv=p['wv'].astype(compute_dtype),
        wg=p['wg'].astype(compute_dtype),
        bg=p['bg'],
        wo=p['wo'].astype(compute_dtype),
        # shared
        bo=p['bo'], lng=p['lng'], lnb=p['lnb'],
    )


# ----------------------------------------------------------------------------
# Wrapper
# ----------------------------------------------------------------------------
def attention_pallas(x, fp, *, heads, dim_head=64, tied=False, block_b=None,
                     out_dtype=jnp.float32, compute_dtype=jnp.bfloat16):
    """x: (B, N, D) float32. `fp` = prepare_attention_params(...) output."""
    B, N, D = x.shape

    if block_b is None:
        block_b = _choose_block_b(B, N, D, heads, dim_head)
    assert B % block_b == 0

    if tied:
        params = [fp['wv'], fp['wg'], fp['bg'], fp['wo'],
                  fp['bo'], fp['lng'], fp['lnb']]
        kern = functools.partial(_attn_tied_kernel, heads=heads,
                                 dim_head=dim_head, eps=LN_EPS,
                                 compute_dtype=compute_dtype)
    else:
        params = [fp['whb'], fp['bg_h'], fp['wo_h'],
                  fp['bo'], fp['lng'], fp['lnb']]
        kern = functools.partial(_attn_kernel, heads=heads, dim_head=dim_head,
                                 eps=LN_EPS, compute_dtype=compute_dtype)

    in_specs = [pl.BlockSpec((block_b, N, D), lambda i: (i, 0, 0))]
    for a in params:                     # weights/biases resident: same block every step
        in_specs.append(pl.BlockSpec(a.shape, lambda i, nd=a.ndim: (0,) * nd))

    est = _vmem_estimate(block_b, N, D, heads, dim_head,
                         out_bytes=jnp.dtype(out_dtype).itemsize)
    vmem_limit = int(min(64 * 2**20, max(32 * 2**20, est * 5 // 4)))

    return pl.pallas_call(
        kern,
        out_shape=jax.ShapeDtypeStruct((B, N, D), out_dtype),
        grid=(B // block_b,),
        in_specs=in_specs,
        out_specs=pl.BlockSpec((block_b, N, D), lambda i: (i, 0, 0)),
        compiler_params=pltpu.CompilerParams(
            dimension_semantics=("parallel",),
            vmem_limit_bytes=vmem_limit),
    )(x, *params)


# ----------------------------------------------------------------------------
# Deterministic parameter init (shapes from the PyTorch __init__, (in,out) layout)
# ----------------------------------------------------------------------------
def init_params(key, dim, heads, dim_head):
    inner = heads * dim_head
    ks = jax.random.split(key, 8)

    def nrm(k, shape, s=0.02):
        return jax.random.normal(k, shape, jnp.float32) * s

    return dict(
        wq=nrm(ks[0], (dim, inner)),
        wk=nrm(ks[1], (dim, inner)),
        wv=nrm(ks[2], (dim, inner)),
        # PyTorch inits gating.weight to 0 / bias to 1; small noise is used here so the
        # gating matmul path is actually exercised numerically (forward math unchanged).
        wg=nrm(ks[3], (dim, inner)),
        bg=jnp.ones((1, inner), jnp.float32),
        wo=nrm(ks[4], (inner, dim)),
        bo=nrm(ks[5], (1, dim), 0.01),
        lng=jnp.ones((1, dim), jnp.float32) + nrm(ks[6], (1, dim), 0.05),
        lnb=nrm(ks[7], (1, dim), 0.05),
    )


# ----------------------------------------------------------------------------
# Pure-JAX reference (literal PyTorch semantics, f32) for verification
# ----------------------------------------------------------------------------
def _ref_ln(x, g, b, eps=LN_EPS):
    mu = x.mean(-1, keepdims=True)
    var = ((x - mu) ** 2).mean(-1, keepdims=True)
    return (x - mu) / jnp.sqrt(var + eps) * g + b


def ref_attention(x, p, heads, dim_head, tied):
    B, N, D = x.shape
    inner = heads * dim_head
    scale = dim_head ** -0.5
    q = (x @ p['wq']).reshape(B, N, heads, dim_head).transpose(0, 2, 1, 3) * scale
    k = (x @ p['wk']).reshape(B, N, heads, dim_head).transpose(0, 2, 1, 3)
    v = (x @ p['wv']).reshape(B, N, heads, dim_head).transpose(0, 2, 1, 3)
    if tied:
        # dots -> rowwise mean (b,h,n,1); expand_as(no-op); softmax over size-1 == 1;
        # the final einsum broadcasts the contracted axis  =>  out[i] = sum_j v[j].
        out = jnp.broadcast_to(v.sum(axis=2, keepdims=True), v.shape)
    else:
        dots = jnp.einsum('bhid,bhjd->bhij', q, k)
        attn = jax.nn.softmax(dots, axis=-1)
        out = jnp.einsum('bhij,bhjd->bhid', attn, v)
    out = out.transpose(0, 2, 1, 3).reshape(B, N, inner)
    gates = x @ p['wg'] + p['bg'][0]
    out = out * jax.nn.sigmoid(gates)
    out = out @ p['wo'] + p['bo'][0]
    out = x + out
    return _ref_ln(out, p['lng'][0], p['lnb'][0])


# ----------------------------------------------------------------------------
if __name__ == "__main__":
    dim, heads, dim_head = 128, 2, 64          # inner = 128 (lane-dense output)
    batch, seq = 16, 32                        # auto block_b=4 -> grid of 4 even steps

    key = jax.random.PRNGKey(0)
    kp, kx = jax.random.split(key)
    params = init_params(kp, dim, heads, dim_head)
    fused = prepare_attention_params(params, heads=heads, dim_head=dim_head)
    x = jax.random.normal(kx, (batch, seq, dim), jnp.float32)

    # regular softmax attention (tied=False)
    out = jax.block_until_ready(
        attention_pallas(x, fused, heads=heads, dim_head=dim_head, tied=False))
    assert out.shape == (batch, seq, dim)
    ref = ref_attention(x, params, heads, dim_head, tied=False)
    np.testing.assert_allclose(np.asarray(out), np.asarray(ref),
                               rtol=2e-2, atol=2e-2)

    # tied row attention (tied=True)
    out_t = jax.block_until_ready(
        attention_pallas(x, fused, heads=heads, dim_head=dim_head, tied=True))
    ref_t = ref_attention(x, params, heads, dim_head, tied=True)
    np.testing.assert_allclose(np.asarray(out_t), np.asarray(ref_t),
                               rtol=2e-2, atol=2e-2)

    print("KERNEL_OK")
</pallas_src>

<mosaic_0001>
module attributes {stable_mosaic.version = 11 : i64} {
  func.func @_attn_kernel(%arg0: i32, %arg1: memref<4x32x128xf32, #tpu.memory_space<vmem>>, %arg2: memref<2x128x256xbf16, #tpu.memory_space<vmem>>, %arg3: memref<2x1x64xf32, #tpu.memory_space<vmem>>, %arg4: memref<2x64x128xbf16, #tpu.memory_space<vmem>>, %arg5: memref<1x128xf32, #tpu.memory_space<vmem>>, %arg6: memref<1x128xf32, #tpu.memory_space<vmem>>, %arg7: memref<1x128xf32, #tpu.memory_space<vmem>>, %arg8: memref<4x32x128xf32, #tpu.memory_space<vmem>>) attributes {dimension_semantics = [#tpu.dimension_semantics<parallel>], iteration_bounds = array<i64: 4>, scalar_prefetch = 0 : i64, scratch_operands = 0 : i64, tpu.core_type = #tpu.core_type<tc>, window_params = [{transform_indices = @transform_0, window_bounds = array<i64: 4, 32, 128>}, {pipeline_mode = #tpu.pipeline_mode<synchronous>, transform_indices = @transform_1, window_bounds = array<i64: 2, 128, 256>}, {pipeline_mode = #tpu.pipeline_mode<synchronous>, transform_indices = @transform_2, window_bounds = array<i64: 2, 1, 64>}, {pipeline_mode = #tpu.pipeline_mode<synchronous>, transform_indices = @transform_3, window_bounds = array<i64: 2, 64, 128>}, {pipeline_mode = #tpu.pipeline_mode<synchronous>, transform_indices = @transform_4, window_bounds = array<i64: 1, 128>}, {pipeline_mode = #tpu.pipeline_mode<synchronous>, transform_indices = @transform_5, window_bounds = array<i64: 1, 128>}, {pipeline_mode = #tpu.pipeline_mode<synchronous>, transform_indices = @transform_6, window_bounds = array<i64: 1, 128>}, {transform_indices = @transform_7, window_bounds = array<i64: 4, 32, 128>}]} {
    %c0 = arith.constant 0 : index
    %c0_0 = arith.constant 0 : index
    %c0_1 = arith.constant 0 : index
    %0 = vector.load %arg1[%c0, %c0_0, %c0_1] : memref<4x32x128xf32, #tpu.memory_space<vmem>>, vector<4x32x128xf32>
    %1 = vector.shape_cast %0 : vector<4x32x128xf32> to vector<128x128xf32>
    %2 = arith.truncf %1 : vector<128x128xf32> to vector<128x128xbf16>
    %3 = vector.shape_cast %2 : vector<128x128xbf16> to vector<1x128x128xbf16>
    %4 = vector.shape_cast %3 : vector<1x128x128xbf16> to vector<1x128x128xbf16>
    %5 = vector.broadcast %4 : vector<1x128x128xbf16> to vector<2x128x128xbf16>
    %c0_2 = arith.constant 0 : index
    %c0_3 = arith.constant 0 : index
    %c0_4 = arith.constant 0 : index
    %6 = vector.load %arg2[%c0_2, %c0_3, %c0_4] : memref<2x128x256xbf16, #tpu.memory_space<vmem>>, vector<2x128x256xbf16>
    "tpu.trace_start"() <{level = 10 : i32, message = "hmd,hdf->hmf"}> : () -> ()
    %cst = arith.constant dense<0.000000e+00> : vector<2x128x256xf32>
    %7 = tpu.matmul %5, %6, %cst {dimension_numbers = #tpu.dot_dimension_numbers<[2], [1], [1], [2], [0, 0, 0, 1, 1, 2], [0], [0]>} : vector<2x128x128xbf16>, vector<2x128x256xbf16>, vector<2x128x256xf32> -> vector<2x128x256xf32>
    "tpu.trace_stop"() : () -> ()
    %8 = vector.extract_strided_slice %7 {offsets = [0, 0, 0], sizes = [2, 128, 192], strides = [1, 1, 1]} : vector<2x128x256xf32> to vector<2x128x192xf32>
    %9 = arith.truncf %8 : vector<2x128x192xf32> to vector<2x128x192xbf16>
    %10 = vector.extract_strided_slice %7 {offsets = [0, 0, 192], sizes = [2, 128, 64], strides = [1, 1, 1]} : vector<2x128x256xf32> to vector<2x128x64xf32>
    %c0_5 = arith.constant 0 : index
    %c0_6 = arith.constant 0 : index
    %c0_7 = arith.constant 0 : index
    %11 = vector.load %arg3[%c0_5, %c0_6, %c0_7] : memref<2x1x64xf32, #tpu.memory_space<vmem>>, vector<2x1x64xf32>
    %12 = vector.broadcast %11 : vector<2x1x64xf32> to vector<2x128x64xf32>
    %13 = arith.addf %10, %12 : vector<2x128x64xf32>
    %14 = vector.extract_strided_slice %9 {offsets = [0, 0, 0], sizes = [2, 128, 64], strides = [1, 1, 1]} : vector<2x128x192xbf16> to vector<2x128x64xbf16>
    %15 = vector.shape_cast %14 : vector<2x128x64xbf16> to vector<8x32x64xbf16>
    %16 = vector.extract_strided_slice %9 {offsets = [0, 0, 64], sizes = [2, 128, 64], strides = [1, 1, 1]} : vector<2x128x192xbf16> to vector<2x128x64xbf16>
    %17 = vector.shape_cast %16 : vector<2x128x64xbf16> to vector<8x32x64xbf16>
    %18 = vector.extract_strided_slice %9 {offsets = [0, 0, 128], sizes = [2, 128, 64], strides = [1, 1, 1]} : vector<2x128x192xbf16> to vector<2x128x64xbf16>
    %19 = vector.shape_cast %18 : vector<2x128x64xbf16> to vector<8x32x64xbf16>
    "tpu.trace_start"() <{level = 10 : i32, message = "bid,bjd->bij"}> : () -> ()
    %cst_8 = arith.constant dense<0.000000e+00> : vector<8x32x32xf32>
    %20 = tpu.matmul %15, %17, %cst_8 {dimension_numbers = #tpu.dot_dimension_numbers<[2], [2], [1], [1], [0, 0, 0, 1, 1, 1], [0], [0]>} : vector<8x32x64xbf16>, vector<8x32x64xbf16>, vector<8x32x32xf32> -> vector<8x32x32xf32>
    "tpu.trace_stop"() : () -> ()
    %cst_9 = arith.constant dense<0xFF800000> : vector<8x32xf32>
    %21 = vector.multi_reduction <maximumf>, %20, %cst_9 [2] : vector<8x32x32xf32> to vector<8x32xf32>
    %22 = vector.shape_cast %21 : vector<8x32xf32> to vector<8x32x1xf32>
    %23 = vector.broadcast %22 : vector<8x32x1xf32> to vector<8x32x32xf32>
    %24 = arith.subf %20, %23 : vector<8x32x32xf32>
    %25 = math.exp %24 : vector<8x32x32xf32>
    %cst_10 = arith.constant dense<0.000000e+00> : vector<8x32xf32>
    %26 = vector.multi_reduction <add>, %25, %cst_10 [2] : vector<8x32x32xf32> to vector<8x32xf32>
    %27 = vector.shape_cast %26 : vector<8x32xf32> to vector<8x32x1xf32>
    %28 = tpu.reciprocal %27 {approx = true} : vector<8x32x1xf32> -> vector<8x32x1xf32>
    %29 = vector.broadcast %28 : vector<8x32x1xf32> to vector<8x32x32xf32>
    %30 = arith.mulf %25, %29 : vector<8x32x32xf32>
    %31 = arith.truncf %30 : vector<8x32x32xf32> to vector<8x32x32xbf16>
    "tpu.trace_start"() <{level = 10 : i32, message = "bij,bjd->bid"}> : () -> ()
    %cst_11 = arith.constant dense<0.000000e+00> : vector<8x32x64xf32>
    %32 = tpu.matmul %31, %19, %cst_11 {dimension_numbers = #tpu.dot_dimension_numbers<[2], [1], [1], [2], [0, 0, 0, 1, 1, 2], [0], [0]>} : vector<8x32x32xbf16>, vector<8x32x64xbf16>, vector<8x32x64xf32> -> vector<8x32x64xf32>
    "tpu.trace_stop"() : () -> ()
    %33 = vector.shape_cast %32 : vector<8x32x64xf32> to vector<2x128x64xf32>
    %34 = arith.negf %13 : vector<2x128x64xf32>
    %35 = math.exp %34 : vector<2x128x64xf32>
    %cst_12 = arith.constant 1.000000e+00 : f32
    %36 = vector.broadcast %cst_12 : f32 to vector<2x128x64xf32>
    %37 = arith.addf %36, %35 : vector<2x128x64xf32>
    %38 = arith.divf %36, %37 : vector<2x128x64xf32>
    %39 = arith.mulf %33, %38 : vector<2x128x64xf32>
    %40 = arith.truncf %39 : vector<2x128x64xf32> to vector<2x128x64xbf16>
    %41 = vector.extract_strided_slice %40 {offsets = [0, 0, 0], sizes = [1, 128, 64], strides = [1, 1, 1]} : vector<2x128x64xbf16> to vector<1x128x64xbf16>
    %42 = vector.shape_cast %41 : vector<1x128x64xbf16> to vector<128x64xbf16>
    %c0_13 = arith.constant 0 : index
    %c0_14 = arith.constant 0 : index
    %c0_15 = arith.constant 0 : index
    %43 = vector.load %arg4[%c0_13, %c0_14, %c0_15] : memref<2x64x128xbf16, #tpu.memory_space<vmem>>, vector<1x64x128xbf16>
    %44 = vector.shape_cast %43 : vector<1x64x128xbf16> to vector<64x128xbf16>
    %cst_16 = arith.constant dense<0.000000e+00> : vector<128x128xf32>
    %45 = tpu.matmul %42, %44, %cst_16 {dimension_numbers = #tpu.dot_dimension_numbers<[1], [0], [0], [1], [0, 0, 1, 1], [], []>} : vector<128x64xbf16>, vector<64x128xbf16>, vector<128x128xf32> -> vector<128x128xf32>
    %46 = vector.extract_strided_slice %40 {offsets = [1, 0, 0], sizes = [1, 128, 64], strides = [1, 1, 1]} : vector<2x128x64xbf16> to vector<1x128x64xbf16>
    %47 = vector.shape_cast %46 : vector<1x128x64xbf16> to vector<128x64xbf16>
    %c1 = arith.constant 1 : index
    %c0_17 = arith.constant 0 : index
    %c0_18 = arith.constant 0 : index
    %48 = vector.load %arg4[%c1, %c0_17, %c0_18] : memref<2x64x128xbf16, #tpu.memory_space<vmem>>, vector<1x64x128xbf16>
    %49 = vector.shape_cast %48 : vector<1x64x128xbf16> to vector<64x128xbf16>
    %cst_19 = arith.constant dense<0.000000e+00> : vector<128x128xf32>
    %50 = tpu.matmul %47, %49, %cst_19 {dimension_numbers = #tpu.dot_dimension_numbers<[1], [0], [0], [1], [0, 0, 1, 1], [], []>} : vector<128x64xbf16>, vector<64x128xbf16>, vector<128x128xf32> -> vector<128x128xf32>
    %51 = arith.addf %45, %50 : vector<128x128xf32>
    %52 = vector.shape_cast %51 : vector<128x128xf32> to vector<4x32x128xf32>
    %c0_20 = arith.constant 0 : index
    %c0_21 = arith.constant 0 : index
    %53 = vector.load %arg5[%c0_20, %c0_21] : memref<1x128xf32, #tpu.memory_space<vmem>>, vector<1x128xf32>
    %54 = vector.shape_cast %53 : vector<1x128xf32> to vector<1x1x128xf32>
    %55 = vector.broadcast %54 : vector<1x1x128xf32> to vector<4x32x128xf32>
    %56 = arith.addf %52, %55 : vector<4x32x128xf32>
    %57 = arith.addf %0, %56 : vector<4x32x128xf32>
    %c0_22 = arith.constant 0 : index
    %c0_23 = arith.constant 0 : index
    %58 = vector.load %arg6[%c0_22, %c0_23] : memref<1x128xf32, #tpu.memory_space<vmem>>, vector<1x128xf32>
    %c0_24 = arith.constant 0 : index
    %c0_25 = arith.constant 0 : index
    %59 = vector.load %arg7[%c0_24, %c0_25] : memref<1x128xf32, #tpu.memory_space<vmem>>, vector<1x128xf32>
    %cst_26 = arith.constant dense<0.000000e+00> : vector<4x32xf32>
    %60 = vector.multi_reduction <add>, %57, %cst_26 [2] : vector<4x32x128xf32> to vector<4x32xf32>
    %61 = vector.shape_cast %60 : vector<4x32xf32> to vector<4x32x1xf32>
    %cst_27 = arith.constant 1.280000e+02 : f32
    %62 = vector.broadcast %cst_27 : f32 to vector<4x32x1xf32>
    %63 = arith.divf %61, %62 : vector<4x32x1xf32>
    %64 = vector.broadcast %63 : vector<4x32x1xf32> to vector<4x32x128xf32>
    %65 = arith.subf %57, %64 : vector<4x32x128xf32>
    %66 = arith.mulf %65, %65 : vector<4x32x128xf32>
    %cst_28 = arith.constant dense<0.000000e+00> : vector<4x32xf32>
    %67 = vector.multi_reduction <add>, %66, %cst_28 [2] : vector<4x32x128xf32> to vector<4x32xf32>
    %68 = vector.shape_cast %67 : vector<4x32xf32> to vector<4x32x1xf32>
    %cst_29 = arith.constant 1.280000e+02 : f32
    %69 = vector.broadcast %cst_29 : f32 to vector<4x32x1xf32>
    %70 = arith.divf %68, %69 : vector<4x32x1xf32>
    %cst_30 = arith.constant 9.99999974E-6 : f32
    %71 = vector.broadcast %cst_30 : f32 to vector<4x32x1xf32>
    %72 = arith.addf %70, %71 : vector<4x32x1xf32>
    %73 = math.rsqrt %72 : vector<4x32x1xf32>
    %74 = vector.broadcast %73 : vector<4x32x1xf32> to vector<4x32x128xf32>
    %75 = arith.mulf %65, %74 : vector<4x32x128xf32>
    %76 = vector.shape_cast %58 : vector<1x128xf32> to vector<1x1x128xf32>
    %77 = vector.broadcast %76 : vector<1x1x128xf32> to vector<4x32x128xf32>
    %78 = arith.mulf %75, %77 : vector<4x32x128xf32>
    %79 = vector.shape_cast %59 : vector<1x128xf32> to vector<1x1x128xf32>
    %80 = vector.broadcast %79 : vector<1x1x128xf32> to vector<4x32x128xf32>
    %81 = arith.addf %78, %80 : vector<4x32x128xf32>
    %c0_31 = arith.constant 0 : index
    %c0_32 = arith.constant 0 : index
    %c0_33 = arith.constant 0 : index
    %82 = vector.load %arg8[%c0_31, %c0_32, %c0_33] : memref<4x32x128xf32, #tpu.memory_space<vmem>>, vector<4x32x128xf32>
    tpu.vector_store %arg8[%c0_31, %c0_32, %c0_33], %81 {strides = array<i32>} : memref<4x32x128xf32, #tpu.memory_space<vmem>>, vector<4x32x128xf32>,
    return
  }
  func.func @transform_0(%arg0: i32) -> (i32, i32, i32) {
    %c0_i32 = arith.constant 0 : i32
    %c0_i32_0 = arith.constant 0 : i32
    %c0_i32_1 = arith.constant 0 : i32
    return %arg0, %c0_i32, %c0_i32_0 : i32, i32, i32
  }
  func.func @transform_1(%arg0: i32) -> (i32, i32, i32) {
    %c0_i32 = arith.constant 0 : i32
    %c0_i32_0 = arith.constant 0 : i32
    %c0_i32_1 = arith.constant 0 : i32
    %c0_i32_2 = arith.constant 0 : i32
    return %c0_i32, %c0_i32_0, %c0_i32_1 : i32, i32, i32
  }
  func.func @transform_2(%arg0: i32) -> (i32, i32, i32) {
    %c0_i32 = arith.constant 0 : i32
    %c0_i32_0 = arith.constant 0 : i32
    %c0_i32_1 = arith.constant 0 : i32
    %c0_i32_2 = arith.constant 0 : i32
    return %c0_i32, %c0_i32_0, %c0_i32_1 : i32, i32, i32
  }
  func.func @transform_3(%arg0: i32) -> (i32, i32, i32) {
    %c0_i32 = arith.constant 0 : i32
    %c0_i32_0 = arith.constant 0 : i32
    %c0_i32_1 = arith.constant 0 : i32
    %c0_i32_2 = arith.constant 0 : i32
    return %c0_i32, %c0_i32_0, %c0_i32_1 : i32, i32, i32
  }
  func.func @transform_4(%arg0: i32) -> (i32, i32) {
    %c0_i32 = arith.constant 0 : i32
    %c0_i32_0 = arith.constant 0 : i32
    %c0_i32_1 = arith.constant 0 : i32
    return %c0_i32, %c0_i32_0 : i32, i32
  }
  func.func @transform_5(%arg0: i32) -> (i32, i32) {
    %c0_i32 = arith.constant 0 : i32
    %c0_i32_0 = arith.constant 0 : i32
    %c0_i32_1 = arith.constant 0 : i32
    return %c0_i32, %c0_i32_0 : i32, i32
  }
  func.func @transform_6(%arg0: i32) -> (i32, i32) {
    %c0_i32 = arith.constant 0 : i32
    %c0_i32_0 = arith.constant 0 : i32
    %c0_i32_1 = arith.constant 0 : i32
    return %c0_i32, %c0_i32_0 : i32, i32
  }
  func.func @transform_7(%arg0: i32) -> (i32, i32, i32) {
    %c0_i32 = arith.constant 0 : i32
    %c0_i32_0 = arith.constant 0 : i32
    %c0_i32_1 = arith.constant 0 : i32
    return %arg0, %c0_i32, %c0_i32_0 : i32, i32, i32
  }
}

</mosaic_0001>

<bundles_post_ra>
// kernel: tpu_custom_call.1
= control target key start
LH: loop header
LB: loop body
LE: loop exit
PB: predicated region body
PF: predicated region fallthrough
CT: control target
= control target key end

     0   :  { %s6540_s0 = inlined_call_operand.hbm [shape: f32[16,32,128], index: 0, kind: input, shape index: {}]   ;;  %s6541_s1 = inlined_call_operand.hbm [shape: bf16[2,128,256], index: 1, kind: input, shape index: {}]   ;;  %s6542_s2 = inlined_call_operand.hbm [shape: f32[2,1,64], index: 2, kind: input, shape index: {}]   ;;  %s6543_s3 = inlined_call_operand.hbm [shape: bf16[2,64,128], index: 3, kind: input, shape index: {}]   ;;  %s6544_s4 = inlined_call_operand.vmem [shape: f32[1,128], index: 4, kind: input, shape index: {}]   ;;  %s6545_s5 = inlined_call_operand.vmem [shape: f32[1,128], index: 5, kind: input, shape index: {}]   ;;  %s6546_s6 = inlined_call_operand.vmem [shape: f32[1,128], index: 6, kind: input, shape index: {}]   ;;  %s6547_s7 = inlined_call_operand.hbm [shape: f32[16,32,128], index: 7, kind: output, shape index: {}]  }
   0x1   :  { %6575 = sst [smem:[#allocation40_spill]] %s6541_s1 }
   0x2   :  { %12 = vsyncpa [#allocation3], 0 }
   0x3   :  { %14 = vsyncpa [#allocation3 + $0x1], 0 }
   0x4   :  { %15 = vsyncpa [#allocation6], 0 }
   0x5   :  { %16 = vsyncpa [#allocation9], 0 }
   0x6   :  { %17 = vsyncpa [#allocation4], 0 }
   0x7   :  { %19 = vsyncpa [#allocation4 + $0x1], 0  ;;  %s4617_s24 = smov 0   ;;  %s4619_s25 = smov 0  }
   0x8   :  { %s4621_s26 = smov 0   ;;  %s4623_s27 = smov 0  }
   0x9 LB: > { %s4638_s28 = sadd.s32 4294967295, %s4562_s27   ;;  %s3648_s29 = sadd.s32 4294967294, %s4562_s27   ;;  %s4562_s27 = sphi %s4623_s27, %s6716_s27   ;;  %s4558_s26 = sphi %s4621_s26, %s6715_s26   ;;  %s4554_s25 = sphi %s4619_s25, %s6714_s25   ;;  %s4550_s24 = sphi %s4617_s24, %s6713_s24  }
   0xa   : > { %p45_p0 = scmp.ne.s32.totalorder %s4554_s25, %s4550_s24  ;;  %p46_p1 = scmp.eq.s32.totalorder %s4638_s28, 0 }
   0xb   : > { %p195_p2 = scmp.eq.s32.totalorder %s4638_s28, 3  ;;  %p201_p3 = scmp.eq.s32.totalorder %s3648_s29, 3 }
   0xc   : > { %p4647_p4 = por %p46_p1, %p45_p0  ;;  %p3649_p5 = scmp.ge.s32.totalorder %s4562_s27, 1 }
   0xd   : > { %p4652_p6 = por %p201_p3, %p45_p0  ;;  %p208_p7 = scmp.lt.s32.totalorder %s4562_s27, 5 }
   0xe   : > { %s6578_s1 = sld [smem:[#allocation40_spill]]  ;;  %s4564_s13 = smov [#allocation5]  }
   0xf   : > { %p4660_p8 = pnand %p3649_p5, %p208_p7  ;;  %s221_s14 = sshll.u32 %s4564_s13, 4  ;;  %s222_s14 = int_to_ptr.vmem [resolvable:$true] %s221_s14 }
  0x10   : > { %s233_s18 = sshll.u32 %s6542_s2, 4  ;;  %s6548_s19 = smov 128   ;;  %s234_s18 = int_to_ptr.hbm [resolvable:$true] %s233_s18 }
  0x11   : > { %p3986_p9 = pneg %p4660_p8  ;;  %s6549_s20 = smov 8  }
  0x12   : > { %s4567_s21 = smov [#allocation7]   ;;  %s4568_s23 = smov 16  }
  0x13   : > { %p4668_p10 = pnand %p3986_p9, %p46_p1  ;;  %s235_s22 = sshll.u32 %s4567_s21, 4  ;;  %s236_s22 = int_to_ptr.vmem [resolvable:$true] %s235_s22 }
  0x14   : > { %s219_s11 = sshll.u32 %s6578_s1, 4  ;;  %s4569_s29 = smov 1   ;;  %s220_s11 = int_to_ptr.hbm [resolvable:$true] %s219_s11 }
  0x15   : > { %3989 = dma.hbm_to_vmem [thread:$0]  (!%p4668_p10), %s220_s11, 4096, %s222_s14, [#allocation6], %s6548_s19, %s6548_s19, %s6549_s20  }
  0x16   : > { %3992 = dma.hbm_to_vmem [thread:$0]  (!%p4668_p10), %s234_s18, 32, %s236_s22, [#allocation6], %s4568_s23, %s4568_s23, %s4569_s29  }
  0x17   : > { %s247_s13 = sshll.u32 %s6543_s3, 4  ;;  %s4570_s11 = smov [#allocation8]   ;;  %s248_s13 = int_to_ptr.hbm [resolvable:$true] %s247_s13 }
  0x18   : > { %s249_s14 = sshll.u32 %s4570_s11, 4  ;;  %s4571_s16 = smov 64   ;;  %s250_s14 = int_to_ptr.vmem [resolvable:$true] %s249_s14 }
  0x19   : > { %s4572_s17 = smov 4   ;;  %s4688_s21 = sadd.s32 1, %s4562_s27  }
  0x1a   : > { %3995 = dma.hbm_to_vmem [thread:$0]  (!%p4668_p10), %s248_s13, 1024, %s250_s14, [#allocation9], %s4571_s16, %s4571_s16, %s4572_s17  }
  0x1b   : > { %s29_s18 = ssub.s32 %s4562_s27, %s4688_s21  ;;  %s32_s22 = sadd.s32 1, %s4558_s26 }
  0x1c   : > { %p30_p11 = scmp.eq.s32.totalorder %s29_s18, 0  ;;  %p39_p12 = scmp.ne.s32.totalorder %s4558_s26, %s4554_s25 }
  0x1d   : > { %p40_p13 = scmp.eq.s32.totalorder %s4562_s27, 0  ;;  %p4007_p3 = scmp.lt.s32.totalorder %s4562_s27, 4 }
  0x1e   : > { %s4697_s23 = scalar_select %p30_p11, %s4558_s26, %s32_s22  }
  0x1f   : > { %p4701_p0 = por %p195_p2, %p39_p12  ;;  %s272_s9 = sand.u32 1, %s4558_s26  }
  0x20   : > { %s3911_s10 = sshll.u32 %s4562_s27, 7  ;;  %p41_p5 = por %p40_p13, %p39_p12 }
  0x21   : > { %s3654_s15 = sshll.u32 %s272_s9, 7  ;;  %s282_s14 = scalar_lea.hbm %s6540_s0, %s3911_s10 }
  0x22   : > { %s283_s16 = sshll.u32 %s282_s14, 4  ;;  %s276_s17 = scalar_lea.vmem [#allocation2], %s3654_s15  ;;  %s284_s16 = int_to_ptr.hbm [resolvable:$true] %s283_s16 }
  0x23   : > { %s285_s18 = sshll.u32 %s276_s17, 4  ;;  %p4711_p7 = pnand %p4007_p3, %p41_p5  ;;  %s286_s18 = int_to_ptr.vmem [resolvable:$true] %s285_s18 }
  0x24   : > { %s273_s19 = scalar_lea.sflag [#allocation3], %s272_s9  ;;  %s4458_s20 = sshra.s32 %s284_s16, 4  ;;  %s4459_s20 = int_to_ptr.hbm [resolvable:$true] %s4458_s20 }
  0x25   : > { %s4460_s1 = scalar_lea.hbm %s4459_s20, 128  ;;  %p4462_p9 = pneg %p4711_p7 }
  0x26   : > { %p4461_p2 = scmp.ne.s32.totalorder %s4459_s20, %s4460_s1  ;;  %s4465_s15 = scalar_lea.hbm %s6540_s0, 512 }
  0x27   : > { %p4466_p12 = scmp.lt.s32.totalorder %s4459_s20, %s6540_s0  ;;  %p4467_p13 = scmp.lt.s32.totalorder %s4465_s15, %s4460_s1 }
  0x28   : > { %p4463_p10 = pnand %p4462_p9, %p4461_p2 }
  0x29   : > { %p4468_p3 = por %p4467_p13, %p4466_p12 }
  0x2a   : > { %p4464_p11 = pneg %p4463_p10 }
  0x2c   : > { %p4469_p5 = pnand %p4468_p3, %p4464_p11 }
  0x2e   : > { %4472 = shalt.err (!%p4469_p5)
}
  0x2f   : > { %s6583_s9 = smov 8   ;;  %s6584_s17 = smov 128  }
  0x30   : > { %3999 = dma.hbm_to_vmem [thread:$0]  (!%p4711_p7), %s284_s16, 2048, %s286_s18, %s273_s19, %s6584_s17, %s6584_s17, %s6583_s9  }
  0x31   : > { %297 = sbr.rel (%p4660_p8) target bundleno = 1755 (0x6db), region = 48 }
  0x36   : > { %s4731_s10 = sand.u32 1, %s4554_s25  }
  0x37   : > { %s3659_s1 = sshll.u32 %s4731_s10, 7  ;;  %s300_s20 = scalar_lea.sflag [#allocation3], %s4731_s10 }
  0x38   : > { %s4737_s13 = scalar_lea.vmem [#allocation2], %s3659_s1 }
  0x39   : > { %4533 = dma.done.wait (%p4647_p4), %s300_s20, 2048  }
  0x3a   : > { %4535 = vsyncadd (%p4647_p4), %s300_s20, 4294965248 }
  0x3b   : > { %4537 = dma.done.wait (%p46_p1), [#allocation6], 4128  }
  0x3c   : > { %4539 = vsyncadd (%p46_p1), [#allocation6], 4294963168 }
  0x3d   : > { %4541 = dma.done.wait (%p46_p1), [#allocation9], 1024  }
  0x3e   : > { %4543 = vsyncadd (%p46_p1), [#allocation9], 4294966272  ;;  %v3722_v0 = vld [vmem:[#allocation5 + $0x70] sm:$0xf]  ;;  %v3927_v1 = vld [vmem:[#allocation5 + $0x74] sm:$0xf0] }
  0x3f   : > { %v3926_v2 = vld [vmem:[#allocation5 + $0x74] sm:$0xf]  ;;  %v3723_v3 = vor.u32 %v3927_v1, %v3722_v0  ;;  %v3724_v4 = vld [vmem:[#allocation5 + $0x78] sm:$0xf0]  ;;  %v3714_v5 = vld [vmem:[#allocation5 + $0x60] sm:$0xf] }
  0x40   : > { %v3925_v6 = vld [vmem:[#allocation5 + $0x64] sm:$0xf0]  ;;  %v3727_v7 = vor.u32 %v3926_v2, %v3724_v4  ;;  %v3924_v8 = vld [vmem:[#allocation5 + $0x64] sm:$0xf]  ;;  %v3716_v9 = vld [vmem:[#allocation5 + $0x68] sm:$0xf0] }
  0x41   : > { %545 = vmatpush.bf16.msra.mxu0 %v3723_v3  ;;  %3954 = vmatpush.bf16.msra.mxu2 %v3723_v3  ;;  %v3715_v10 = vor.u32 %v3925_v6, %v3714_v5  ;;  %v3719_v11 = vor.u32 %v3924_v8, %v3716_v9  ;;  %v3706_v12 = vld [vmem:[#allocation5 + $0x50] sm:$0xf]  ;;  %v3923_v13 = vld [vmem:[#allocation5 + $0x54] sm:$0xf0]  ;;  %v3922_v14 = vld [vmem:[#allocation5 + $0x54] sm:$0xf] }
  0x42   : > { %594 = vmatpush.bf16.msra.mxu1 %v3727_v7  ;;  %3962 = vmatpush.bf16.msra.mxu3 %v3727_v7  ;;  %v3708_v15 = vld [vmem:[#allocation5 + $0x58] sm:$0xf0]  ;;  %v3707_v16 = vor.u32 %v3923_v13, %v3706_v12  ;;  %v3698_v18 = vld [vmem:[#allocation5 + $0x40] sm:$0xf]  ;;  %v3921_v19 = vld [vmem:[#allocation5 + $0x44] sm:$0xf0] }
  0x43   : > { %v3711_v17 = vor.u32 %v3922_v14, %v3708_v15  ;;  %v3920_v20 = vld [vmem:[#allocation5 + $0x44] sm:$0xf]  ;;  %v3700_v21 = vld [vmem:[#allocation5 + $0x48] sm:$0xf0]  ;;  %v3699_v22 = vor.u32 %v3921_v19, %v3698_v18  ;;  %v3690_v24 = vld [vmem:[#allocation5 + $0x30] sm:$0xf] }
  0x44   : > { %v3703_v23 = vor.u32 %v3920_v20, %v3700_v21  ;;  %v3919_v25 = vld [vmem:[#allocation5 + $0x34] sm:$0xf0]  ;;  %v3918_v26 = vld [vmem:[#allocation5 + $0x34] sm:$0xf]  ;;  %v3692_v27 = vld [vmem:[#allocation5 + $0x38] sm:$0xf0] }
  0x45   : > { %546 = vmatpush.bf16.msra.mxu0 %v3715_v10  ;;  %3955 = vmatpush.bf16.msra.mxu2 %v3715_v10  ;;  %v3691_v28 = vor.u32 %v3919_v25, %v3690_v24  ;;  %v3695_v29 = vor.u32 %v3918_v26, %v3692_v27  ;;  %v3682_v30 = vld [vmem:[#allocation5 + $0x20] sm:$0xf]  ;;  %v3917_v31 = vld [vmem:[#allocation5 + $0x24] sm:$0xf0]  ;;  %v3916_v32 = vld [vmem:[#allocation5 + $0x24] sm:$0xf] }
  0x46   : > { %595 = vmatpush.bf16.msra.mxu1 %v3719_v11  ;;  %3963 = vmatpush.bf16.msra.mxu3 %v3719_v11  ;;  %v3684_v33 = vld [vmem:[#allocation5 + $0x28] sm:$0xf0]  ;;  %v353_v34 = vld [vmem:[%s4737_s13] sm:$0xff]  ;;  %v3683_v35 = vor.u32 %v3917_v31, %v3682_v30  ;;  %v3674_v40 = vld [vmem:[#allocation5 + $0x10] sm:$0xf]  ;;  %s4573_s30 = smov 64  }
  0x47   : > { %v354_v36 = vld [vmem:[%s4737_s13 + $0x8] sm:$0xff]  ;;  %v361_v37 = vld [vmem:[%s4737_s13 + $0x40] sm:$0xff]  ;;  %v3687_v39 = vor.u32 %v3916_v32, %v3684_v33  ;;  %v3915_v41 = vld [vmem:[#allocation5 + $0x14] sm:$0xf0]  ;;  %v369_v44 = vpack.c.bf16 %v353_v34, %v353_v34  ;;  %vm971_vm0 = vcmask 523264   ;;  %vm1290_vm1 = vcmask 261120  }
  0x48   : > { %v362_v38 = vld [vmem:[%s4737_s13 + $0x48] sm:$0xff]  ;;  %v3914_v42 = vld [vmem:[#allocation5 + $0x14] sm:$0xf]  ;;  %v3676_v43 = vld [vmem:[#allocation5 + $0x18] sm:$0xf0]  ;;  %v370_v45 = vpack.c.bf16 %v354_v36, %v354_v36  ;;  %v377_v46 = vpack.c.bf16 %v361_v37, %v361_v37  ;;  %v3675_v48 = vor.u32 %v3915_v41, %v3674_v40  ;;  %s6431_s11 = scalar_lea.vmem [#allocation10], %s3659_s1 }
  0x49   : > { %547 = vmatpush.bf16.msra.mxu0 %v3707_v16  ;;  %3956 = vmatpush.bf16.msra.mxu2 %v3707_v16  ;;  %v378_v47 = vpack.c.bf16 %v362_v38, %v362_v38  ;;  %v3679_v49 = vor.u32 %v3914_v42, %v3676_v43  ;;  %v3666_v50 = vld [vmem:[#allocation5] sm:$0xf]  ;;  %v3913_v51 = vld [vmem:[#allocation5 + $0x4] sm:$0xf0]  ;;  %v3912_v52 = vld [vmem:[#allocation5 + $0x4] sm:$0xf]  ;;  %v433_v54 = vunpack.c.l.b16 %v369_v44 }
  0x4a   : > { %596 = vmatpush.bf16.msra.mxu1 %v3711_v17  ;;  %3964 = vmatpush.bf16.msra.mxu3 %v3711_v17  ;;  %v3668_v53 = vld [vmem:[#allocation5 + $0x8] sm:$0xf0]  ;;  %v434_v55 = vunpack.c.l.b16 %v370_v45  ;;  %v441_v56 = vunpack.c.l.b16 %v377_v46  ;;  %v3667_v58 = vor.u32 %v3913_v51, %v3666_v50  ;;  %v355_v62 = vld [vmem:[%s4737_s13 + $0x10] sm:$0xff]  ;;  %v356_v63 = vld [vmem:[%s4737_s13 + $0x18] sm:$0xff]  ;;  %s3953_s14 = sshll.u32 %s4638_s28, 7  ;;  %s3543_s20 = sshll.u32 %s6431_s11, 4  ;;  %s3544_s20 = int_to_ptr.vmem [resolvable:$true] %s3543_s20 }
  0x4b   : > { %v442_v57 = vunpack.c.l.b16 %v378_v47  ;;  %v3671_v59 = vor.u32 %v3912_v52, %v3668_v53  ;;  %v3786_v0 = vld [vmem:[#allocation5 + $0xf0] sm:$0xf]  ;;  %v3943_v1 = vld [vmem:[#allocation5 + $0xf4] sm:$0xf0]  ;;  %v3942_v2 = vld [vmem:[#allocation5 + $0xf4] sm:$0xf]  ;;  %v371_v16 = vpack.c.bf16 %v355_v62, %v355_v62  ;;  %v372_v17 = vpack.c.bf16 %v356_v63, %v356_v63  ;;  %s3542_s1 = scalar_lea.hbm %s6547_s7, %s3953_s14 }
  0x4c   : > { %v4755_v60 = vpack.c.b16 %v434_v55, %v433_v54  ;;  %v363_v3 = vld [vmem:[%s4737_s13 + $0x50] sm:$0xff]  ;;  %v364_v4 = vld [vmem:[%s4737_s13 + $0x58] sm:$0xff]  ;;  %v3787_v5 = vor.u32 %v3943_v1, %v3786_v0  ;;  %v3778_v8 = vld [vmem:[#allocation5 + $0xe0] sm:$0xf]  ;;  %s3545_s28 = sshll.u32 %s3542_s1, 4  ;;  %s4508_s18 = scalar_lea.hbm %s6547_s7, 512  ;;  %s3546_s28 = int_to_ptr.hbm [resolvable:$true] %s3545_s28 }
  0x4d   : > { %548 = vmatpush.bf16.msra.mxu0 %v3699_v22  ;;  %3957 = vmatpush.bf16.msra.mxu2 %v3699_v22  ;;  %v4757_v61 = vpack.c.b16 %v442_v57, %v441_v56  ;;  %v3788_v6 = vld [vmem:[#allocation5 + $0xf8] sm:$0xf0]  ;;  %v3941_v9 = vld [vmem:[#allocation5 + $0xe4] sm:$0xf0]  ;;  %v3940_v10 = vld [vmem:[#allocation5 + $0xe4] sm:$0xf]  ;;  %v379_v18 = vpack.c.bf16 %v363_v3, %v363_v3  ;;  %v380_v19 = vpack.c.bf16 %v364_v4, %v364_v4  ;;  %v435_v26 = vunpack.c.l.b16 %v371_v16 }
  0x4e   : > { %597 = vmatpush.bf16.msra.mxu1 %v3703_v23  ;;  %3965 = vmatpush.bf16.msra.mxu3 %v3703_v23  ;;  %v3791_v7 = vor.u32 %v3942_v2, %v3788_v6  ;;  %v3779_v11 = vor.u32 %v3941_v9, %v3778_v8  ;;  %v3780_v12 = vld [vmem:[#allocation5 + $0xe8] sm:$0xf0]  ;;  %v3770_v14 = vld [vmem:[#allocation5 + $0xd0] sm:$0xf]  ;;  %v3939_v15 = vld [vmem:[#allocation5 + $0xd4] sm:$0xf0]  ;;  %v436_v27 = vunpack.c.l.b16 %v372_v17 }
  0x4f   : > { %v3783_v13 = vor.u32 %v3940_v10, %v3780_v12  ;;  %v3938_v20 = vld [vmem:[#allocation5 + $0xd4] sm:$0xf]  ;;  %v3772_v21 = vld [vmem:[#allocation5 + $0xd8] sm:$0xf0]  ;;  %v3771_v22 = vor.u32 %v3939_v15, %v3770_v14  ;;  %v3762_v24 = vld [vmem:[#allocation5 + $0xc0] sm:$0xf] }
  0x50   : > { %v3775_v23 = vor.u32 %v3938_v20, %v3772_v21  ;;  %v3937_v25 = vld [vmem:[#allocation5 + $0xc4] sm:$0xf0]  ;;  %v3936_v30 = vld [vmem:[#allocation5 + $0xc4] sm:$0xf]  ;;  %v3764_v31 = vld [vmem:[#allocation5 + $0xc8] sm:$0xf0]  ;;  %v4767_v34 = vpack.c.b16 %v436_v27, %v435_v26 }
  0x51   : > { %549 = vmatpush.bf16.msra.mxu0 %v3691_v28  ;;  %3958 = vmatpush.bf16.msra.mxu2 %v3691_v28  ;;  %v443_v28 = vunpack.c.l.b16 %v379_v18  ;;  %v3763_v32 = vor.u32 %v3937_v25, %v3762_v24  ;;  %v3767_v33 = vor.u32 %v3936_v30, %v3764_v31  ;;  %v357_v36 = vld [vmem:[%s4737_s13 + $0x20] sm:$0xff]  ;;  %v358_v37 = vld [vmem:[%s4737_s13 + $0x28] sm:$0xff]  ;;  %v3754_v38 = vld [vmem:[#allocation5 + $0xb0] sm:$0xf] }
  0x52   : > { %598 = vmatpush.bf16.msra.mxu1 %v3695_v29  ;;  %3966 = vmatpush.bf16.msra.mxu3 %v3695_v29  ;;  %v444_v29 = vunpack.c.l.b16 %v380_v19  ;;  %v3934_v40 = vld [vmem:[#allocation5 + $0xb4] sm:$0xf]  ;;  %v365_v41 = vld [vmem:[%s4737_s13 + $0x60] sm:$0xff]  ;;  %v366_v42 = vld [vmem:[%s4737_s13 + $0x68] sm:$0xff]  ;;  %v373_v54 = vpack.c.bf16 %v357_v36, %v357_v36  ;;  %v374_v55 = vpack.c.bf16 %v358_v37, %v358_v37 }
  0x53   : > { %v3756_v44 = vld [vmem:[#allocation5 + $0xb8] sm:$0xf0]  ;;  %v3746_v46 = vld [vmem:[#allocation5 + $0xa0] sm:$0xf]  ;;  %v3933_v47 = vld [vmem:[#allocation5 + $0xa4] sm:$0xf0]  ;;  %v381_v56 = vpack.c.bf16 %v365_v41, %v365_v41  ;;  %v382_v57 = vpack.c.bf16 %v366_v42, %v366_v42 }
  0x54   : > { %v3759_v45 = vor.u32 %v3934_v40, %v3756_v44  ;;  %v3748_v50 = vld [vmem:[#allocation5 + $0xa8] sm:$0xf0]  ;;  %v3738_v52 = vld [vmem:[#allocation5 + $0x90] sm:$0xf]  ;;  %v3931_v53 = vld [vmem:[#allocation5 + $0x94] sm:$0xf0]  ;;  %v437_v2 = vunpack.c.l.b16 %v373_v54  ;;  %v438_v3 = vunpack.c.l.b16 %v374_v55 }
  0x55   : > { %550 = vmatpush.bf16.msra.mxu0 %v3683_v35  ;;  %3959 = vmatpush.bf16.msra.mxu2 %v3683_v35  ;;  %v4769_v35 = vpack.c.b16 %v444_v29, %v443_v28  ;;  %v3739_v62 = vor.u32 %v3931_v53, %v3738_v52  ;;  %v3730_v0 = vld [vmem:[#allocation5 + $0x80] sm:$0xf]  ;;  %v3929_v1 = vld [vmem:[#allocation5 + $0x84] sm:$0xf0]  ;;  %v445_v4 = vunpack.c.l.b16 %v381_v56  ;;  %v3928_v6 = vld [vmem:[#allocation5 + $0x84] sm:$0xf] }
  0x56   : > { %599 = vmatpush.bf16.msra.mxu1 %v3687_v39  ;;  %3967 = vmatpush.bf16.msra.mxu3 %v3687_v39  ;;  %v3935_v39 = vld [vmem:[#allocation5 + $0xb4] sm:$0xf0]  ;;  %v3731_v8 = vor.u32 %v3929_v1, %v3730_v0  ;;  %v451_v10 = vpack.c.b16 %v438_v3, %v437_v2  ;;  %v359_v12 = vld [vmem:[%s4737_s13 + $0x30] sm:$0xff] }
  0x57   : > { %v3755_v43 = vor.u32 %v3935_v39, %v3754_v38  ;;  %v367_v14 = vld [vmem:[%s4737_s13 + $0x70] sm:$0xff]  ;;  %v368_v15 = vld [vmem:[%s4737_s13 + $0x78] sm:$0xff]  ;;  %v375_v16 = vpack.c.bf16 %v359_v12, %v359_v12 }
  0x58   : > { %v383_v18 = vpack.c.bf16 %v367_v14, %v367_v14  ;;  %v384_v19 = vpack.c.bf16 %v368_v15, %v368_v15 }
  0x59   : > { %551 = vmatpush.bf16.msra.mxu0 %v3675_v48  ;;  %3960 = vmatpush.bf16.msra.mxu2 %v3675_v48  ;;  %v3932_v48 = vld [vmem:[#allocation5 + $0xa4] sm:$0xf]  ;;  %v439_v20 = vunpack.c.l.b16 %v375_v16 }
  0x5a   : > { %600 = vmatpush.bf16.msra.mxu1 %v3679_v49  ;;  %3968 = vmatpush.bf16.msra.mxu3 %v3679_v49  ;;  %v3747_v49 = vor.u32 %v3933_v47, %v3746_v46  ;;  %v3751_v51 = vor.u32 %v3932_v48, %v3748_v50 }
  0x5d   : > { %552 = vmatpush.bf16.msra.mxu0 %v3667_v58  ;;  %3961 = vmatpush.bf16.msra.mxu2 %v3667_v58  ;;  %v3930_v58 = vld [vmem:[#allocation5 + $0x94] sm:$0xf] }
  0x5e   : > { %601 = vmatpush.bf16.msra.mxu1 %v3671_v59  ;;  %3969 = vmatpush.bf16.msra.mxu3 %v3671_v59  ;;  %v3740_v59 = vld [vmem:[#allocation5 + $0x98] sm:$0xf0] }
  0x5f   : > { %v3743_v63 = vor.u32 %v3930_v58, %v3740_v59 }
  0x60   : > { %553 = vmatmul.bf16.vlgmr.msra.gmra.mxu0 %v4755_v60  ;;  %573 = vmatmul.bf16.vlgmr.msra.gmra.mxu2 %v4757_v61 }
  0x61   : > { %602 = vmatmul.bf16.vlgmr.msra.gmra.mxu1 %v4755_v60  ;;  %622 = vmatmul.bf16.vlgmr.msra.gmra.mxu3 %v4757_v61 }
  0x62   : > { %723 = vmatpush.bf16.msrb.mxu2 %v3787_v5  ;;  %772 = vmatpush.bf16.msrb.mxu3 %v3791_v7  ;;  %v446_v5 = vunpack.c.l.b16 %v382_v57  ;;  %v3732_v7 = vld [vmem:[#allocation5 + $0x88] sm:$0xf0] }
  0x63   : > { %v3735_v9 = vor.u32 %v3928_v6, %v3732_v7 }
  0x66   : > { %724 = vmatpush.bf16.msrb.mxu2 %v3779_v11  ;;  %773 = vmatpush.bf16.msrb.mxu3 %v3783_v13  ;;  %v4779_v11 = vpack.c.b16 %v446_v5, %v445_v4  ;;  %v360_v13 = vld [vmem:[%s4737_s13 + $0x38] sm:$0xff] }
  0x67   : > { %v376_v17 = vpack.c.bf16 %v360_v13, %v360_v13 }
  0x69   : > { %v440_v21 = vunpack.c.l.b16 %v376_v17 }
  0x6a   : > { %725 = vmatpush.bf16.msrb.mxu2 %v3771_v22  ;;  %774 = vmatpush.bf16.msrb.mxu3 %v3775_v23  ;;  %v447_v22 = vunpack.c.l.b16 %v383_v18  ;;  %v448_v23 = vunpack.c.l.b16 %v384_v19 }
  0x6b   : > { %v452_v24 = vpack.c.b16 %v440_v21, %v439_v20 }
  0x6c   : > { %v4787_v25 = vpack.c.b16 %v448_v23, %v447_v22 }
  0x6e   : > { %726 = vmatpush.bf16.msrb.mxu2 %v3763_v32  ;;  %775 = vmatpush.bf16.msrb.mxu3 %v3767_v33 }
  0x70   : > { %558 = vmatmul.bf16.gmra.mxu0 %v4767_v34  ;;  %578 = vmatmul.bf16.gmra.mxu2 %v4769_v35 }
  0x71   : > { %607 = vmatmul.bf16.gmra.mxu1 %v4767_v34  ;;  %627 = vmatmul.bf16.gmra.mxu3 %v4769_v35 }
  0x72   : > { %727 = vmatpush.bf16.msrb.mxu2 %v3755_v43  ;;  %776 = vmatpush.bf16.msrb.mxu3 %v3759_v45 }
  0x76   : > { %728 = vmatpush.bf16.msrb.mxu2 %v3747_v49  ;;  %777 = vmatpush.bf16.msrb.mxu3 %v3751_v51 }
  0x7a   : > { %729 = vmatpush.bf16.msrb.mxu2 %v3739_v62  ;;  %778 = vmatpush.bf16.msrb.mxu3 %v3743_v63 }
  0x7e   : > { %730 = vmatpush.bf16.msrb.mxu2 %v3731_v8  ;;  %779 = vmatpush.bf16.msrb.mxu3 %v3735_v9 }
  0x80   : > { %563 = vmatmul.bf16.gmra.mxu0 %v451_v10  ;;  %583 = vmatmul.bf16.gmra.mxu2 %v4779_v11 }
  0x81   : > { %612 = vmatmul.bf16.gmra.mxu1 %v451_v10  ;;  %632 = vmatmul.bf16.gmra.mxu3 %v4779_v11 }
  0x90   : > { %568 = vmatmul.bf16.gmra.mxu0 %v452_v24  ;;  %588 = vmatmul.bf16.gmra.mxu2 %v4787_v25 }
  0x91   : > { %617 = vmatmul.bf16.gmra.mxu1 %v452_v24  ;;  %637 = vmatmul.bf16.gmra.mxu3 %v4787_v25 }
  0xa0   : > { %731 = vmatmul.bf16.vlgmr.msrb.gmra.mxu2 %v4755_v60 }
  0xa1   : > { %780 = vmatmul.bf16.vlgmr.msrb.gmra.mxu3 %v4755_v60 }
  0xb0   : > { %736 = vmatmul.bf16.gmra.mxu2 %v4767_v34 }
  0xb1   : > { %785 = vmatmul.bf16.gmra.mxu3 %v4767_v34 }
  0xc0   : > { %741 = vmatmul.bf16.gmra.mxu2 %v451_v10 }
  0xc1   : > { %790 = vmatmul.bf16.gmra.mxu3 %v451_v10 }
  0xd0   : > { %746 = vmatmul.bf16.gmra.mxu2 %v452_v24 }
  0xd1   : > { %795 = vmatmul.bf16.gmra.mxu3 %v452_v24 }
  0xdd   : > { %v554_v26 = vpop.f32.mrf.mxu0 }
  0xde   : > { %v4795_v27 = vpop.f32.mrf.mxu1 }
  0xdf   : > { %v821_v28 = vpack.c.bf16 %v4795_v27, %v554_v26 }
  0xe0   : > { %751 = vmatmul.bf16.gmra.mxu2 %v4757_v61 }
  0xe1   : > { %800 = vmatmul.bf16.gmra.mxu3 %v4757_v61  ;;  %v929_v60 = vrot.slane %v821_v28, 4  ;;  %v961_v7 = vunpack.c.l.b16 %v821_v28 }
  0xe3   : > { %v574_v29 = vpop.f32.mrf.mxu2  ;;  %v4805_v34 = vunpack.c.l.b16 %v929_v60 }
  0xe4   : > { %v4800_v30 = vpop.f32.mrf.mxu3 }
  0xe5   : > { %6585 = vst [vmem:[#allocation15_spill] sm:$0xff] %v4800_v30  ;;  %v556_v31 = vpop.f32.mrf.mxu0  ;;  %v4808_v36 = vpack.c.bf16 %v4800_v30, %v574_v29 }
  0xe6   : > { %v4802_v32 = vpop.f32.mrf.mxu1 }
  0xe7   : > { %v822_v33 = vpack.c.bf16 %v4802_v32, %v556_v31  ;;  %v937_v61 = vrot.slane %v4808_v36, 4 }
  0xe9   : > { %v930_v37 = vrot.slane %v822_v33, 4  ;;  %v4824_v46 = vunpack.c.l.b16 %v937_v61  ;;  %v962_v8 = vunpack.c.l.b16 %v822_v33 }
  0xeb   : > { %v576_v38 = vpop.f32.mrf.mxu2  ;;  %v4810_v39 = vunpack.c.l.b16 %v930_v37  ;;  %v4860_v15 = vpack.c.b16 %v962_v8, %v961_v7 }
  0xec   : > { %v4812_v40 = vpop.f32.mrf.mxu3 }
  0xed   : > { %v4816_v41 = vpack.c.bf16 %v4812_v40, %v576_v38  ;;  %v559_v42 = vpop.f32.mrf.mxu0 }
  0xee   : > { %v4820_v44 = vpop.f32.mrf.mxu1 }
  0xef   : > { %6586 = vst [vmem:[#allocation16_spill] sm:$0xff] %v4820_v44  ;;  %v938_v45 = vrot.slane %v4816_v41, 4  ;;  %v823_v48 = vpack.c.bf16 %v4820_v44, %v559_v42 }
  0xf0   : > { %756 = vmatmul.bf16.gmra.mxu2 %v4769_v35 }
  0xf1   : > { %805 = vmatmul.bf16.gmra.mxu3 %v4769_v35  ;;  %v4827_v47 = vunpack.c.l.b16 %v938_v45  ;;  %v931_v52 = vrot.slane %v823_v48, 4  ;;  %v963_v56 = vunpack.c.l.b16 %v823_v48 }
  0xf3   : > { %v579_v49 = vpop.f32.mrf.mxu2  ;;  %v4837_v57 = vunpack.c.l.b16 %v931_v52 }
  0xf4   : > { %v4832_v51 = vpop.f32.mrf.mxu3 }
  0xf5   : > { %6587 = vst [vmem:[#allocation17_spill] sm:$0xff] %v4832_v51  ;;  %v561_v53 = vpop.f32.mrf.mxu0  ;;  %v831_v35 = vpack.c.bf16 %v4832_v51, %v579_v49 }
  0xf6   : > { %v4834_v54 = vpop.f32.mrf.mxu1 }
  0xf7   : > { %v824_v55 = vpack.c.bf16 %v4834_v54, %v561_v53  ;;  %v939_v2 = vrot.slane %v831_v35, 4 }
  0xf9   : > { %v932_v58 = vrot.slane %v824_v55, 4  ;;  %v964_v59 = vunpack.c.l.b16 %v824_v55  ;;  %v4854_v10 = vunpack.c.l.b16 %v939_v2 }
  0xfb   : > { %v4840_v62 = vunpack.c.l.b16 %v932_v58  ;;  %v581_v63 = vpop.f32.mrf.mxu2  ;;  %v4842_v0 = vpack.c.b16 %v964_v59, %v963_v56 }
  0xfc   : > { %v4844_v1 = vpop.f32.mrf.mxu3 }
  0xfd   : > { %6588 = vst [vmem:[#allocation18_spill] sm:$0xff] %v4844_v1  ;;  %v832_v3 = vpack.c.bf16 %v4844_v1, %v581_v63  ;;  %969 = vrot.lane.b32.xlu0 %v4842_v0, %s4573_s30  ;;  %v564_v4 = vpop.f32.mrf.mxu0 }
  0xfe   : > { %v4851_v6 = vpop.f32.mrf.mxu1 }
  0xff   : > { %v940_v9 = vrot.slane %v832_v3, 4  ;;  %v825_v13 = vpack.c.bf16 %v4851_v6, %v564_v4  ;;  %v1047_v21 = vunpack.c.l.b16 %v832_v3 }
 0x100   : > { %761 = vmatmul.bf16.gmra.mxu2 %v4779_v11 }
 0x101   : > { %v4856_v12 = vunpack.c.l.b16 %v940_v9  ;;  %810 = vmatmul.bf16.gmra.mxu3 %v4779_v11  ;;  %v933_v18 = vrot.slane %v825_v13, 4  ;;  %v1003_v23 = vunpack.c.l.b16 %v825_v13  ;;  %v1046_v11 = vunpack.c.l.b16 %v831_v35 }
 0x103   : > { %v584_v14 = vpop.f32.mrf.mxu2  ;;  %v4871_v24 = vunpack.c.l.b16 %v933_v18  ;;  %v4876_v31 = vpack.c.b16 %v1047_v21, %v1046_v11 }
 0x104   : > { %v4864_v17 = vpop.f32.mrf.mxu3 }
 0x105   : > { %6589 = vst [vmem:[#allocation19_spill] sm:$0xff] %v4864_v17  ;;  %967 = vrot.lane.b32.xlu0 %v4860_v15, %s4573_s30  ;;  %v566_v19 = vpop.f32.mrf.mxu0  ;;  %v4874_v26 = vpack.c.bf16 %v4864_v17, %v584_v14 }
 0x106   : > { %v4868_v20 = vpop.f32.mrf.mxu1 }
 0x107   : > { %6590 = vst [vmem:[#allocation20_spill] sm:$0xff] %v4868_v20  ;;  %v826_v22 = vpack.c.bf16 %v4868_v20, %v566_v19  ;;  %v941_v61 = vrot.slane %v4874_v26, 4 }
 0x109   : > { %v934_v28 = vrot.slane %v826_v22, 4  ;;  %v1004_v29 = vunpack.c.l.b16 %v826_v22  ;;  %v4898_v53 = vunpack.c.l.b16 %v941_v61 }
 0x10b   : > { %v586_v60 = vpop.f32.mrf.mxu2  ;;  %v4878_v33 = vpack.c.b16 %v1004_v29, %v1003_v23  ;;  %v4880_v37 = vunpack.c.l.b16 %v934_v28 }
 0x10c   : > { %v4882_v38 = vpop.f32.mrf.mxu3 }
 0x10d   : > { %6591 = vst [vmem:[#allocation21_spill] sm:$0xff] %v4882_v38  ;;  %v4886_v42 = vpack.c.bf16 %v4882_v38, %v586_v60  ;;  %1052 = vrot.lane.b32.xlu0 %v4876_v31, %s4573_s30  ;;  %v569_v45 = vpop.f32.mrf.mxu0  ;;  %1009 = vrot.lane.b32.xlu2 %v4878_v33, %s4573_s30 }
 0x10e   : > { %v4894_v49 = vpop.f32.mrf.mxu1 }
 0x10f   : > { %6592 = vst [vmem:[#allocation22_spill] sm:$0xff] %v4894_v49  ;;  %v942_v52 = vrot.slane %v4886_v42, 4  ;;  %v827_v56 = vpack.c.bf16 %v4894_v49, %v569_v45 }
 0x110   : > { %766 = vmatmul.bf16.gmra.mxu2 %v4787_v25 }
 0x111   : > { %815 = vmatmul.bf16.gmra.mxu3 %v4787_v25  ;;  %v4901_v55 = vunpack.c.l.b16 %v942_v52  ;;  %v935_v63 = vrot.slane %v827_v56, 4  ;;  %v1005_v7 = vunpack.c.l.b16 %v827_v56 }
 0x113   : > { %v589_v35 = vpop.f32.mrf.mxu2  ;;  %v4911_v8 = vunpack.c.l.b16 %v935_v63 }
 0x114   : > { %v4906_v59 = vpop.f32.mrf.mxu3 }
 0x115   : > { %6593 = vst [vmem:[#allocation23_spill] sm:$0xff] %v4906_v59  ;;  %v571_v2 = vpop.f32.mrf.mxu0  ;;  %v835_v25 = vpack.c.bf16 %v4906_v59, %v589_v35 }
 0x116   : > { %v4908_v3 = vpop.f32.mrf.mxu1 }
 0x117   : > { %6594 = vst [vmem:[#allocation24_spill] sm:$0xff] %v4908_v3  ;;  %v828_v4 = vpack.c.bf16 %v4908_v3, %v571_v2  ;;  %v943_v22 = vrot.slane %v835_v25, 4  ;;  %v1087_v59 = vunpack.c.l.b16 %v835_v25 }
 0x119   : > { %v936_v9 = vrot.slane %v828_v4, 4  ;;  %v1006_v13 = vunpack.c.l.b16 %v828_v4  ;;  %v4925_v29 = vunpack.c.l.b16 %v943_v22 }
 0x11b   : > { %v4914_v14 = vunpack.c.l.b16 %v936_v9  ;;  %v591_v18 = vpop.f32.mrf.mxu2  ;;  %v4916_v19 = vpack.c.b16 %v1006_v13, %v1005_v7 }
 0x11c   : > { %v4918_v21 = vpop.f32.mrf.mxu3 }
 0x11d   : > { %6595 = vst [vmem:[#allocation25_spill] sm:$0xff] %v4918_v21  ;;  %v836_v23 = vpack.c.bf16 %v4918_v21, %v591_v18  ;;  %1011 = vrot.lane.b32.xlu1 %v4916_v19, %s4573_s30 }
 0x11f   : > { %v944_v28 = vrot.slane %v836_v23, 4 }
 0x121   : > { %v4927_v60 = vunpack.c.l.b16 %v944_v28 }
 0x123   : > { %v732_v61 = vpop.f32.mrf.mxu2 }
 0x124   : > { %v4931_v52 = vpop.f32.mrf.mxu3 }
 0x125   : > { %6596 = vst [vmem:[#allocation26_spill] sm:$0xff] %v4931_v52  ;;  %v837_v56 = vpack.c.bf16 %v4931_v52, %v732_v61 }
 0x127   : > { %v945_v2 = vrot.slane %v837_v56, 4  ;;  %v1126_v7 = vunpack.c.l.b16 %v837_v56 }
 0x129   : > { %v4937_v18 = vunpack.c.l.b16 %v945_v2 }
 0x12b   : > { %v734_v35 = vpop.f32.mrf.mxu2 }
 0x12c   : > { %v4934_v63 = vpop.f32.mrf.mxu3 }
 0x12d   : > { %6597 = vst [vmem:[#allocation27_spill] sm:$0xff] %v4934_v63  ;;  %v838_v4 = vpack.c.bf16 %v4934_v63, %v734_v35 }
 0x12f   : > { %v946_v9 = vrot.slane %v838_v4, 4  ;;  %v1127_v13 = vunpack.c.l.b16 %v838_v4 }
 0x131   : > { %v4939_v22 = vpack.c.b16 %v1127_v13, %v1126_v7  ;;  %v4941_v28 = vunpack.c.l.b16 %v946_v9 }
 0x133   : > { %1132 = vrot.lane.b32.xlu2 %v4939_v22, %s4573_s30  ;;  %v737_v58 = vpop.f32.mrf.mxu2 }
 0x134   : > { %v4947_v45 = vpop.f32.mrf.mxu3 }
 0x135   : > { %6598 = vst [vmem:[#allocation28_spill] sm:$0xff] %v4947_v45  ;;  %v839_v35 = vpack.c.bf16 %v4947_v45, %v737_v58 }
 0x137   : > { %v947_v2 = vrot.slane %v839_v35, 4  ;;  %v1128_v7 = vunpack.c.l.b16 %v839_v35  ;;  %v1044_v35 = vunpack.c.l.b16 %v4808_v36 }
 0x139   : > { %v4953_v16 = vunpack.c.l.b16 %v947_v2 }
 0x13b   : > { %v739_v56 = vpop.f32.mrf.mxu2 }
 0x13c   : > { %v4950_v50 = vpop.f32.mrf.mxu3 }
 0x13d   : > { %6599 = vst [vmem:[#allocation29_spill] sm:$0xff] %v4950_v50  ;;  %v840_v4 = vpack.c.bf16 %v4950_v50, %v739_v56  ;;  %v1045_v56 = vunpack.c.l.b16 %v4816_v41 }
 0x13f   : > { %v948_v9 = vrot.slane %v840_v4, 4  ;;  %v1129_v13 = vunpack.c.l.b16 %v840_v4  ;;  %v4968_v4 = vpack.c.b16 %v1045_v56, %v1044_v35  ;;  %v1085_v56 = vunpack.c.l.b16 %v4874_v26 }
 0x141   : > { %v4955_v48 = vunpack.c.l.b16 %v948_v9  ;;  %v4957_v11 = vpack.c.b16 %v1129_v13, %v1128_v7  ;;  %v1088_v13 = vunpack.c.l.b16 %v836_v23  ;;  %v1086_v23 = vunpack.c.l.b16 %v4886_v42 }
 0x143   : > { %1134 = vrot.lane.b32.xlu1 %v4957_v11, %s4573_s30  ;;  %v742_v61 = vpop.f32.mrf.mxu2  ;;  %v4977_v41 = vpack.c.b16 %v1088_v13, %v1087_v59 }
 0x144   : > { %v4963_v43 = vpop.f32.mrf.mxu3 }
 0x145   : > { %6600 = vst [vmem:[#allocation30_spill] sm:$0xff] %v4963_v43  ;;  %v841_v2 = vpack.c.bf16 %v4963_v43, %v742_v61 }
 0x147   : > { %v1167_v5 = vunpack.c.l.b16 %v841_v2  ;;  %v949_v1 = vrot.slane %v841_v2, 4 }
 0x14b   : > { %1050 = vrot.lane.b32.xlu1 %v4968_v4, %s4573_s30  ;;  %v744_v7 = vpop.f32.mrf.mxu2 }
 0x14c   : > { %v4972_v9 = vpop.f32.mrf.mxu3 }
 0x14d   : > { %6601 = vst [vmem:[#allocation31_spill] sm:$0xff] %v4972_v9  ;;  %v842_v58 = vpack.c.bf16 %v4972_v9, %v744_v7 }
 0x14f   : > { %v1168_v38 = vunpack.c.l.b16 %v842_v58 }
 0x151   : > { %v4975_v30 = vpack.c.b16 %v1168_v38, %v1167_v5  ;;  %v4990_v5 = vpack.c.b16 %v1086_v23, %v1085_v56 }
 0x153   : > { %1173 = vrot.lane.b32.xlu0 %v4975_v30, %s4573_s30  ;;  %1093 = vrot.lane.b32.xlu1 %v4977_v41, %s4573_s30  ;;  %v747_v36 = vpop.f32.mrf.mxu2 }
 0x154   : > { %v4983_v61 = vpop.f32.mrf.mxu3 }
 0x155   : > { %6602 = vst [vmem:[#allocation32_spill] sm:$0xff] %v4983_v61  ;;  %v4988_v25 = vpack.c.bf16 %v4983_v61, %v747_v36 }
 0x157   : > { %v1169_v35 = vunpack.c.l.b16 %v4988_v25 }
 0x15b   : > { %1091 = vrot.lane.b32.xlu0 %v4990_v5, %s4573_s30  ;;  %v749_v38 = vpop.f32.mrf.mxu2 }
 0x15c   : > { %v4994_v59 = vpop.f32.mrf.mxu3 }
 0x15d   : > { %6603 = vst [vmem:[#allocation33_spill] sm:$0xff] %v4994_v59  ;;  %v4998_v7 = vpack.c.bf16 %v4994_v59, %v749_v38  ;;  %v5024_v59 = vunpack.c.l.b16 %v949_v1 }
 0x15f   : > { %v1170_v42 = vunpack.c.l.b16 %v4998_v7 }
 0x161   : > { %v5001_v13 = vpack.c.b16 %v1170_v42, %v1169_v35 }
 0x163   : > { %1175 = vrot.lane.b32.xlu2 %v5001_v13, %s4573_s30  ;;  %v752_v26 = vpop.f32.mrf.mxu2 }
 0x164   : > { %v5005_v36 = vpop.f32.mrf.mxu3 }
 0x165   : > { %6604 = vst [vmem:[#allocation34_spill] sm:$0xff] %v5005_v36  ;;  %v5008_v23 = vpack.c.bf16 %v5005_v36, %v752_v26  ;;  %v950_v26 = vrot.slane %v842_v58, 4 }
 0x167   : > { %v1208_v3 = vunpack.c.l.b16 %v5008_v23  ;;  %v1010_v61 = vpop.permute.xlu2 %1009 }
 0x16b   : > { %v754_v56 = vpop.f32.mrf.mxu2 }
 0x16c   : > { %v5010_v17 = vpop.f32.mrf.mxu3 }
 0x16d   : > { %6605 = vst [vmem:[#allocation35_spill] sm:$0xff] %v5010_v17  ;;  %v5014_v38 = vpack.c.bf16 %v5010_v17, %v754_v56  ;;  %v5026_v17 = vunpack.c.l.b16 %v950_v26 }
 0x16f   : > { %v1209_v35 = vunpack.c.l.b16 %v5014_v38  ;;  %v970_v42 = vpop.permute.xlu0 %969 }
 0x170   : > { %v982_v21 = vsel %vm971_vm0, %v970_v42, 0 }
 0x171   : > { %990 = vmatpush.bf16.xpose.msrb.mxu0 %v982_v21  ;;  %v5018_v9 = vpack.c.b16 %v1209_v35, %v1208_v3 }
 0x173   : > { %1214 = vrot.lane.b32.xlu1 %v5018_v9, %s4573_s30  ;;  %v757_v36 = vpop.f32.mrf.mxu2 }
 0x174   : > { %v5022_v20 = vpop.f32.mrf.mxu3 }
 0x175   : > { %6606 = vst [vmem:[#allocation36_spill] sm:$0xff] %v5022_v20  ;;  %v847_v42 = vpack.c.bf16 %v5022_v20, %v757_v36 }
 0x177   : > { %v968_v56 = vpop.permute.xlu0 %967  ;;  %v955_v21 = vrot.slane %v847_v42, 4  ;;  %v1210_v35 = vunpack.c.l.b16 %v847_v42  ;;  %v951_v42 = vrot.slane %v4988_v25, 4 }
 0x178   : > { %v979_v45 = vsel %vm971_vm0, %v968_v56, 0 }
 0x179   : > { %991 = vmatpush.bf16.xpose.msrb.mxu0 %v979_v45  ;;  %v5035_v1 = vunpack.c.l.b16 %v955_v21 }
 0x17b   : > { %v759_v58 = vpop.f32.mrf.mxu2 }
 0x17c   : > { %v5032_v2 = vpop.f32.mrf.mxu3 }
 0x17d   : > { %6607 = vst [vmem:[#allocation37_spill] sm:$0xff] %v5032_v2  ;;  %v848_v51 = vpack.c.bf16 %v5032_v2, %v759_v58 }
 0x17f   : > { %v956_v43 = vrot.slane %v848_v51, 4  ;;  %v1211_v26 = vunpack.c.l.b16 %v848_v51  ;;  %v1053_v63 = vpop.permute.xlu0 %1052 }
 0x180   : > { %v1064_v56 = vsel %vm971_vm0, %v1053_v63, 0  ;;  %3792 = vmatmul.msk.bf16.vlgmr.msrb.gmra.mxu0 %vm971_vm0, %v4860_v15 }
 0x181   : > { %v5040_v45 = vunpack.c.l.b16 %v956_v43  ;;  %1072 = vmatpush.bf16.xpose.msra.mxu2 %v1064_v56  ;;  %v5042_v36 = vpack.c.b16 %v1211_v26, %v1210_v35 }
 0x183   : > { %1216 = vrot.lane.b32.xlu2 %v5042_v36, %s4573_s30  ;;  %v762_v21 = vpop.f32.mrf.mxu2 }
 0x184   : > { %v5048_v58 = vpop.f32.mrf.mxu3 }
 0x185   : > { %6608 = vst [vmem:[#allocation38_spill] sm:$0xff] %v5048_v58  ;;  %v5051_v51 = vpack.c.bf16 %v5048_v58, %v762_v21  ;;  %v952_v21 = vrot.slane %v4998_v7, 4  ;;  %v1902_v58 = vunpack.c.l.b16 %v951_v42  ;;  %v954_v42 = vrot.slane %v5014_v38, 4 }
 0x187   : > { %v1249_v43 = vunpack.c.l.b16 %v5051_v51  ;;  %v1903_v2 = vunpack.c.l.b16 %v952_v21 }
 0x189   : > { %v1905_v25 = vpack.c.b16 %v1903_v2, %v1902_v58 }
 0x18b   : > { %v764_v63 = vpop.f32.mrf.mxu2 }
 0x18c   : > { %v5053_v3 = vpop.f32.mrf.mxu3 }
 0x18d   : > { %6609 = vst [vmem:[#allocation39_spill] sm:$0xff] %v5053_v3  ;;  %v5057_v15 = vpack.c.bf16 %v5053_v3, %v764_v63 }
 0x18f   : > { %v1250_v35 = vunpack.c.l.b16 %v5057_v15  ;;  %v1012_v26 = vpop.permute.xlu1 %1011 }
 0x190   : > { %3793 = vmatmul.msk.bf16.gmra.mxu0 %vm971_vm0, %v4842_v0  ;;  %v1023_v56 = vsel %vm971_vm0, %v1012_v26, 0  ;;  %v1020_v0 = vsel %vm971_vm0, %v1010_v61, 0  ;;  %v953_v61 = vrot.slane %v5008_v23, 4 }
 0x191   : > { %1031 = vmatpush.bf16.xpose.msrb.mxu1 %v1023_v56  ;;  %v5065_v20 = vpack.c.b16 %v1250_v35, %v1249_v43 }
 0x193   : > { %1255 = vrot.lane.b32.xlu0 %v5065_v20, %s4573_s30  ;;  %v767_v63 = vpop.f32.mrf.mxu2 }
 0x194   : > { %v5069_v3 = vpop.f32.mrf.mxu3 }
 0x195   : > { %v851_v26 = vpack.c.bf16 %v5069_v3, %v767_v63  ;;  %v1944_v63 = vunpack.c.l.b16 %v954_v42 }
 0x197   : > { %v959_v52 = vrot.slane %v851_v26, 4  ;;  %v1251_v43 = vunpack.c.l.b16 %v851_v26 }
 0x199   : > { %1032 = vmatpush.bf16.xpose.msrb.mxu1 %v1020_v0  ;;  %v5076_v50 = vunpack.c.l.b16 %v959_v52  ;;  %v1943_v52 = vunpack.c.l.b16 %v953_v61 }
 0x19b   : > { %v769_v7 = vpop.f32.mrf.mxu2  ;;  %v1947_v0 = vpack.c.b16 %v1944_v63, %v1943_v52 }
 0x19c   : > { %v5073_v56 = vpop.f32.mrf.mxu3 }
 0x19d   : > { %v852_v35 = vpack.c.bf16 %v5073_v56, %v769_v7 }
 0x19f   : > { %v960_v49 = vrot.slane %v852_v35, 4  ;;  %v1252_v44 = vunpack.c.l.b16 %v852_v35  ;;  %v6610_v35 = vpack.c.b16 %v4840_v62, %v4837_v57  ;;  %v6612_v57 = vpack.c.b16 %v4955_v48, %v4953_v16 }
 0x1a0   : > { %3794 = vmatmul.msk.bf16.vlgmr.msrb.gmra.mxu1 %vm971_vm0, %v4878_v33  ;;  %v1133_v33 = vpop.permute.xlu2 %1132  ;;  %v6615_v62 = vpack.c.b16 %v4880_v37, %v4871_v24  ;;  %v6616_v16 = vpack.c.b16 %v5026_v17, %v5024_v59  ;;  %v958_v17 = vrot.slane %v5057_v15, 4 }
 0x1a1   : > { %v5082_v21 = vunpack.c.l.b16 %v960_v49  ;;  %v5084_v2 = vpack.c.b16 %v1252_v44, %v1251_v43  ;;  %v1143_v43 = vsel %vm971_vm0, %v1133_v33, 0 }
 0x1a3   : > { %v1991_v58 = vpack.c.b16 %v5082_v21, %v5076_v50  ;;  %1257 = vrot.lane.b32.xlu2 %v5084_v2, %s4573_s30 }
 0x1b0   : > { %3795 = vmatmul.msk.bf16.gmra.mxu1 %vm971_vm0, %v4916_v19  ;;  %v6611_v19 = vpack.c.b16 %v4810_v39, %v4805_v34  ;;  %v6613_v34 = vpack.c.b16 %v4914_v14, %v4911_v8  ;;  %v6614_v39 = vpack.c.b16 %v4941_v28, %v4937_v18  ;;  %v1987_v8 = vunpack.c.l.b16 %v958_v17 }
 0x1b1   : > { %v6618_v28 = vpack.c.b16 %v4827_v47, %v4824_v46 }
 0x1b5   : > { %v1135_v23 = vpop.permute.xlu1 %1134 }
 0x1b6   : > { %v1146_v38 = vsel %vm971_vm0, %v1135_v23, 0 }
 0x1b7   : > { %1154 = vmatpush.bf16.xpose.msra.mxu0 %v1146_v38 }
 0x1bd   : > { %v1176_v49 = vpop.permute.xlu2 %1175  ;;  %v1051_v44 = vpop.permute.xlu1 %1050 }
 0x1be   : > { %v1187_v26 = vsel %vm971_vm0, %v1176_v49, 0  ;;  %v1061_v7 = vsel %vm971_vm0, %v1051_v44, 0 }
 0x1bf   : > { %1073 = vmatpush.bf16.xpose.msra.mxu2 %v1061_v7  ;;  %1155 = vmatpush.bf16.xpose.msra.mxu0 %v1143_v43 }
 0x1c0   : > { %1195 = vmatpush.bf16.xpose.msra.mxu1 %v1187_v26 }
 0x1c5   : > { %v1174_v61 = vpop.permute.xlu0 %1173  ;;  %v1094_v42 = vpop.permute.xlu1 %1093 }
 0x1c6   : > { %v1184_v52 = vsel %vm971_vm0, %v1174_v61, 0  ;;  %v1105_v63 = vsel %vm971_vm0, %v1094_v42, 0  ;;  %3796 = vmatmul.msk.bf16.vlgmr.msra.gmra.mxu2 %vm971_vm0, %v4968_v4  ;;  %3800 = vmatmul.msk.bf16.vlgmr.msra.gmra.mxu0 %vm971_vm0, %v4939_v22 }
 0x1c7   : > { %1705 = vmatpush.bf16.msrb.mxu0 %v6610_v35  ;;  %1113 = vmatpush.bf16.xpose.msra.mxu3 %v1105_v63 }
 0x1c8   : > { %1196 = vmatpush.bf16.xpose.msra.mxu1 %v1184_v52 }
 0x1cb   : > { %1706 = vmatpush.bf16.msrb.mxu0 %v6611_v19 }
 0x1cd   : > { %v1092_v4 = vpop.permute.xlu0 %1091 }
 0x1ce   : > { %v1102_v22 = vsel %vm971_vm0, %v1092_v4, 0 }
 0x1cf   : > { %1877 = vmatpush.bf16.msra.mxu0 %v6612_v57  ;;  %3802 = vmatmul.msk.bf16.vlgmr.msra.gmra.mxu1 %vm971_vm0, %v4975_v30  ;;  %v957_v30 = vrot.slane %v5051_v51, 4 }
 0x1d0   : > { %1748 = vmatpush.bf16.msrb.mxu1 %v6613_v34  ;;  %1114 = vmatpush.bf16.xpose.msra.mxu3 %v1102_v22 }
 0x1d1   : > { %v1986_v48 = vunpack.c.l.b16 %v957_v30 }
 0x1d3   : > { %1878 = vmatpush.bf16.msra.mxu0 %v6614_v39  ;;  %v1990_v18 = vpack.c.b16 %v1987_v8, %v1986_v48 }
 0x1d4   : > { %1749 = vmatpush.bf16.msrb.mxu1 %v6615_v62 }
 0x1d6   : > { %3797 = vmatmul.msk.bf16.gmra.mxu2 %vm971_vm0, %v4876_v31  ;;  %3801 = vmatmul.msk.bf16.gmra.mxu0 %vm971_vm0, %v4957_v11  ;;  %v6617_v11 = vpack.c.b16 %v4856_v12, %v4854_v10 }
 0x1d7   : > { %3798 = vmatmul.msk.bf16.vlgmr.msra.gmra.mxu3 %vm971_vm0, %v4990_v5  ;;  %v6619_v5 = vpack.c.b16 %v5040_v45, %v5035_v1  ;;  %v6620_v1 = vpack.c.b16 %v4927_v60, %v4925_v29  ;;  %v6621_v45 = vpack.c.b16 %v4901_v55, %v4898_v53 }
 0x1d8   : > { %1920 = vmatpush.bf16.msra.mxu1 %v1905_v25 }
 0x1dc   : > { %1921 = vmatpush.bf16.msra.mxu1 %v6616_v16 }
 0x1dd   : > { %v1217_v24 = vpop.permute.xlu2 %1216 }
 0x1de   : > { %v1228_v37 = vsel %vm971_vm0, %v1217_v24, 0 }
 0x1df   : > { %3803 = vmatmul.msk.bf16.gmra.mxu1 %vm971_vm0, %v5001_v13  ;;  %1236 = vmatpush.bf16.xpose.msrb.mxu2 %v1228_v37 }
 0x1e5   : > { %v1215_v31 = vpop.permute.xlu1 %1214 }
 0x1e6   : > { %v1225_v14 = vsel %vm971_vm0, %v1215_v31, 0 }
 0x1e7   : > { %3799 = vmatmul.msk.bf16.gmra.mxu3 %vm971_vm0, %v4977_v41  ;;  %1237 = vmatpush.bf16.xpose.msrb.mxu2 %v1225_v14 }
 0x1ee   : > { %3804 = vmatmul.msk.bf16.vlgmr.msrb.gmra.mxu2 %vm971_vm0, %v5018_v9 }
 0x1ef   : > { %1791 = vmatpush.bf16.msra.mxu2 %v6617_v11 }
 0x1f3   : > { %1792 = vmatpush.bf16.msra.mxu2 %v6618_v28 }
 0x1f7   : > { %1963 = vmatpush.bf16.msrb.mxu2 %v6619_v5 }
 0x1fb   : > { %1964 = vmatpush.bf16.msrb.mxu2 %v1947_v0 }
 0x1fd   : > { %v1258_v41 = vpop.permute.xlu2 %1257  ;;  %v5151_v59 = vpop.f32.mrf.mxu0 }
 0x1fe   : > { %v1269_v10 = vsel %vm971_vm0, %v1258_v41, 0  ;;  %3805 = vmatmul.msk.bf16.gmra.mxu2 %vm971_vm0, %v5042_v36  ;;  %v1291_v46 = vsel %vm1290_vm1, %v5151_v59, -inf }
 0x1ff   : > { %1292 = vmax.xlane.f32.xlu1 %v1291_v46  ;;  %1277 = vmatpush.bf16.xpose.msrb.mxu3 %v1269_v10 }
 0x205   : > { %v1256_v47 = vpop.permute.xlu0 %1255  ;;  %v5158_v12 = vpop.f32.mrf.mxu0 }
 0x206   : > { %v1266_v9 = vsel %vm971_vm0, %v1256_v47, 0  ;;  %v1294_v13 = vsel %vm1290_vm1, %v5158_v12, -inf }
 0x207   : > { %1295 = vmax.xlane.f32.xlu2 %v1294_v13  ;;  %1278 = vmatpush.bf16.xpose.msrb.mxu3 %v1266_v9 }
 0x20d   : > { %v5169_v36 = vpop.f32.mrf.mxu0 }
 0x20e   : > { %v1297_v51 = vsel %vm1290_vm1, %v5169_v36, -inf  ;;  %3806 = vmatmul.msk.bf16.vlgmr.msrb.gmra.mxu3 %vm971_vm0, %v5065_v20 }
 0x20f   : > { %1834 = vmatpush.bf16.msra.mxu3 %v6620_v1  ;;  %1298 = vmax.xlane.f32.xlu0 %v1297_v51 }
 0x213   : > { %1835 = vmatpush.bf16.msra.mxu3 %v6621_v45 }
 0x215   : > { %v5186_v60 = vpop.f32.mrf.mxu0 }
 0x217   : > { %2006 = vmatpush.bf16.msrb.mxu3 %v1991_v58 }
 0x21b   : > { %2007 = vmatpush.bf16.msrb.mxu3 %v1990_v18 }
 0x21d   : > { %v5178_v29 = vpop.f32.mrf.mxu1 }
 0x21e   : > { %v1303_v53 = vsel %vm1290_vm1, %v5178_v29, -inf  ;;  %3807 = vmatmul.msk.bf16.gmra.mxu3 %vm971_vm0, %v5084_v2  ;;  %v1300_v2 = vsel %vm1290_vm1, %v5186_v60, -inf }
 0x21f   : > { %1304 = vmax.xlane.f32.xlu1 %v1303_v53 }
 0x225   : > { %v5184_v55 = vpop.f32.mrf.mxu1 }
 0x226   : > { %v1306_v7 = vsel %vm1290_vm1, %v5184_v55, -inf }
 0x22d   : > { %v5196_v21 = vpop.f32.mrf.mxu1 }
 0x22e   : > { %v1309_v42 = vsel %vm1290_vm1, %v5196_v21, -inf }
 0x235   : > { %v5212_v44 = vpop.f32.mrf.mxu1 }
 0x236   : > { %v1312_v52 = vsel %vm1290_vm1, %v5212_v44, -inf }
 0x243   : > { %v5192_v15 = vpop.f32.mrf.mxu0 }
 0x244   : > { %v1339_v4 = vsel %vm1290_vm1, %v5192_v15, -inf }
 0x249   : > { %v5188_v20 = vpop.f32.mrf.mxu2 }
 0x24a   : > { %v1315_v50 = vsel %vm1290_vm1, %v5188_v20, -inf }
 0x24b   : > { %1316 = vmax.xlane.f32.xlu2 %v1315_v50  ;;  %v5210_v49 = vpop.f32.mrf.mxu0 }
 0x24c   : > { %v1342_v35 = vsel %vm1290_vm1, %v5210_v49, -inf  ;;  %v5222_v19 = vpop.f32.mrf.mxu1 }
 0x24d   : > { %v1351_v16 = vsel %vm1290_vm1, %v5222_v19, -inf }
 0x251   : > { %v5194_v25 = vpop.f32.mrf.mxu2 }
 0x252   : > { %v1318_v58 = vsel %vm1290_vm1, %v5194_v25, -inf }
 0x253   : > { %1301 = vmax.xlane.f32.xlu2 %v1300_v2  ;;  %1319 = vmax.xlane.f32.xlu0 %v1318_v58  ;;  %v5224_v61 = vpop.f32.mrf.mxu0 }
 0x254   : > { %v1345_v63 = vsel %vm1290_vm1, %v5224_v61, -inf  ;;  %v5232_v57 = vpop.f32.mrf.mxu1 }
 0x255   : > { %v1354_v41 = vsel %vm1290_vm1, %v5232_v57, -inf }
 0x259   : > { %v5202_v0 = vpop.f32.mrf.mxu2 }
 0x25a   : > { %v5204_v33 = vpop.f32.mrf.mxu3  ;;  %v1321_v23 = vsel %vm1290_vm1, %v5202_v0, -inf }
 0x25b   : > { %v1327_v38 = vsel %vm1290_vm1, %v5204_v33, -inf  ;;  %1322 = vmax.xlane.f32.xlu2 %v1321_v23  ;;  %v5234_v34 = vpop.f32.mrf.mxu0 }
 0x25c   : > { %1328 = vmax.xlane.f32.xlu1 %v1327_v38  ;;  %v1348_v62 = vsel %vm1290_vm1, %v5234_v34, -inf  ;;  %v5245_v30 = vpop.f32.mrf.mxu1 }
 0x25d   : > { %v1357_v31 = vsel %vm1290_vm1, %v5245_v30, -inf }
 0x261   : > { %v5214_v26 = vpop.f32.mrf.mxu2 }
 0x262   : > { %v1324_v43 = vsel %vm1290_vm1, %v5214_v26, -inf  ;;  %v5243_v37 = vpop.f32.mrf.mxu3 }
 0x263   : > { %1307 = vmax.xlane.f32.xlu2 %v1306_v7  ;;  %1325 = vmax.xlane.f32.xlu0 %v1324_v43  ;;  %v1330_v48 = vsel %vm1290_vm1, %v5243_v37, -inf }
 0x264   : > { %1343 = vmax.xlane.f32.xlu1 %v1342_v35  ;;  %v5267_v9 = vpop.f32.mrf.mxu1 }
 0x265   : > { %v1360_v13 = vsel %vm1290_vm1, %v5267_v9, -inf }
 0x26b   : > { %1310 = vmax.xlane.f32.xlu2 %v1309_v42  ;;  %1313 = vmax.xlane.f32.xlu0 %v1312_v52 }
 0x26c   : > { %1346 = vmax.xlane.f32.xlu1 %v1345_v63 }
 0x271   : > { %v5256_v28 = vpop.f32.mrf.mxu2 }
 0x272   : > { %v1293_v39 = vpop.xlane.xlu1 %1292 }
 0x273   : > { %v1387_v22 = vsub.f32 %v5151_v59, %v1293_v39  ;;  %1349 = vmax.xlane.f32.xlu2 %v1348_v62  ;;  %1340 = vmax.xlane.f32.xlu0 %v1339_v4 }
 0x274   : > { %1352 = vmax.xlane.f32.xlu1 %v1351_v16 }
 0x275   : > { %v1419_v24 = vmul.f32 1.442695, %v1387_v22 }
 0x277   : > { %4062 = vpow2.f32 %v1419_v24  ;;  %v5296_v24 = vpop.f32.mrf.mxu3 }
 0x279   : > { %v5271_v1 = vpop.f32.mrf.mxu2 }
 0x27a   : > { %v1296_v17 = vpop.xlane.xlu2 %1295 }
 0x27b   : > { %v1388_v8 = vsub.f32 %v5158_v12, %v1296_v17  ;;  %1331 = vmax.xlane.f32.xlu2 %v1330_v48  ;;  %v1363_v12 = vsel %vm1290_vm1, %v5256_v28, -inf }
 0x27c   : > { %1358 = vmax.xlane.f32.xlu1 %v1357_v31 }
 0x27d   : > { %v5252_v14 = vpop.eup %4062  ;;  %v1421_v11 = vmul.f32 1.442695, %v1388_v8 }
 0x27e   : > { %v1483_v18 = vsel %vm1290_vm1, %v5252_v14, 0.0 }
 0x27f   : > { %4064 = vpow2.f32 %v1421_v11  ;;  %1484 = vadd.xlane.f32.xlu0 %v1483_v18 }
 0x282   : > { %v1299_v5 = vpop.xlane.xlu0 %1298 }
 0x283   : > { %v1389_v59 = vsub.f32 %v5169_v36, %v1299_v5  ;;  %1355 = vmax.xlane.f32.xlu2 %v1354_v41  ;;  %v1366_v36 = vsel %vm1290_vm1, %v5271_v1, -inf }
 0x285   : > { %v5261_v10 = vpop.eup %4064  ;;  %v1423_v46 = vmul.f32 1.442695, %v1389_v59 }
 0x286   : > { %v1486_v47 = vsel %vm1290_vm1, %v5261_v10, 0.0 }
 0x287   : > { %4066 = vpow2.f32 %v1423_v46  ;;  %1487 = vadd.xlane.f32.xlu1 %v1486_v47  ;;  %1364 = vmax.xlane.f32.xlu0 %v1363_v12  ;;  %v5304_v46 = vpop.f32.mrf.mxu3 }
 0x28b   : > { %1361 = vmax.xlane.f32.xlu2 %v1360_v13 }
 0x28d   : > { %v5273_v45 = vpop.eup %4066 }
 0x28e   : > { %v1489_v51 = vsel %vm1290_vm1, %v5273_v45, 0.0 }
 0x28f   : > { %1367 = vmax.xlane.f32.xlu1 %v1366_v36  ;;  %1490 = vadd.xlane.f32.xlu0 %v1489_v51 }
 0x292   : > { %v1305_v53 = vpop.xlane.xlu1 %1304 }
 0x293   : > { %v1391_v50 = vsub.f32 %v5178_v29, %v1305_v53 }
 0x295   : > { %v1427_v2 = vmul.f32 1.442695, %v1391_v50  ;;  %v1336_v50 = vsel %vm1290_vm1, %v5304_v46, -inf }
 0x297   : > { %4068 = vpow2.f32 %v1427_v2 }
 0x29d   : > { %v5280_v58 = vpop.eup %4068 }
 0x29e   : > { %v1495_v23 = vsel %vm1290_vm1, %v5280_v58, 0.0 }
 0x29f   : > { %1496 = vadd.xlane.f32.xlu0 %v1495_v23 }
 0x2be   : > { %v1317_v38 = vpop.xlane.xlu2 %1316 }
 0x2bf   : > { %v1395_v12 = vsub.f32 %v5188_v20, %v1317_v38 }
 0x2c1   : > { %v1435_v2 = vmul.f32 1.442695, %v1395_v12 }
 0x2c6   : > { %v1302_v7 = vpop.xlane.xlu2 %1301  ;;  %v5285_v42 = vpop.xlane.xlu0 %1319 }
 0x2c7   : > { %v1390_v43 = vsub.f32 %v5186_v60, %v1302_v7 }
 0x2c9   : > { %v1425_v35 = vmul.f32 1.442695, %v1390_v43 }
 0x2cb   : > { %4070 = vpow2.f32 %v1425_v35 }
 0x2ce   : > { %v1323_v52 = vpop.xlane.xlu2 %1322 }
 0x2cf   : > { %v5287_v63 = vpop.xlane.xlu1 %1328  ;;  %v1397_v7 = vsub.f32 %v5202_v0, %v1323_v52  ;;  %v1333_v0 = vsel %vm1290_vm1, %v5296_v24, -inf }
 0x2d1   : > { %v5289_v29 = vpop.eup %4070  ;;  %v1439_v52 = vmul.f32 1.442695, %v1397_v7 }
 0x2d2   : > { %v1492_v39 = vsel %vm1290_vm1, %v5289_v29, 0.0 }
 0x2d3   : > { %1493 = vadd.xlane.f32.xlu1 %v1492_v39 }
 0x2d6   : > { %v1308_v62 = vpop.xlane.xlu2 %1307  ;;  %v5293_v4 = vpop.xlane.xlu0 %1325 }
 0x2d7   : > { %v1392_v22 = vsub.f32 %v5184_v55, %v1308_v62  ;;  %v1344_v16 = vpop.xlane.xlu1 %1343 }
 0x2d8   : > { %v1404_v36 = vsub.f32 %v5210_v49, %v1344_v16  ;;  %v5320_v49 = vpop.f32.mrf.mxu3 }
 0x2d9   : > { %v1429_v60 = vmul.f32 1.442695, %v1392_v22 }
 0x2da   : > { %v1453_v20 = vmul.f32 1.442695, %v1404_v36 }
 0x2db   : > { %4072 = vpow2.f32 %v1429_v60 }
 0x2de   : > { %v1311_v17 = vpop.xlane.xlu2 %1310  ;;  %v1314_v48 = vpop.xlane.xlu0 %1313 }
 0x2df   : > { %v1394_v8 = vsub.f32 %v5212_v44, %v1314_v48  ;;  %v1347_v31 = vpop.xlane.xlu1 %1346  ;;  %v1393_v53 = vsub.f32 %v5196_v21, %v1311_v17 }
 0x2e0   : > { %v1405_v5 = vsub.f32 %v5224_v61, %v1347_v31  ;;  %v1399_v31 = vsub.f32 %v5204_v33, %v5287_v63 }
 0x2e1   : > { %v5299_v11 = vpop.eup %4072  ;;  %v1433_v18 = vmul.f32 1.442695, %v1394_v8  ;;  %v1431_v23 = vmul.f32 1.442695, %v1393_v53 }
 0x2e2   : > { %v1498_v41 = vsel %vm1290_vm1, %v5299_v11, 0.0  ;;  %v1455_v55 = vmul.f32 1.442695, %v1405_v5  ;;  %v1443_v33 = vmul.f32 1.442695, %v1399_v31 }
 0x2e3   : > { %1499 = vadd.xlane.f32.xlu1 %v1498_v41  ;;  %4074 = vpow2.f32 %v1433_v18 }
 0x2e4   : > { %4076 = vpow2.f32 %v1455_v55 }
 0x2e6   : > { %v1341_v59 = vpop.xlane.xlu0 %1340  ;;  %v1350_v44 = vpop.xlane.xlu2 %1349 }
 0x2e7   : > { %v1403_v47 = vsub.f32 %v5192_v15, %v1341_v59  ;;  %v5308_v13 = vpop.xlane.xlu1 %1352  ;;  %v1406_v43 = vsub.f32 %v5234_v34, %v1350_v44  ;;  %v5338_v34 = vpop.f32.mrf.mxu2 }
 0x2e8   : > { %v1369_v31 = vsel %vm1290_vm1, %v5338_v34, -inf }
 0x2e9   : > { %v1451_v61 = vmul.f32 1.442695, %v1403_v47  ;;  %v5311_v51 = vpop.eup %4074  ;;  %v1457_v17 = vmul.f32 1.442695, %v1406_v43  ;;  %v5352_v47 = vpop.f32.mrf.mxu3 }
 0x2ea   : > { %v1504_v15 = vsel %vm1290_vm1, %v5311_v51, 0.0  ;;  %v5318_v38 = vpop.eup %4076 }
 0x2eb   : > { %1337 = vmax.xlane.f32.xlu1 %v1336_v50  ;;  %4078 = vpow2.f32 %v1451_v61  ;;  %1505 = vadd.xlane.f32.xlu0 %v1504_v15  ;;  %v1537_v62 = vsel %vm1290_vm1, %v5318_v38, 0.0  ;;  %v1396_v15 = vsub.f32 %v5194_v25, %v5285_v42 }
 0x2ec   : > { %4080 = vpow2.f32 %v1435_v2 }
 0x2ed   : > { %4082 = vpow2.f32 %v1453_v20 }
 0x2ee   : > { %4084 = vpow2.f32 %v1431_v23  ;;  %v5326_v35 = vpop.xlane.xlu2 %1331 }
 0x2ef   : > { %v5328_v39 = vpop.xlane.xlu1 %1358  ;;  %v5359_v61 = vpop.f32.mrf.mxu2 }
 0x2f0   : > { %v1372_v7 = vsel %vm1290_vm1, %v5359_v61, -inf }
 0x2f1   : > { %v5323_v21 = vpop.eup %4078 }
 0x2f2   : > { %v1485_v22 = vpop.xlane.xlu0 %1484  ;;  %v1531_v16 = vsel %vm1290_vm1, %v5323_v21, 0.0  ;;  %v5336_v60 = vpop.eup %4080 }
 0x2f3   : > { %1538 = vadd.xlane.f32.xlu1 %v1537_v62  ;;  %1532 = vadd.xlane.f32.xlu2 %v1531_v16  ;;  %4086 = vrcp.f32 %v1485_v22  ;;  %v5340_v48 = vpop.eup %4082  ;;  %v1507_v5 = vsel %vm1290_vm1, %v5336_v60, 0.0  ;;  %v1437_v62 = vmul.f32 1.442695, %v1396_v15  ;;  %v5371_v22 = vpop.f32.mrf.mxu3 }
 0x2f4   : > { %1334 = vmax.xlane.f32.xlu0 %v1333_v0  ;;  %v5342_v8 = vpop.eup %4084  ;;  %4088 = vpow2.f32 %v1439_v52  ;;  %v1534_v55 = vsel %vm1290_vm1, %v5340_v48, 0.0 }
 0x2f5   : > { %4090 = vpow2.f32 %v1457_v17  ;;  %v1501_v41 = vsel %vm1290_vm1, %v5342_v8, 0.0 }
 0x2f6   : > { %v1356_v12 = vpop.xlane.xlu2 %1355 }
 0x2f7   : > { %v1408_v53 = vsub.f32 %v5232_v57, %v1356_v12 }
 0x2f9   : > { %v4087_v59 = vpop.eup %4086  ;;  %v1461_v57 = vmul.f32 1.442695, %v1408_v53 }
 0x2fa   : > { %v1488_v18 = vpop.xlane.xlu1 %1487  ;;  %v5354_v63 = vpop.eup %4088  ;;  %v1611_v44 = vmul.f32 %v4087_v59, %v5252_v14 }
 0x2fb   : > { %1508 = vadd.xlane.f32.xlu1 %v1507_v5  ;;  %4092 = vrcp.f32 %v1488_v18  ;;  %1502 = vadd.xlane.f32.xlu2 %v1501_v41  ;;  %v5357_v36 = vpop.eup %4090  ;;  %v1513_v2 = vsel %vm1290_vm1, %v5354_v63, 0.0  ;;  %v1378_v18 = vsel %vm1290_vm1, %v5352_v47, -inf  ;;  %v5387_v59 = vpop.f32.mrf.mxu3 }
 0x2fc   : > { %1535 = vadd.xlane.f32.xlu0 %v1534_v55  ;;  %4094 = vpow2.f32 %v1443_v33  ;;  %v1643_v20 = vpack.c.bf16 %v1611_v44, %v1611_v44  ;;  %v1540_v14 = vsel %vm1290_vm1, %v5357_v36, 0.0  ;;  %v1398_v33 = vsub.f32 %v5214_v26, %v5293_v4 }
 0x2fd   : > { %4096 = vpow2.f32 %v1461_v57 }
 0x2fe   : > { %v1362_v25 = vpop.xlane.xlu2 %1361  ;;  %v1679_v16 = vunpack.c.l.b16 %v1643_v20  ;;  %4098 = vpow2.f32 %v1437_v62  ;;  %v1381_v62 = vsel %vm1290_vm1, %v5371_v22, -inf }
 0x2ff   : > { %v1410_v52 = vsub.f32 %v5267_v9, %v1362_v25 }
 0x301   : > { %v4093_v50 = vpop.eup %4092  ;;  %v1465_v5 = vmul.f32 1.442695, %v1410_v52 }
 0x302   : > { %v1612_v23 = vmul.f32 %v4093_v50, %v5261_v10  ;;  %v5373_v42 = vpop.eup %4094  ;;  %v1368_v41 = vpop.xlane.xlu1 %1367  ;;  %v1384_v50 = vsel %vm1290_vm1, %v5387_v59, -inf }
 0x303   : > { %1514 = vadd.xlane.f32.xlu1 %v1513_v2  ;;  %1541 = vadd.xlane.f32.xlu2 %v1540_v14  ;;  %v1519_v17 = vsel %vm1290_vm1, %v5373_v42, 0.0  ;;  %v5383_v55 = vpop.eup %4096  ;;  %4100 = vpow2.f32 %v1465_v5  ;;  %v1412_v12 = vsub.f32 %v5271_v1, %v1368_v41  ;;  %v1441_v2 = vmul.f32 1.442695, %v1398_v33 }
 0x304   : > { %1373 = vmax.xlane.f32.xlu0 %v1372_v7  ;;  %v1644_v43 = vpack.c.bf16 %v1612_v23, %v1612_v23  ;;  %v5385_v9 = vpop.eup %4098  ;;  %v1546_v44 = vsel %vm1290_vm1, %v5383_v55, 0.0  ;;  %v1375_v1 = vsel %vm1290_vm1, %v5320_v49, -inf  ;;  %v1400_v14 = vsub.f32 %v5243_v37, %v5326_v35  ;;  %v5420_v37 = vpop.xlane.xlu0 %1364 }
 0x305   : > { %v1510_v53 = vsel %vm1290_vm1, %v5385_v9, 0.0  ;;  %v1469_v15 = vmul.f32 1.442695, %v1412_v12 }
 0x306   : > { %v1680_v0 = vunpack.c.l.b16 %v1644_v43  ;;  %v1445_v43 = vmul.f32 1.442695, %v1400_v14 }
 0x307   : > { %4102 = vpow2.f32 %v1469_v15 }
 0x308   : > { %v1683_v10 = vpack.c.b16 %v1680_v0, %v1679_v16  ;;  %4104 = vpow2.f32 %v1441_v2 }
 0x309   : > { %v5398_v20 = vpop.eup %4100  ;;  %4106 = vpow2.f32 %v1445_v43 }
 0x30a   : > { %3808 = vmatmul.msk.bf16.vlgmr.msrb.gmra.mxu0 %vm1290_vm1, %v1683_v10  ;;  %v1552_v26 = vsel %vm1290_vm1, %v5398_v20, 0.0 }
 0x30b   : > { %1520 = vadd.xlane.f32.xlu1 %v1519_v17  ;;  %1370 = vmax.xlane.f32.xlu2 %v1369_v31 }
 0x30c   : > { %1379 = vmax.xlane.f32.xlu0 %v1378_v18  ;;  %v1491_v35 = vpop.xlane.xlu0 %1490 }
 0x30d   : > { %v5404_v4 = vpop.eup %4102  ;;  %4108 = vrcp.f32 %v1491_v35 }
 0x30e   : > { %v5406_v23 = vpop.eup %4104  ;;  %v1558_v7 = vsel %vm1290_vm1, %v5404_v4, 0.0 }
 0x30f   : > { %v1516_v57 = vsel %vm1290_vm1, %v5406_v23, 0.0  ;;  %v5416_v25 = vpop.eup %4106 }
 0x310   : > { %v1522_v16 = vsel %vm1290_vm1, %v5416_v25, 0.0 }
 0x313   : > { %1547 = vadd.xlane.f32.xlu1 %v1546_v44  ;;  %1511 = vadd.xlane.f32.xlu2 %v1510_v53  ;;  %v4109_v10 = vpop.eup %4108 }
 0x314   : > { %1385 = vmax.xlane.f32.xlu0 %v1384_v50  ;;  %v1613_v52 = vmul.f32 %v4109_v10, %v5273_v45  ;;  %v1497_v31 = vpop.xlane.xlu0 %1496 }
 0x316   : > { %v1645_v5 = vpack.c.bf16 %v1613_v52, %v1613_v52 }
 0x318   : > { %v1681_v12 = vunpack.c.l.b16 %v1645_v5 }
 0x31b   : > { %1553 = vadd.xlane.f32.xlu1 %v1552_v26  ;;  %1376 = vmax.xlane.f32.xlu2 %v1375_v1 }
 0x323   : > { %1559 = vadd.xlane.f32.xlu1 %v1558_v7  ;;  %1517 = vadd.xlane.f32.xlu2 %v1516_v57  ;;  %v1407_v57 = vsub.f32 %v5222_v19, %v5308_v13 }
 0x32b   : > { %1382 = vmax.xlane.f32.xlu2 %v1381_v62 }
 0x333   : > { %1523 = vadd.xlane.f32.xlu2 %v1522_v16 }
 0x346   : > { %v1494_v0 = vpop.xlane.xlu1 %1493 }
 0x347   : > { %4110 = vrcp.f32 %v1494_v0  ;;  %v1459_v0 = vmul.f32 1.442695, %v1407_v57 }
 0x348   : > { %4112 = vrcp.f32 %v1497_v31 }
 0x34d   : > { %v4111_v17 = vpop.eup %4110 }
 0x34e   : > { %v1614_v18 = vmul.f32 %v4111_v17, %v5289_v29  ;;  %v4113_v50 = vpop.eup %4112 }
 0x34f   : > { %v1615_v15 = vmul.f32 %v4113_v50, %v5280_v58  ;;  %v1409_v58 = vsub.f32 %v5245_v30, %v5328_v39 }
 0x350   : > { %v1646_v41 = vpack.c.bf16 %v1614_v18, %v1614_v18 }
 0x351   : > { %v1647_v26 = vpack.c.bf16 %v1615_v15, %v1615_v15  ;;  %v1463_v17 = vmul.f32 1.442695, %v1409_v58 }
 0x352   : > { %v1682_v33 = vunpack.c.l.b16 %v1646_v41 }
 0x353   : > { %v1722_v62 = vunpack.c.l.b16 %v1647_v26 }
 0x354   : > { %v1684_v44 = vpack.c.b16 %v1682_v33, %v1681_v12 }
 0x356   : > { %3809 = vmatmul.msk.bf16.gmra.mxu0 %vm1290_vm1, %v1684_v44  ;;  %v1500_v53 = vpop.xlane.xlu1 %1499 }
 0x357   : > { %4114 = vrcp.f32 %v1500_v53 }
 0x35d   : > { %v4115_v2 = vpop.eup %4114 }
 0x35e   : > { %v1616_v45 = vmul.f32 %v4115_v2, %v5299_v11  ;;  %v1338_v1 = vpop.xlane.xlu1 %1337  ;;  %v1506_v14 = vpop.xlane.xlu0 %1505 }
 0x35f   : > { %v1402_v29 = vsub.f32 %v5304_v46, %v1338_v1 }
 0x360   : > { %v1648_v7 = vpack.c.bf16 %v1616_v45, %v1616_v45 }
 0x361   : > { %v1449_v43 = vmul.f32 1.442695, %v1402_v29 }
 0x362   : > { %v1723_v16 = vunpack.c.l.b16 %v1648_v7 }
 0x363   : > { %4116 = vpow2.f32 %v1449_v43 }
 0x364   : > { %v1726_v35 = vpack.c.b16 %v1723_v16, %v1722_v62  ;;  %4118 = vpow2.f32 %v1459_v0 }
 0x365   : > { %4120 = vrcp.f32 %v1506_v14 }
 0x366   : > { %3810 = vmatmul.msk.bf16.vlgmr.msrb.gmra.mxu1 %vm1290_vm1, %v1726_v35  ;;  %v1533_v11 = vpop.xlane.xlu2 %1532 }
 0x367   : > { %v1335_v10 = vpop.xlane.xlu0 %1334  ;;  %4122 = vrcp.f32 %v1533_v11 }
 0x368   : > { %v1401_v52 = vsub.f32 %v5296_v24, %v1335_v10  ;;  %v1411_v24 = vsub.f32 %v5256_v28, %v5420_v37  ;;  %v1539_v28 = vpop.xlane.xlu1 %1538 }
 0x369   : > { %v5434_v46 = vpop.eup %4116 }
 0x36a   : > { %v1447_v19 = vmul.f32 1.442695, %v1401_v52  ;;  %v1528_v13 = vsel %vm1290_vm1, %v5434_v46, 0.0  ;;  %v5438_v31 = vpop.eup %4118  ;;  %v1467_v53 = vmul.f32 1.442695, %v1411_v24 }
 0x36b   : > { %1529 = vadd.xlane.f32.xlu0 %v1528_v13  ;;  %v4121_v18 = vpop.eup %4120  ;;  %v1543_v12 = vsel %vm1290_vm1, %v5438_v31, 0.0 }
 0x36c   : > { %4124 = vpow2.f32 %v1447_v19  ;;  %v1618_v44 = vmul.f32 %v4121_v18, %v5311_v51 }
 0x36d   : > { %4126 = vpow2.f32 %v1463_v17  ;;  %v4123_v5 = vpop.eup %4122 }
 0x36e   : > { %v1503_v30 = vpop.xlane.xlu2 %1502  ;;  %v1627_v50 = vmul.f32 %v4123_v5, %v5323_v21  ;;  %v1650_v14 = vpack.c.bf16 %v1618_v44, %v1618_v44 }
 0x36f   : > { %v1536_v39 = vpop.xlane.xlu0 %1535  ;;  %4128 = vrcp.f32 %v1503_v30 }
 0x370   : > { %4130 = vrcp.f32 %v1536_v39  ;;  %v1659_v29 = vpack.c.bf16 %v1627_v50, %v1627_v50  ;;  %v1725_v35 = vunpack.c.l.b16 %v1650_v14 }
 0x371   : > { %4132 = vpow2.f32 %v1467_v53 }
 0x372   : > { %v5442_v41 = vpop.eup %4124  ;;  %v1851_v0 = vunpack.c.l.b16 %v1659_v29 }
 0x373   : > { %v1525_v33 = vsel %vm1290_vm1, %v5442_v41, 0.0  ;;  %1544 = vadd.xlane.f32.xlu0 %v1543_v12  ;;  %v5450_v15 = vpop.eup %4126 }
 0x374   : > { %1526 = vadd.xlane.f32.xlu2 %v1525_v33  ;;  %v1549_v62 = vsel %vm1290_vm1, %v5450_v15, 0.0 }
 0x375   : > { %v4129_v37 = vpop.eup %4128 }
 0x376   : > { %v4131_v2 = vpop.eup %4130  ;;  %v1542_v26 = vpop.xlane.xlu2 %1541  ;;  %v1617_v1 = vmul.f32 %v4129_v37, %v5342_v8 }
 0x377   : > { %v1374_v45 = vpop.xlane.xlu0 %1373  ;;  %v1628_v7 = vmul.f32 %v4131_v2, %v5340_v48  ;;  %4134 = vrcp.f32 %v1542_v26  ;;  %v5457_v11 = vpop.eup %4132 }
 0x378   : > { %v1414_v51 = vsub.f32 %v5359_v61, %v1374_v45  ;;  %v1649_v57 = vpack.c.bf16 %v1617_v1, %v1617_v1  ;;  %4136 = vrcp.f32 %v1539_v28  ;;  %v1509_v61 = vpop.xlane.xlu1 %1508  ;;  %v1555_v39 = vsel %vm1290_vm1, %v5457_v11, 0.0 }
 0x379   : > { %v1660_v21 = vpack.c.bf16 %v1628_v7, %v1628_v7 }
 0x37a   : > { %v1473_v43 = vmul.f32 1.442695, %v1414_v51  ;;  %v1724_v16 = vunpack.c.l.b16 %v1649_v57 }
 0x37b   : > { %1550 = vadd.xlane.f32.xlu0 %v1549_v62  ;;  %v1852_v8 = vunpack.c.l.b16 %v1660_v21  ;;  %v4057_v62 = vld [vmem:[#allocation7] ss:$0 sm:$0xff] }
 0x37c   : > { %4138 = vpow2.f32 %v1473_v43  ;;  %v1727_v58 = vpack.c.b16 %v1725_v35, %v1724_v16 }
 0x37d   : > { %v1855_v48 = vpack.c.b16 %v1852_v8, %v1851_v0  ;;  %v4135_v10 = vpop.eup %4134  ;;  %4140 = vrcp.f32 %v1509_v61 }
 0x37e   : > { %v1371_v52 = vpop.xlane.xlu2 %1370  ;;  %3811 = vmatmul.msk.bf16.gmra.mxu1 %vm1290_vm1, %v1727_v58  ;;  %v4137_v13 = vpop.eup %4136  ;;  %v1630_v18 = vmul.f32 %v4135_v10, %v5357_v36 }
 0x37f   : > { %v1413_v19 = vsub.f32 %v5338_v34, %v1371_v52  ;;  %3816 = vmatmul.msk.bf16.vlgmr.msra.gmra.mxu0 %vm1290_vm1, %v1855_v48  ;;  %v1629_v34 = vmul.f32 %v4137_v13, %v5318_v38  ;;  %v1380_v2 = vpop.xlane.xlu0 %1379 }
 0x380   : > { %v1662_v5 = vpack.c.bf16 %v1630_v18, %v1630_v18  ;;  %v1515_v38 = vpop.xlane.xlu1 %1514 }
 0x381   : > { %v1471_v30 = vmul.f32 1.442695, %v1413_v19  ;;  %v1661_v44 = vpack.c.bf16 %v1629_v34, %v1629_v34 }
 0x382   : > { %v5462_v17 = vpop.eup %4138  ;;  %v1854_v50 = vunpack.c.l.b16 %v1662_v5 }
 0x383   : > { %v1564_v24 = vsel %vm1290_vm1, %v5462_v17, 0.0  ;;  %1556 = vadd.xlane.f32.xlu0 %v1555_v39  ;;  %4142 = vpow2.f32 %v1471_v30  ;;  %v4141_v33 = vpop.eup %4140  ;;  %v1853_v37 = vunpack.c.l.b16 %v1661_v44 }
 0x384   : > { %1565 = vadd.xlane.f32.xlu2 %v1564_v24  ;;  %v1619_v28 = vmul.f32 %v4141_v33, %v5336_v60  ;;  %v1416_v60 = vsub.f32 %v5352_v47, %v1380_v2  ;;  %v4058_v24 = vld [vmem:[#allocation7 + $0x1] ss:$0 sm:$0xff] }
 0x385   : > { %v1856_v45 = vpack.c.b16 %v1854_v50, %v1853_v37 }
 0x386   : > { %v1512_v12 = vpop.xlane.xlu2 %1511  ;;  %v1651_v1 = vpack.c.bf16 %v1619_v28, %v1619_v28  ;;  %v1477_v35 = vmul.f32 1.442695, %v1416_v60 }
 0x387   : > { %4144 = vrcp.f32 %v1512_v12  ;;  %v1386_v0 = vpop.xlane.xlu0 %1385 }
 0x388   : > { %4146 = vrcp.f32 %v1515_v38  ;;  %v1765_v21 = vunpack.c.l.b16 %v1651_v1  ;;  %v1418_v47 = vsub.f32 %v5387_v59, %v1386_v0  ;;  %v1521_v61 = vpop.xlane.xlu1 %1520 }
 0x389   : > { %v5470_v53 = vpop.eup %4142 }
 0x38a   : > { %v1561_v36 = vsel %vm1290_vm1, %v5470_v53, 0.0  ;;  %v1481_v52 = vmul.f32 1.442695, %v1418_v47 }
 0x38b   : > { %1562 = vadd.xlane.f32.xlu1 %v1561_v36 }
 0x38d   : > { %v4145_v26 = vpop.eup %4144 }
 0x38e   : > { %v1620_v14 = vmul.f32 %v4145_v26, %v5385_v9  ;;  %v1377_v29 = vpop.xlane.xlu2 %1376 }
 0x38f   : > { %v1415_v7 = vsub.f32 %v5320_v49, %v1377_v29  ;;  %3817 = vmatmul.msk.bf16.gmra.mxu0 %vm1290_vm1, %v1856_v45  ;;  %v4147_v49 = vpop.eup %4146 }
 0x390   : > { %v1652_v51 = vpack.c.bf16 %v1620_v14, %v1620_v14  ;;  %v1621_v58 = vmul.f32 %v4147_v49, %v5354_v63 }
 0x391   : > { %v1475_v57 = vmul.f32 1.442695, %v1415_v7  ;;  %v1548_v7 = vpop.xlane.xlu1 %1547 }
 0x392   : > { %v1766_v43 = vunpack.c.l.b16 %v1652_v51  ;;  %v1653_v19 = vpack.c.bf16 %v1621_v58, %v1621_v58 }
 0x393   : > { %4148 = vpow2.f32 %v1475_v57 }
 0x394   : > { %v1769_v16 = vpack.c.b16 %v1766_v43, %v1765_v21  ;;  %v1767_v59 = vunpack.c.l.b16 %v1653_v19 }
 0x396   : > { %v1518_v8 = vpop.xlane.xlu2 %1517  ;;  %3812 = vmatmul.msk.bf16.vlgmr.msra.gmra.mxu2 %vm1290_vm1, %v1769_v16 }
 0x397   : > { %859 = vrot.lane.b32.xlu0 %v4057_v62, %s4573_s30  ;;  %4150 = vrcp.f32 %v1518_v8 }
 0x398   : > { %4152 = vpow2.f32 %v1477_v35 }
 0x399   : > { %v5481_v9 = vpop.eup %4148  ;;  %4154 = vrcp.f32 %v1521_v61 }
 0x39a   : > { %v1567_v48 = vsel %vm1290_vm1, %v5481_v9, 0.0  ;;  %4156 = vpow2.f32 %v1481_v52 }
 0x39b   : > { %1568 = vadd.xlane.f32.xlu2 %v1567_v48 }
 0x39d   : > { %v4151_v10 = vpop.eup %4150 }
 0x39e   : > { %v1622_v13 = vmul.f32 %v4151_v10, %v5406_v23  ;;  %v1383_v30 = vpop.xlane.xlu2 %1382  ;;  %v5488_v39 = vpop.eup %4152 }
 0x39f   : > { %v1570_v63 = vsel %vm1290_vm1, %v5488_v39, 0.0  ;;  %v4155_v12 = vpop.eup %4154  ;;  %v1417_v37 = vsub.f32 %v5371_v22, %v1383_v30  ;;  %v1554_v22 = vpop.xlane.xlu1 %1553 }
 0x3a0   : > { %v1654_v18 = vpack.c.bf16 %v1622_v13, %v1622_v13  ;;  %v5494_v23 = vpop.eup %4156  ;;  %v1623_v44 = vmul.f32 %v4155_v12, %v5373_v42 }
 0x3a1   : > { %v1576_v50 = vsel %vm1290_vm1, %v5494_v23, 0.0  ;;  %v1479_v1 = vmul.f32 1.442695, %v1417_v37 }
 0x3a2   : > { %v1768_v34 = vunpack.c.l.b16 %v1654_v18  ;;  %v1655_v36 = vpack.c.bf16 %v1623_v44, %v1623_v44 }
 0x3a3   : > { %1571 = vadd.xlane.f32.xlu2 %v1570_v63 }
 0x3a4   : > { %861 = vrot.lane.b32.xlu1 %v4058_v24, %s4573_s30  ;;  %v1770_v5 = vpack.c.b16 %v1768_v34, %v1767_v59  ;;  %v1808_v45 = vunpack.c.l.b16 %v1655_v36 }
 0x3a6   : > { %v1524_v33 = vpop.xlane.xlu2 %1523  ;;  %3813 = vmatmul.msk.bf16.gmra.mxu2 %vm1290_vm1, %v1770_v5 }
 0x3a7   : > { %4158 = vrcp.f32 %v1524_v33  ;;  %v1560_v8 = vpop.xlane.xlu1 %1559 }
 0x3a8   : > { %4160 = vpow2.f32 %v1479_v1 }
 0x3a9   : > { %4162 = vrcp.f32 %v1548_v7 }
 0x3ab   : > { %1577 = vadd.xlane.f32.xlu2 %v1576_v50 }
 0x3ad   : > { %v4159_v28 = vpop.eup %4158 }
 0x3ae   : > { %v1624_v2 = vmul.f32 %v4159_v28, %v5416_v25  ;;  %v5502_v29 = vpop.eup %4160 }
 0x3af   : > { %v1573_v42 = vsel %vm1290_vm1, %v5502_v29, 0.0  ;;  %v4163_v60 = vpop.eup %4162 }
 0x3b0   : > { %v1656_v26 = vpack.c.bf16 %v1624_v2, %v1624_v2  ;;  %v1632_v43 = vmul.f32 %v4163_v60, %v5383_v55 }
 0x3b2   : > { %v1809_v38 = vunpack.c.l.b16 %v1656_v26  ;;  %v1664_v0 = vpack.c.bf16 %v1632_v43, %v1632_v43 }
 0x3b4   : > { %v1812_v14 = vpack.c.b16 %v1809_v38, %v1808_v45  ;;  %v1895_v52 = vunpack.c.l.b16 %v1664_v0 }
 0x3b6   : > { %3814 = vmatmul.msk.bf16.vlgmr.msra.gmra.mxu3 %vm1290_vm1, %v1812_v14 }
 0x3c1   : > { %1574 = vadd.xlane.f32.xlu0 %v1573_v42 }
 0x3de   : > { %v1530_v51 = vpop.xlane.xlu0 %1529 }
 0x3df   : > { %4164 = vrcp.f32 %v1530_v51 }
 0x3e5   : > { %v4165_v21 = vpop.eup %4164 }
 0x3e6   : > { %v1545_v25 = vpop.xlane.xlu0 %1544  ;;  %v1626_v62 = vmul.f32 %v4165_v21, %v5434_v46 }
 0x3e7   : > { %v1527_v57 = vpop.xlane.xlu2 %1526  ;;  %4166 = vrcp.f32 %v1545_v25 }
 0x3e8   : > { %4168 = vrcp.f32 %v1527_v57  ;;  %v1658_v58 = vpack.c.bf16 %v1626_v62, %v1626_v62 }
 0x3ea   : > { %v1811_v55 = vunpack.c.l.b16 %v1658_v58 }
 0x3ed   : > { %v4167_v16 = vpop.eup %4166 }
 0x3ee   : > { %v4169_v35 = vpop.eup %4168  ;;  %v1631_v49 = vmul.f32 %v4167_v16, %v5438_v31  ;;  %v1551_v47 = vpop.xlane.xlu0 %1550 }
 0x3ef   : > { %v1625_v48 = vmul.f32 %v4169_v35, %v5442_v41  ;;  %4170 = vrcp.f32 %v1551_v47 }
 0x3f0   : > { %4172 = vrcp.f32 %v1554_v22  ;;  %v1663_v10 = vpack.c.bf16 %v1631_v49, %v1631_v49 }
 0x3f1   : > { %4174 = vrcp.f32 %v1560_v8  ;;  %v1657_v61 = vpack.c.bf16 %v1625_v48, %v1625_v48 }
 0x3f2   : > { %v1894_v19 = vunpack.c.l.b16 %v1663_v10 }
 0x3f3   : > { %v1810_v13 = vunpack.c.l.b16 %v1657_v61 }
 0x3f4   : > { %v1898_v46 = vpack.c.b16 %v1895_v52, %v1894_v19 }
 0x3f5   : > { %v4171_v30 = vpop.eup %4170  ;;  %v1813_v18 = vpack.c.b16 %v1811_v55, %v1810_v13  ;;  %v6623_v55 = vld [vmem:[#allocation22_spill] sm:$0xff] }
 0x3f6   : > { %v4173_v24 = vpop.eup %4172  ;;  %v1557_v59 = vpop.xlane.xlu0 %1556  ;;  %3818 = vmatmul.msk.bf16.vlgmr.msra.gmra.mxu1 %vm1290_vm1, %v1898_v46  ;;  %v1633_v41 = vmul.f32 %v4171_v30, %v5450_v15 }
 0x3f7   : > { %v4175_v31 = vpop.eup %4174  ;;  %4176 = vrcp.f32 %v1557_v59  ;;  %3815 = vmatmul.msk.bf16.gmra.mxu3 %vm1290_vm1, %v1813_v18  ;;  %v1634_v63 = vmul.f32 %v4173_v24, %v5398_v20  ;;  %v1566_v5 = vpop.xlane.xlu2 %1565  ;;  %v6624_v24 = vld [vmem:[#allocation29_spill] sm:$0xff] }
 0x3f8   : > { %v1636_v34 = vmul.f32 %v4175_v31, %v5404_v4  ;;  %v1665_v12 = vpack.c.bf16 %v1633_v41, %v1633_v41  ;;  %4178 = vrcp.f32 %v1566_v5  ;;  %v6625_v41 = vld [vmem:[#allocation26_spill] sm:$0xff] }
 0x3f9   : > { %v1666_v28 = vpack.c.bf16 %v1634_v63, %v1634_v63 }
 0x3fa   : > { %v1668_v44 = vpack.c.bf16 %v1636_v34, %v1636_v34  ;;  %v1896_v2 = vunpack.c.l.b16 %v1665_v12 }
 0x3fb   : > { %v1897_v1 = vunpack.c.l.b16 %v1666_v28 }
 0x3fc   : > { %v1938_v26 = vunpack.c.l.b16 %v1668_v44 }
 0x3fd   : > { %v4177_v33 = vpop.eup %4176  ;;  %v1899_v38 = vpack.c.b16 %v1897_v1, %v1896_v2 }
 0x3fe   : > { %v1635_v50 = vmul.f32 %v4177_v33, %v5457_v11  ;;  %v1563_v36 = vpop.xlane.xlu1 %1562  ;;  %v4179_v4 = vpop.eup %4178 }
 0x3ff   : > { %4180 = vrcp.f32 %v1563_v36  ;;  %v1638_v11 = vmul.f32 %v4179_v4, %v5462_v17 }
 0x400   : > { %v1667_v37 = vpack.c.bf16 %v1635_v50, %v1635_v50 }
 0x401   : > { %v1670_v43 = vpack.c.bf16 %v1638_v11, %v1638_v11 }
 0x402   : > { %v1937_v45 = vunpack.c.l.b16 %v1667_v37 }
 0x404   : > { %v1941_v15 = vpack.c.b16 %v1938_v26, %v1937_v45 }
 0x405   : > { %v4181_v14 = vpop.eup %4180 }
 0x406   : > { %3819 = vmatmul.msk.bf16.gmra.mxu1 %vm1290_vm1, %v1899_v38  ;;  %3820 = vmatmul.msk.bf16.vlgmr.msrb.gmra.mxu2 %vm1290_vm1, %v1941_v15  ;;  %v1637_v20 = vmul.f32 %v4181_v14, %v5470_v53 }
 0x408   : > { %v1669_v60 = vpack.c.bf16 %v1637_v20, %v1637_v20 }
 0x409   : > { %v5520_v42 = vpop.permute.xlu0 %859 }
 0x40a   : > { %v866_v7 = vadd.f32 %v5520_v42, %v4802_v32  ;;  %v865_v51 = vadd.f32 %v5520_v42, %v4795_v27  ;;  %v868_v22 = vadd.f32 %v5520_v42, %v4834_v54  ;;  %v869_v25 = vadd.f32 %v5520_v42, %v4851_v6  ;;  %v6622_v54 = vld [vmem:[#allocation16_spill] sm:$0xff] }
 0x40b   : > { %v1939_v16 = vunpack.c.l.b16 %v1669_v60  ;;  %v1940_v32 = vunpack.c.l.b16 %v1670_v43  ;;  %v874_v27 = vadd.f32 %v5520_v42, %v4812_v40  ;;  %v867_v6 = vadd.f32 %v5520_v42, %v6622_v54  ;;  %v6630_v60 = vld [vmem:[#allocation32_spill] sm:$0xff] }
 0x40c   : > { %v3825_v57 = vmul.f32 -1.442695, %v866_v7  ;;  %v3824_v21 = vmul.f32 -1.442695, %v865_v51  ;;  %v3827_v53 = vmul.f32 -1.442695, %v868_v22  ;;  %v871_v13 = vadd.f32 %v5520_v42, %v6623_v55 }
 0x40d   : > { %v3828_v17 = vmul.f32 -1.442695, %v869_v25  ;;  %v1942_v0 = vpack.c.b16 %v1940_v32, %v1939_v16  ;;  %v3833_v48 = vmul.f32 -1.442695, %v874_v27  ;;  %v3826_v40 = vmul.f32 -1.442695, %v867_v6 }
 0x40e   : > { %4182 = vpow2.f32 %v3825_v57  ;;  %v1569_v62 = vpop.xlane.xlu2 %1568  ;;  %v5558_v5 = vmul.f32 -1.442695, %v871_v13 }
 0x40f   : > { %4184 = vpow2.f32 %v3824_v21  ;;  %v6631_v21 = vld [vmem:[#allocation27_spill] sm:$0xff] }
 0x410   : > { %4186 = vrcp.f32 %v1569_v62 }
 0x411   : > { %4188 = vpow2.f32 %v3827_v53 }
 0x412   : > { %4190 = vpow2.f32 %v3828_v17 }
 0x414   : > { %v4183_v35 = vpop.eup %4182 }
 0x415   : > { %v4185_v8 = vpop.eup %4184  ;;  %v5534_v49 = vadd.f32 1.0, %v4183_v35 }
 0x416   : > { %v4187_v47 = vpop.eup %4186  ;;  %3821 = vmatmul.msk.bf16.gmra.mxu2 %vm1290_vm1, %v1942_v0  ;;  %v5537_v58 = vadd.f32 1.0, %v4185_v8  ;;  %v1572_v61 = vpop.xlane.xlu2 %1571 }
 0x417   : > { %v4189_v10 = vpop.eup %4188  ;;  %v5539_v52 = vpop.permute.xlu1 %861  ;;  %4192 = vrcp.f32 %v5534_v49  ;;  %v1639_v46 = vmul.f32 %v4187_v47, %v5481_v9  ;;  %v2171_v30 = vand.u32 2147483647, %v5534_v49  ;;  %v2173_v31 = vand.u32 2147483648, %v5534_v49 }
 0x418   : > { %v4191_v19 = vpop.eup %4190  ;;  %4194 = vrcp.f32 %v1572_v61  ;;  %v5547_v18 = vadd.f32 1.0, %v4189_v10  ;;  %v884_v59 = vadd.f32 %v5539_v52, %v6624_v24  ;;  %v881_v34 = vadd.f32 %v5539_v52, %v6625_v41 }
 0x419   : > { %4196 = vrcp.f32 %v5537_v58  ;;  %v5554_v63 = vadd.f32 1.0, %v4191_v19  ;;  %v2156_v9 = vand.u32 2147483647, %v5537_v58  ;;  %v1671_v33 = vpack.c.bf16 %v1639_v46, %v1639_v46 }
 0x41a   : > { %4198 = vpow2.f32 %v3833_v48  ;;  %v3843_v44 = vmul.f32 -1.442695, %v884_v59  ;;  %v3840_v50 = vmul.f32 -1.442695, %v881_v34  ;;  %vm2167_vm2 = vweird.f32 %v5534_v49  ;;  %v6632_v48 = vld [vmem:[#allocation30_spill] sm:$0xff] }
 0x41b   : > { %4200 = vpow2.f32 %v3826_v40  ;;  %vm5563_vm3 = vcmp.eq.f32.partialorder %v2171_v30, 8.507059e+37  ;;  %vm2152_vm4 = vweird.f32 %v5537_v58  ;;  %v2174_v1 = vor.u32 1.1754944e-38, %v2173_v31 }
 0x41c   : > { %4202 = vrcp.f32 %v5547_v18  ;;  %v2158_v15 = vand.u32 2147483648, %v5537_v58  ;;  %vm5573_vm5 = vcmp.eq.f32.partialorder %v2156_v9, 8.507059e+37  ;;  %v1980_v7 = vunpack.c.l.b16 %v1671_v33 }
 0x41d   : > { %v4193_v12 = vpop.eup %4192  ;;  %4204 = vrcp.f32 %v5554_v63  ;;  %v887_v57 = vadd.f32 %v5539_v52, %v6630_v60  ;;  %v882_v53 = vadd.f32 %v5539_v52, %v6631_v21  ;;  %v2201_v32 = vand.u32 2147483647, %v5547_v18 }
 0x41e   : > { %v4195_v28 = vpop.eup %4194  ;;  %v2163_v36 = vmul.f32 %v4193_v12, %v5534_v49  ;;  %v1578_v45 = vpop.xlane.xlu2 %1577  ;;  %4206 = vpow2.f32 %v3843_v44  ;;  %vm2168_vm6 = vweird.f32 %v4193_v12  ;;  %v2159_v62 = vor.u32 1.1754944e-38, %v2158_v15 }
 0x41f   : > { %v4197_v2 = vpop.eup %4196  ;;  %v1640_v26 = vmul.f32 %v4195_v28, %v5488_v39  ;;  %4208 = vrcp.f32 %v1578_v45  ;;  %vm2169_vm8 = vmor %vm2167_vm2, %vm2168_vm6  ;;  %v3846_v47 = vmul.f32 -1.442695, %v887_v57  ;;  %v885_v10 = vadd.f32 %v5539_v52, %v6632_v48 }
 0x420   : > { %v5570_v38 = vpop.eup %4198  ;;  %v2164_v4 = vsub.f32 1.0, %v2163_v36  ;;  %v2148_v14 = vmul.f32 %v4197_v2, %v5537_v58  ;;  %4210 = vpow2.f32 %v3840_v50  ;;  %vm2153_vm7 = vweird.f32 %v4197_v2 }
 0x421   : > { %v5577_v11 = vpop.eup %4200  ;;  %v1672_v51 = vpack.c.bf16 %v1640_v26, %v1640_v26  ;;  %v3841_v13 = vmul.f32 -1.442695, %v882_v53  ;;  %vm2154_vm9 = vmor %vm2152_vm4, %vm2153_vm7  ;;  %4212 = vpow2.f32 %v3846_v47  ;;  %v2203_v31 = vand.u32 2147483648, %v5547_v18 }
 0x422   : > { %v5579_v39 = vpop.eup %4202  ;;  %v2165_v22 = vmul.f32 %v4193_v12, %v2164_v4  ;;  %v2149_v25 = vsub.f32 1.0, %v2148_v14  ;;  %v2216_v9 = vand.u32 2147483647, %v5554_v63  ;;  %vm2197_vm11 = vweird.f32 %v5547_v18 }
 0x423   : > { %v5585_v43 = vpop.eup %4204  ;;  %v1981_v17 = vunpack.c.l.b16 %v1672_v51  ;;  %v2193_v16 = vmul.f32 %v5579_v39, %v5547_v18  ;;  %vm2198_vm10 = vweird.f32 %v5579_v39  ;;  %v2218_v33 = vand.u32 2147483648, %v5554_v63 }
 0x424   : > { %v2166_v27 = vadd.f32 %v4193_v12, %v2165_v22  ;;  %v2150_v54 = vmul.f32 %v4197_v2, %v2149_v25  ;;  %v2208_v6 = vmul.f32 %v5585_v43, %v5554_v63  ;;  %v4207_v35 = vpop.eup %4206  ;;  %vm5620_vm12 = vmor %vm2197_vm11, %vm2198_vm10  ;;  %vm5624_vm13 = vcmp.eq.f32.partialorder %v2201_v32, 8.507059e+37 }
 0x425   : > { %v1984_v0 = vpack.c.b16 %v1981_v17, %v1980_v7  ;;  %v2194_v8 = vsub.f32 1.0, %v2193_v16  ;;  %v4209_v61 = vpop.eup %4208  ;;  %v5597_v55 = vadd.f32 1.0, %v4207_v35  ;;  %vm2212_vm14 = vweird.f32 %v5554_v63 }
 0x426   : > { %v2170_v40 = vsel %vm2169_vm8, %v4193_v12, %v2166_v27  ;;  %v2151_v19 = vadd.f32 %v4197_v2, %v2150_v54  ;;  %v4211_v46 = vpop.eup %4210  ;;  %v2209_v24 = vsub.f32 1.0, %v2208_v6  ;;  %v1642_v41 = vmul.f32 %v4209_v61, %v5494_v23 }
 0x427   : > { %3822 = vmatmul.msk.bf16.vlgmr.msrb.gmra.mxu3 %vm1290_vm1, %v1984_v0  ;;  %v2175_v30 = vsel %vm5563_vm3, %v2174_v1, %v2170_v40  ;;  %v2195_v49 = vmul.f32 %v5579_v39, %v2194_v8  ;;  %4214 = vrcp.f32 %v5597_v55  ;;  %v5617_v12 = vadd.f32 1.0, %v4211_v46 }
 0x428   : > { %2661 = vrot.lane.b32.xlu2 %v2175_v30, %s4573_s30  ;;  %v2155_v59 = vsel %vm2154_vm9, %v4197_v2, %v2151_v19  ;;  %4216 = vpow2.f32 %v3841_v13  ;;  %v2210_v50 = vmul.f32 %v5585_v43, %v2209_v24  ;;  %v3844_v28 = vmul.f32 -1.442695, %v885_v10  ;;  %v4213_v2 = vpop.eup %4212 }
 0x429   : > { %v2160_v34 = vsel %vm5573_vm5, %v2159_v62, %v2155_v59  ;;  %v2196_v58 = vadd.f32 %v5579_v39, %v2195_v49  ;;  %v2204_v36 = vor.u32 1.1754944e-38, %v2203_v31  ;;  %v2441_v37 = vand.u32 2147483647, %v5597_v55  ;;  %v6658_v49 = vld [vmem:[#allocation28_spill] sm:$0xff] }
 0x42a   : > { %2659 = vrot.lane.b32.xlu1 %v2160_v34, %s4573_s30  ;;  %4218 = vrcp.f32 %v5617_v12  ;;  %v1674_v26 = vpack.c.bf16 %v1642_v41, %v1642_v41  ;;  %vm5635_vm15 = vcmp.eq.f32.partialorder %v2216_v9, 8.507059e+37  ;;  %v5640_v1 = vadd.f32 1.0, %v5570_v38 }
 0x42b   : > { %v2200_v18 = vsel %vm5620_vm12, %v5579_v39, %v2196_v58  ;;  %4220 = vpow2.f32 %v3844_v28  ;;  %v2443_v4 = vand.u32 2147483648, %v5597_v55  ;;  %vm2213_vm2 = vweird.f32 %v5585_v43 }
 0x42c   : > { %v2219_v14 = vor.u32 1.1754944e-38, %v2218_v33  ;;  %v5644_v20 = vadd.f32 1.0, %v4213_v2  ;;  %v2205_v7 = vsel %vm5624_vm13, %v2204_v36, %v2200_v18  ;;  %v2396_v39 = vand.u32 2147483647, %v5617_v12  ;;  %vm5669_vm7 = vmor %vm2212_vm14, %vm2213_vm2 }
 0x42d   : > { %v4215_v15 = vpop.eup %4214  ;;  %v2211_v22 = vadd.f32 %v5585_v43, %v2210_v50  ;;  %vm2437_vm3 = vweird.f32 %v5597_v55  ;;  %vm5653_vm4 = vcmp.eq.f32.partialorder %v2441_v37, 8.507059e+37  ;;  %v2398_v60 = vand.u32 2147483648, %v5617_v12 }
 0x42e   : > { %v2433_v51 = vmul.f32 %v4215_v15, %v5597_v55  ;;  %v4217_v25 = vpop.eup %4216  ;;  %4222 = vrcp.f32 %v5644_v20  ;;  %v5659_v57 = vunpack.c.l.b16 %v1674_v26  ;;  %vm2438_vm5 = vweird.f32 %v4215_v15 }
 0x42f   : > { %v5661_v53 = vadd.f32 1.0, %v4217_v25  ;;  %4224 = vrcp.f32 %v5640_v1  ;;  %v2444_v62 = vor.u32 1.1754944e-38, %v2443_v4  ;;  %vm2392_vm6 = vweird.f32 %v5617_v12  ;;  %vm2439_vm9 = vmor %vm2437_vm3, %vm2438_vm5 }
 0x430   : > { %2665 = vrot.lane.b32.xlu2 %v2205_v7, %s4573_s30  ;;  %v2434_v21 = vsub.f32 1.0, %v2433_v51  ;;  %v4219_v17 = vpop.eup %4218  ;;  %4226 = vpow2.f32 %v5558_v5  ;;  %vm5675_vm8 = vcmp.eq.f32.partialorder %v2396_v39, 8.507059e+37  ;;  %v2215_v35 = vsel %vm5669_vm7, %v5585_v43, %v2211_v22  ;;  %v6666_v51 = vld [vmem:[#allocation31_spill] sm:$0xff] }
 0x431   : > { %v4221_v32 = vpop.eup %4220  ;;  %v2388_v54 = vmul.f32 %v4219_v17, %v5617_v12  ;;  %v2486_v63 = vand.u32 2147483647, %v5644_v20  ;;  %v2399_v8 = vor.u32 1.1754944e-38, %v2398_v60  ;;  %v2488_v47 = vand.u32 2147483648, %v5644_v20 }
 0x432   : > { %v2435_v27 = vmul.f32 %v4215_v15, %v2434_v21  ;;  %4228 = vrcp.f32 %v5661_v53  ;;  %v5686_v5 = vadd.f32 1.0, %v5577_v11  ;;  %v5688_v61 = vadd.f32 1.0, %v4221_v32 }
 0x433   : > { %v2389_v10 = vsub.f32 1.0, %v2388_v54  ;;  %vm2393_vm10 = vweird.f32 %v4219_v17  ;;  %v2220_v43 = vsel %vm5635_vm15, %v2219_v14, %v2215_v35  ;;  %vm2482_vm11 = vweird.f32 %v5644_v20  ;;  %v6668_v35 = vld [vmem:[#allocation25_spill] sm:$0xff] }
 0x434   : > { %v1575_v0 = vpop.xlane.xlu0 %1574  ;;  %v2436_v48 = vadd.f32 %v4215_v15, %v2435_v27  ;;  %v4223_v40 = vpop.eup %4222  ;;  %v2413_v19 = vand.u32 2147483648, %v5661_v53  ;;  %vm5700_vm12 = vcmp.eq.f32.partialorder %v2486_v63, 8.507059e+37  ;;  %v2411_v55 = vand.u32 2147483647, %v5661_v53  ;;  %vm2394_vm14 = vmor %vm2392_vm6, %vm2393_vm10 }
 0x435   : > { %4230 = vrcp.f32 %v1575_v0  ;;  %v5697_v11 = vpop.eup %4224  ;;  %v2390_v46 = vmul.f32 %v4219_v17, %v2389_v10  ;;  %v2478_v30 = vmul.f32 %v4223_v40, %v5644_v20  ;;  %vm2287_vm13 = vweird.f32 %v5640_v1  ;;  %v6655_v0 = vld [vmem:[#allocation17_spill] sm:$0xff] }
 0x436   : > { %v2440_v13 = vsel %vm2439_vm9, %v4215_v15, %v2436_v48  ;;  %v4227_v24 = vpop.eup %4226  ;;  %4232 = vrcp.f32 %v5688_v61  ;;  %v2291_v31 = vand.u32 2147483647, %v5640_v1  ;;  %v2293_v41 = vand.u32 2147483648, %v5640_v1 }
 0x437   : > { %v2445_v59 = vsel %vm5653_vm4, %v2444_v62, %v2440_v13  ;;  %v2391_v34 = vadd.f32 %v4219_v17, %v2390_v46  ;;  %v2479_v58 = vsub.f32 1.0, %v2478_v30  ;;  %v2489_v9 = vor.u32 1.1754944e-38, %v2488_v47 }
 0x438   : > { %2667 = vrot.lane.b32.xlu2 %v2220_v43, %s4573_s30  ;;  %2697 = vrot.lane.b32.xlu0 %v2445_v59, %s4573_s30  ;;  %v2283_v33 = vmul.f32 %v5697_v11, %v5640_v1  ;;  %v4229_v44 = vpop.eup %4228  ;;  %vm2483_vm15 = vweird.f32 %v4223_v40  ;;  %vm2407_vm2 = vweird.f32 %v5661_v53  ;;  %v2414_v23 = vor.u32 1.1754944e-38, %v2413_v19  ;;  %v6659_v59 = vld [vmem:[#allocation33_spill] sm:$0xff] }
 0x439   : > { %4234 = vrcp.f32 %v5686_v5  ;;  %v2395_v28 = vsel %vm2394_vm14, %v4219_v17, %v2391_v34  ;;  %v2480_v18 = vmul.f32 %v4223_v40, %v2479_v58  ;;  %v2403_v36 = vmul.f32 %v4229_v44, %v5661_v53  ;;  %vm2484_vm6 = vmor %vm2482_vm11, %vm2483_vm15 }
 0x43a   : > { %vm5721_vm3 = vcmp.eq.f32.partialorder %v2411_v55, 8.507059e+37  ;;  %v2456_v2 = vand.u32 2147483647, %v5688_v61  ;;  %v2400_v26 = vsel %vm5675_vm8, %v2399_v8, %v2395_v28  ;;  %v2284_v45 = vsub.f32 1.0, %v2283_v33 }
 0x43b   : > { %v4231_v50 = vpop.eup %4230  ;;  %v2294_v15 = vor.u32 1.1754944e-38, %v2293_v41  ;;  %2691 = vrot.lane.b32.xlu1 %v2400_v26, %s4573_s30  ;;  %v2481_v4 = vadd.f32 %v4223_v40, %v2480_v18  ;;  %v2404_v14 = vsub.f32 1.0, %v2403_v36  ;;  %vm2452_vm4 = vweird.f32 %v5688_v61  ;;  %v6660_v41 = vld [vmem:[#allocation37_spill] sm:$0xff]  ;;  %v6663_v18 = vld [vmem:[#allocation20_spill] sm:$0xff] }
 0x43c   : > { %v1641_v12 = vmul.f32 %v4231_v50, %v5502_v29  ;;  %v2458_v7 = vand.u32 2147483648, %v5688_v61  ;;  %vm5732_vm5 = vcmp.eq.f32.partialorder %v2291_v31, 8.507059e+37  ;;  %v4233_v39 = vpop.eup %4232  ;;  %v2285_v29 = vmul.f32 %v5697_v11, %v2284_v45  ;;  %v6664_v45 = vld [vmem:[#allocation34_spill] sm:$0xff] }
 0x43d   : > { %vm2288_vm7 = vweird.f32 %v5697_v11  ;;  %v5741_v25 = vadd.f32 1.0, %v4227_v24  ;;  %v2485_v38 = vsel %vm2484_vm6, %v4223_v40, %v2481_v4  ;;  %v2405_v60 = vmul.f32 %v4229_v44, %v2404_v14  ;;  %v6665_v14 = vld [vmem:[#allocation38_spill] sm:$0xff] }
 0x43e   : > { %v1673_v22 = vpack.c.bf16 %v1641_v12, %v1641_v12  ;;  %vm2408_vm8 = vweird.f32 %v4229_v44  ;;  %v2448_v21 = vmul.f32 %v4233_v39, %v5688_v61  ;;  %vm5744_vm9 = vcmp.eq.f32.partialorder %v2456_v2, 8.507059e+37  ;;  %vm5758_vm11 = vmor %vm2287_vm13, %vm2288_vm7 }
 0x43f   : > { %vm2182_vm10 = vweird.f32 %v5686_v5  ;;  %v4235_v62 = vpop.eup %4234  ;;  %v2490_v16 = vsel %vm5700_vm12, %v2489_v9, %v2485_v38  ;;  %v2286_v32 = vadd.f32 %v5697_v11, %v2285_v29  ;;  %v2186_v27 = vand.u32 2147483647, %v5686_v5  ;;  %vm2409_vm12 = vmor %vm2407_vm2, %vm2408_vm8 }
 0x440   : > { %v1982_v20 = vunpack.c.l.b16 %v1673_v22  ;;  %2703 = vrot.lane.b32.xlu0 %v2490_v16, %s4573_s30  ;;  %v2406_v54 = vadd.f32 %v4229_v44, %v2405_v60  ;;  %v2449_v6 = vsub.f32 1.0, %v2448_v21  ;;  %v2178_v63 = vmul.f32 %v4235_v62, %v5686_v5 }
 0x441   : > { %v875_v8 = vadd.f32 %v5520_v42, %v6655_v0  ;;  %vm2453_vm14 = vweird.f32 %v4233_v39  ;;  %v2188_v48 = vand.u32 2147483648, %v5686_v5  ;;  %4236 = vrcp.f32 %v5741_v25  ;;  %v6669_v0 = vld [vmem:[#allocation24_spill] sm:$0xff] }
 0x442   : > { %v1985_v47 = vpack.c.b16 %v5659_v57, %v1982_v20  ;;  %v2410_v1 = vsel %vm2409_vm12, %v4229_v44, %v2406_v54  ;;  %v2450_v10 = vmul.f32 %v4233_v39, %v2449_v6  ;;  %v2290_v40 = vsel %vm5758_vm11, %v5697_v11, %v2286_v32  ;;  %vm2454_vm2 = vmor %vm2452_vm4, %vm2453_vm14  ;;  %v6667_v54 = vld [vmem:[#allocation18_spill] sm:$0xff] }
 0x443   : > { %v2179_v43 = vsub.f32 1.0, %v2178_v63  ;;  %v2415_v19 = vsel %vm5721_vm3, %v2414_v23, %v2410_v1  ;;  %v2459_v13 = vor.u32 1.1754944e-38, %v2458_v7  ;;  %vm2183_vm13 = vweird.f32 %v4235_v62 }
 0x444   : > { %3823 = vmatmul.msk.bf16.gmra.mxu3 %vm1290_vm1, %v1985_v47  ;;  %vm5777_vm15 = vcmp.eq.f32.partialorder %v2186_v27, 8.507059e+37  ;;  %2693 = vrot.lane.b32.xlu1 %v2415_v19, %s4573_s30  ;;  %v2451_v53 = vadd.f32 %v4233_v39, %v2450_v10  ;;  %v3834_v30 = vmul.f32 -1.442695, %v875_v8  ;;  %v883_v11 = vadd.f32 %v5539_v52, %v6658_v49  ;;  %vm5798_vm1 = vmor %vm2182_vm10, %vm2183_vm13 }
 0x445   : > { %v2180_v46 = vmul.f32 %v4235_v62, %v2179_v43  ;;  %v2295_v55 = vsel %vm5732_vm5, %v2294_v15, %v2290_v40  ;;  %v2189_v24 = vor.u32 1.1754944e-38, %v2188_v48  ;;  %v888_v31 = vadd.f32 %v5539_v52, %v6659_v59 }
 0x446   : > { %v892_v34 = vadd.f32 %v5539_v52, %v6660_v41  ;;  %v2455_v58 = vsel %vm2454_vm2, %v4233_v39, %v2451_v53  ;;  %4238 = vpow2.f32 %v3834_v30  ;;  %v3842_v33 = vmul.f32 -1.442695, %v883_v11 }
 0x447   : > { %v2181_v9 = vadd.f32 %v4235_v62, %v2180_v46  ;;  %v4237_v44 = vpop.eup %4236  ;;  %v2460_v23 = vsel %vm5744_vm9, %v2459_v13, %v2455_v58  ;;  %v3847_v50 = vmul.f32 -1.442695, %v888_v31  ;;  %v870_v36 = vadd.f32 %v5520_v42, %v6663_v18 }
 0x448   : > { %v3851_v28 = vmul.f32 -1.442695, %v892_v34  ;;  %2699 = vrot.lane.b32.xlu2 %v2460_v23, %s4573_s30  ;;  %2677 = vrot.lane.b32.xlu0 %v2295_v55, %s4573_s30  ;;  %v2238_v2 = vmul.f32 %v4237_v44, %v5741_v25  ;;  %v2246_v5 = vand.u32 2147483647, %v5741_v25  ;;  %4240 = vpow2.f32 %v3842_v33 }
 0x449   : > { %v2185_v37 = vsel %vm5798_vm1, %v4235_v62, %v2181_v9  ;;  %v2248_v12 = vand.u32 2147483648, %v5741_v25  ;;  %4242 = vpow2.f32 %v3847_v50  ;;  %v3829_v26 = vmul.f32 -1.442695, %v870_v36 }
 0x44a   : > { %v889_v15 = vadd.f32 %v5539_v52, %v6664_v45  ;;  %v2239_v4 = vsub.f32 1.0, %v2238_v2  ;;  %4244 = vpow2.f32 %v3851_v28  ;;  %v893_v7 = vadd.f32 %v5539_v52, %v6665_v14 }
 0x44b   : > { %v886_v39 = vadd.f32 %v5539_v52, %v6666_v51  ;;  %v2190_v22 = vsel %vm5777_vm15, %v2189_v24, %v2185_v37  ;;  %vm2243_vm3 = vweird.f32 %v4237_v44  ;;  %4246 = vpow2.f32 %v3829_v26  ;;  %v6670_v24 = vld [vmem:[#allocation19_spill] sm:$0xff] }
 0x44c   : > { %v3848_v29 = vmul.f32 -1.442695, %v889_v15  ;;  %v4239_v38 = vpop.eup %4238  ;;  %2663 = vrot.lane.b32.xlu1 %v2190_v22, %s4573_s30  ;;  %v2240_v60 = vmul.f32 %v4237_v44, %v2239_v4  ;;  %v3852_v21 = vmul.f32 -1.442695, %v893_v7  ;;  %vm2242_vm4 = vweird.f32 %v5741_v25 }
 0x44d   : > { %v5820_v17 = vadd.f32 1.0, %v4239_v38  ;;  %v3845_v62 = vmul.f32 -1.442695, %v886_v39  ;;  %vm2247_vm5 = vcmp.eq.f32.partialorder %v2246_v5, 8.507059e+37  ;;  %v2249_v32 = vor.u32 1.1754944e-38, %v2248_v12  ;;  %vm2244_vm6 = vmor %vm2242_vm4, %vm2243_vm3 }
 0x44e   : > { %4248 = vpow2.f32 %v3848_v29  ;;  %v4241_v20 = vpop.eup %4240  ;;  %v2241_v16 = vadd.f32 %v4237_v44, %v2240_v60  ;;  %v876_v6 = vadd.f32 %v5520_v42, %v6667_v54  ;;  %v880_v63 = vadd.f32 %v5520_v42, %v6668_v35 }
 0x44f   : > { %v4243_v27 = vpop.eup %4242  ;;  %4250 = vrcp.f32 %v5820_v17  ;;  %v872_v8 = vadd.f32 %v5520_v42, %v6669_v0  ;;  %v5830_v1 = vadd.f32 1.0, %v4241_v20  ;;  %v2306_v13 = vand.u32 2147483647, %v5820_v17 }
 0x450   : > { %v4245_v47 = vpop.eup %4244  ;;  %v2245_v48 = vsel %vm2244_vm6, %v4237_v44, %v2241_v16  ;;  %v5832_v25 = vadd.f32 1.0, %v4243_v27  ;;  %4252 = vpow2.f32 %v3852_v21  ;;  %v2308_v57 = vand.u32 2147483648, %v5820_v17 }
 0x451   : > { %v2250_v10 = vsel %vm2247_vm5, %v2249_v32, %v2245_v48  ;;  %v5834_v40 = vadd.f32 1.0, %v4245_v47  ;;  %4254 = vpow2.f32 %v3845_v62  ;;  %v4247_v43 = vpop.eup %4246  ;;  %v5842_v53 = vmul.f32 -1.442695, %v876_v6  ;;  %v6694_v48 = vld [vmem:[#allocation36_spill] sm:$0xff] }
 0x452   : > { %2671 = vrot.lane.b32.xlu2 %v2250_v10, %s4573_s30  ;;  %4256 = vrcp.f32 %v5830_v1  ;;  %v5844_v46 = vmul.f32 -1.442695, %v880_v63  ;;  %v5846_v30 = vmul.f32 -1.442695, %v872_v8  ;;  %vm2302_vm7 = vweird.f32 %v5820_v17 }
 0x453   : > { %4258 = vrcp.f32 %v5832_v25  ;;  %v2426_v11 = vand.u32 2147483647, %v5830_v1  ;;  %v2428_v55 = vand.u32 2147483648, %v5830_v1  ;;  %v5853_v59 = vadd.f32 %v5520_v42, %v6670_v24 }
 0x454   : > { %v4249_v19 = vpop.eup %4248  ;;  %4260 = vrcp.f32 %v5834_v40  ;;  %v2501_v34 = vand.u32 2147483647, %v5832_v25  ;;  %v5857_v58 = vadd.f32 1.0, %v4247_v43  ;;  %vm5861_vm8 = vcmp.eq.f32.partialorder %v2306_v13, 8.507059e+37 }
 0x455   : > { %v4251_v49 = vpop.eup %4250  ;;  %v5859_v9 = vadd.f32 1.0, %v4249_v19  ;;  %v2309_v23 = vor.u32 1.1754944e-38, %v2308_v57  ;;  %v2503_v61 = vand.u32 2147483648, %v5832_v25  ;;  %v2563_v50 = vand.u32 2147483648, %v5834_v40 }
 0x456   : > { %v4253_v31 = vpop.eup %4252  ;;  %v2298_v41 = vmul.f32 %v4251_v49, %v5820_v17  ;;  %vm2422_vm9 = vweird.f32 %v5830_v1  ;;  %vm2497_vm10 = vweird.f32 %v5832_v25  ;;  %4262 = vrcp.f32 %v5857_v58 }
 0x457   : > { %v4255_v33 = vpop.eup %4254  ;;  %vm5871_vm11 = vcmp.eq.f32.partialorder %v2426_v11, 8.507059e+37  ;;  %v2429_v5 = vor.u32 1.1754944e-38, %v2428_v55  ;;  %4264 = vrcp.f32 %v5859_v9  ;;  %v5876_v12 = vadd.f32 1.0, %v4253_v31 }
 0x458   : > { %v4257_v28 = vpop.eup %4256  ;;  %v2299_v18 = vsub.f32 1.0, %v2298_v41  ;;  %vm2303_vm12 = vweird.f32 %v4251_v49  ;;  %vm5881_vm14 = vcmp.eq.f32.partialorder %v2501_v34, 8.507059e+37  ;;  %vm2557_vm13 = vweird.f32 %v5834_v40 }
 0x459   : > { %v4259_v36 = vpop.eup %4258  ;;  %v2418_v37 = vmul.f32 %v4257_v28, %v5830_v1  ;;  %v2561_v14 = vand.u32 2147483647, %v5834_v40  ;;  %v2504_v51 = vor.u32 1.1754944e-38, %v2503_v61  ;;  %v2564_v22 = vor.u32 1.1754944e-38, %v2563_v50  ;;  %vm2304_vm15 = vmor %vm2302_vm7, %vm2303_vm12 }
 0x45a   : > { %v5878_v26 = vpop.eup %4260  ;;  %v2300_v45 = vmul.f32 %v4251_v49, %v2299_v18  ;;  %v2493_v15 = vmul.f32 %v4259_v36, %v5832_v25  ;;  %v2231_v60 = vand.u32 2147483647, %v5857_v58  ;;  %v5890_v21 = vadd.f32 1.0, %v4255_v33 }
 0x45b   : > { %v2419_v7 = vsub.f32 1.0, %v2418_v37  ;;  %v2553_v39 = vmul.f32 %v5878_v26, %v5834_v40  ;;  %vm2423_vm2 = vweird.f32 %v4257_v28  ;;  %vm2227_vm1 = vweird.f32 %v5857_v58 }
 0x45c   : > { %v2301_v29 = vadd.f32 %v4251_v49, %v2300_v45  ;;  %v2494_v38 = vsub.f32 1.0, %v2493_v15  ;;  %4266 = vrcp.f32 %v5876_v12  ;;  %v4263_v16 = vpop.eup %4262  ;;  %vm2498_vm3 = vweird.f32 %v4259_v36  ;;  %vm2424_vm5 = vmor %vm2422_vm9, %vm2423_vm2 }
 0x45d   : > { %v2420_v62 = vmul.f32 %v4257_v28, %v2419_v7  ;;  %v2554_v20 = vsub.f32 1.0, %v2553_v39  ;;  %vm5896_vm4 = vcmp.eq.f32.partialorder %v2561_v14, 8.507059e+37  ;;  %v2233_v6 = vand.u32 2147483648, %v5857_v58  ;;  %v5901_v35 = vpop.eup %4264  ;;  %v6690_v7 = vld [vmem:[#allocation39_spill] sm:$0xff] }
 0x45e   : > { %v2305_v32 = vsel %vm2304_vm15, %v4251_v49, %v2301_v29  ;;  %v2495_v27 = vmul.f32 %v4259_v36, %v2494_v38  ;;  %v2223_v8 = vmul.f32 %v4263_v16, %v5857_v58  ;;  %vm2558_vm6 = vweird.f32 %v5878_v26  ;;  %v6691_v39 = vld [vmem:[#allocation35_spill] sm:$0xff] }
 0x45f   : > { %v2310_v17 = vsel %vm5861_vm8, %v2309_v23, %v2305_v32  ;;  %v2421_v63 = vadd.f32 %v4257_v28, %v2420_v62  ;;  %v2555_v0 = vmul.f32 %v5878_v26, %v2554_v20  ;;  %vm5912_vm7 = vcmp.eq.f32.partialorder %v2231_v60, 8.507059e+37  ;;  %vm2499_vm8 = vmor %vm2497_vm10, %vm2498_vm3 }
 0x460   : > { %2679 = vrot.lane.b32.xlu0 %v2310_v17, %s4573_s30  ;;  %v2496_v47 = vadd.f32 %v4259_v36, %v2495_v27  ;;  %v2508_v10 = vmul.f32 %v5901_v35, %v5859_v9  ;;  %v2224_v13 = vsub.f32 1.0, %v2223_v8  ;;  %v2516_v1 = vand.u32 2147483647, %v5859_v9  ;;  %vm5933_vm9 = vmor %vm2557_vm13, %vm2558_vm6 }
 0x461   : > { %v2425_v43 = vsel %vm2424_vm5, %v4257_v28, %v2421_v63  ;;  %v2556_v19 = vadd.f32 %v5878_v26, %v2555_v0  ;;  %v2518_v55 = vand.u32 2147483648, %v5859_v9  ;;  %vm2228_vm10 = vweird.f32 %v4263_v16 }
 0x462   : > { %v2430_v57 = vsel %vm5871_vm11, %v2429_v5, %v2425_v43  ;;  %v2500_v49 = vsel %vm2499_vm8, %v4259_v36, %v2496_v47  ;;  %v2509_v11 = vsub.f32 1.0, %v2508_v10  ;;  %v4267_v24 = vpop.eup %4266  ;;  %v2225_v41 = vmul.f32 %v4263_v16, %v2224_v13  ;;  %vm5952_vm13 = vmor %vm2227_vm1, %vm2228_vm10 }
 0x463   : > { %2695 = vrot.lane.b32.xlu1 %v2430_v57, %s4573_s30  ;;  %v2505_v31 = vsel %vm5881_vm14, %v2504_v51, %v2500_v49  ;;  %v2234_v34 = vor.u32 1.1754944e-38, %v2233_v6  ;;  %v2560_v33 = vsel %vm5933_vm9, %v5878_v26, %v2556_v19  ;;  %vm2513_vm11 = vweird.f32 %v5901_v35 }
 0x464   : > { %2705 = vrot.lane.b32.xlu2 %v2505_v31, %s4573_s30  ;;  %v2510_v44 = vmul.f32 %v5901_v35, %v2509_v11  ;;  %v2568_v23 = vmul.f32 %v4267_v24, %v5876_v12  ;;  %v2226_v40 = vadd.f32 %v4263_v16, %v2225_v41  ;;  %vm2512_vm12 = vweird.f32 %v5859_v9 }
 0x465   : > { %vm5945_vm14 = vcmp.eq.f32.partialorder %v2516_v1, 8.507059e+37  ;;  %4268 = vrcp.f32 %v5890_v21  ;;  %v2519_v18 = vor.u32 1.1754944e-38, %v2518_v55  ;;  %vm2572_vm15 = vweird.f32 %v5876_v12  ;;  %vm5962_vm2 = vmor %vm2512_vm12, %vm2513_vm11 }
 0x466   : > { %v2511_v28 = vadd.f32 %v5901_v35, %v2510_v44  ;;  %v2569_v36 = vsub.f32 1.0, %v2568_v23  ;;  %v2565_v9 = vsel %vm5896_vm4, %v2564_v22, %v2560_v33  ;;  %v2230_v37 = vsel %vm5952_vm13, %v4263_v16, %v2226_v40 }
 0x467   : > { %4270 = vpow2.f32 %v5842_v53  ;;  %v3836_v58 = vmul.f32 -1.442695, %v5853_v59  ;;  %vm2573_vm1 = vweird.f32 %v4267_v24  ;;  %v2576_v45 = vand.u32 2147483647, %v5876_v12  ;;  %v6689_v53 = vld [vmem:[#allocation15_spill] sm:$0xff] }
 0x468   : > { %2713 = vrot.lane.b32.xlu0 %v2565_v9, %s4573_s30  ;;  %v2515_v5 = vsel %vm5962_vm2, %v5901_v35, %v2511_v28  ;;  %v2570_v26 = vmul.f32 %v4267_v24, %v2569_v36  ;;  %v2235_v15 = vsel %vm5912_vm7, %v2234_v34, %v2230_v37  ;;  %v2578_v4 = vand.u32 2147483648, %v5876_v12  ;;  %vm5989_vm3 = vmor %vm2572_vm15, %vm2573_vm1 }
 0x469   : > { %4272 = vpow2.f32 %v5844_v46  ;;  %v873_v59 = vadd.f32 %v5520_v42, %v6689_v53  ;;  %v894_v51 = vadd.f32 %v5539_v52, %v6690_v7  ;;  %v890_v22 = vadd.f32 %v5539_v52, %v6691_v39 }
 0x46a   : > { %v2571_v14 = vadd.f32 %v4267_v24, %v2570_v26  ;;  %4274 = vpow2.f32 %v5846_v30  ;;  %v2520_v38 = vsel %vm5945_vm14, %v2519_v18, %v2515_v5  ;;  %vm2577_vm4 = vcmp.eq.f32.partialorder %v2576_v45, 8.507059e+37 }
 0x46b   : > { %v4269_v29 = vpop.eup %4268  ;;  %2669 = vrot.lane.b32.xlu1 %v2235_v15, %s4573_s30  ;;  %4276 = vpow2.f32 %v3836_v58  ;;  %v3832_v30 = vmul.f32 -1.442695, %v873_v59  ;;  %v3853_v20 = vmul.f32 -1.442695, %v894_v51  ;;  %v2579_v32 = vor.u32 1.1754944e-38, %v2578_v4 }
 0x46c   : > { %2707 = vrot.lane.b32.xlu2 %v2520_v38, %s4573_s30  ;;  %v2575_v60 = vsel %vm5989_vm3, %v4267_v24, %v2571_v14  ;;  %v2463_v62 = vmul.f32 %v4269_v29, %v5890_v21  ;;  %v2471_v27 = vand.u32 2147483647, %v5890_v21  ;;  %v3849_v6 = vmul.f32 -1.442695, %v890_v22 }
 0x46d   : > { %v4271_v16 = vpop.eup %4270  ;;  %4278 = vpow2.f32 %v3832_v30  ;;  %v2580_v17 = vsel %vm2577_vm4, %v2579_v32, %v2575_v60  ;;  %v2473_v63 = vand.u32 2147483648, %v5890_v21  ;;  %v895_v0 = vadd.f32 %v5539_v52, %v5069_v3 }
 0x46e   : > { %v2464_v12 = vsub.f32 1.0, %v2463_v62  ;;  %v5998_v54 = vadd.f32 1.0, %v4271_v16  ;;  %4280 = vpow2.f32 %v3853_v20  ;;  %vm2468_vm5 = vweird.f32 %v4269_v29 }
 0x46f   : > { %v4273_v35 = vpop.eup %4272  ;;  %v891_v10 = vadd.f32 %v5539_v52, %v6694_v48  ;;  %vm2467_vm6 = vweird.f32 %v5890_v21  ;;  %vm2472_vm8 = vcmp.eq.f32.partialorder %v2471_v27, 8.507059e+37  ;;  %v2474_v3 = vor.u32 1.1754944e-38, %v2473_v63 }
 0x470   : > { %v4275_v8 = vpop.eup %4274  ;;  %2715 = vrot.lane.b32.xlu0 %v2580_v17, %s4573_s30  ;;  %v2465_v47 = vmul.f32 %v4269_v29, %v2464_v12  ;;  %4282 = vrcp.f32 %v5998_v54  ;;  %v6007_v19 = vadd.f32 1.0, %v4273_v35  ;;  %vm2469_vm7 = vmor %vm2467_vm6, %vm2468_vm5  ;;  %v3854_v49 = vmul.f32 -1.442695, %v895_v0 }
 0x471   : > { %v4277_v43 = vpop.eup %4276  ;;  %v6009_v13 = vadd.f32 1.0, %v4275_v8  ;;  %4284 = vpow2.f32 %v3849_v6  ;;  %v2321_v24 = vand.u32 2147483647, %v5998_v54  ;;  %v3850_v31 = vmul.f32 -1.442695, %v891_v10 }
 0x472   : > { %v2466_v1 = vadd.f32 %v4269_v29, %v2465_v47  ;;  %v6012_v57 = vadd.f32 1.0, %v4277_v43  ;;  %4286 = vrcp.f32 %v6007_v19  ;;  %v2323_v21 = vand.u32 2147483648, %v5998_v54 }
 0x473   : > { %v4279_v11 = vpop.eup %4278  ;;  %4288 = vrcp.f32 %v6009_v13  ;;  %v2381_v33 = vand.u32 2147483647, %v6007_v19  ;;  %vm2317_vm9 = vweird.f32 %v5998_v54  ;;  %vm6023_vm10 = vcmp.eq.f32.partialorder %v2321_v24, 8.507059e+37 }
 0x474   : > { %v2470_v55 = vsel %vm2469_vm7, %v4269_v29, %v2466_v1  ;;  %v4281_v25 = vpop.eup %4280  ;;  %4290 = vrcp.f32 %v6012_v57  ;;  %v6027_v61 = vadd.f32 1.0, %v4279_v11  ;;  %v2324_v36 = vor.u32 1.1754944e-38, %v2323_v21 }
 0x475   : > { %v2475_v41 = vsel %vm2472_vm8, %v2474_v3, %v2470_v55  ;;  %4292 = vpow2.f32 %v3854_v49  ;;  %v6029_v50 = vadd.f32 1.0, %v4281_v25  ;;  %vm2377_vm11 = vweird.f32 %v6007_v19  ;;  %v6701_v3 = vld [vmem:[#allocation21_spill] sm:$0xff] }
 0x476   : > { %v4283_v34 = vpop.eup %4282  ;;  %2701 = vrot.lane.b32.xlu1 %v2475_v41, %s4573_s30  ;;  %4294 = vpow2.f32 %v3850_v31  ;;  %v2383_v9 = vand.u32 2147483648, %v6007_v19  ;;  %vm6034_vm12 = vcmp.eq.f32.partialorder %v2381_v33, 8.507059e+37  ;;  %vm2257_vm14 = vweird.f32 %v6009_v13  ;;  %v6099_v33 = vpop.f32.mrf.mxu0 }
 0x477   : > { %v2313_v44 = vmul.f32 %v4283_v34, %v5998_v54  ;;  %v4285_v23 = vpop.eup %4284  ;;  %4296 = vrcp.f32 %v6027_v61  ;;  %vm2318_vm13 = vweird.f32 %v4283_v34  ;;  %v2261_v45 = vand.u32 2147483647, %v6009_v13 }
 0x478   : > { %v4287_v28 = vpop.eup %4286  ;;  %v2263_v53 = vand.u32 2147483648, %v6009_v13  ;;  %4298 = vrcp.f32 %v6029_v50  ;;  %v6046_v59 = vadd.f32 1.0, %v4285_v23  ;;  %v2384_v51 = vor.u32 1.1754944e-38, %v2383_v9  ;;  %vm2319_vm15 = vmor %vm2317_vm9, %vm2318_vm13 }
 0x479   : > { %v2314_v18 = vsub.f32 1.0, %v2313_v44  ;;  %v4289_v37 = vpop.eup %4288  ;;  %v2373_v2 = vmul.f32 %v4287_v28, %v6007_v19  ;;  %vm2378_vm2 = vweird.f32 %v4287_v28  ;;  %vm2332_vm1 = vweird.f32 %v6012_v57 }
 0x47a   : > { %v2253_v26 = vmul.f32 %v4289_v37, %v6009_v13  ;;  %v6042_v15 = vpop.eup %4290  ;;  %v2336_v46 = vand.u32 2147483647, %v6012_v57  ;;  %vm2258_vm3 = vweird.f32 %v4289_v37  ;;  %4300 = vrcp.f32 %v6046_v59  ;;  %vm2379_vm4 = vmor %vm2377_vm11, %vm2378_vm2 }
 0x47b   : > { %v2315_v5 = vmul.f32 %v4283_v34, %v2314_v18  ;;  %v2374_v4 = vsub.f32 1.0, %v2373_v2  ;;  %v4293_v14 = vpop.eup %4292  ;;  %v2328_v22 = vmul.f32 %v6042_v15, %v6012_v57  ;;  %vm2333_vm5 = vweird.f32 %v6042_v15  ;;  %vm2259_vm6 = vmor %vm2257_vm14, %vm2258_vm3 }
 0x47c   : > { %v2254_v39 = vsub.f32 1.0, %v2253_v26  ;;  %v4295_v29 = vpop.eup %4294  ;;  %v6057_v27 = vadd.f32 1.0, %v4293_v14  ;;  %vm2262_vm7 = vcmp.eq.f32.partialorder %v2261_v45, 8.507059e+37  ;;  %v2264_v63 = vor.u32 1.1754944e-38, %v2263_v53  ;;  %vm6077_vm8 = vmor %vm2332_vm1, %vm2333_vm5 }
 0x47d   : > { %v2316_v7 = vadd.f32 %v4283_v34, %v2315_v5  ;;  %v2375_v38 = vmul.f32 %v4287_v28, %v2374_v4  ;;  %v2329_v62 = vsub.f32 1.0, %v2328_v22  ;;  %v4297_v20 = vpop.eup %4296  ;;  %v2338_v0 = vand.u32 2147483648, %v6012_v57 }
 0x47e   : > { %v2255_v60 = vmul.f32 %v4289_v37, %v2254_v39  ;;  %v2268_v6 = vmul.f32 %v4297_v20, %v6027_v61  ;;  %v6065_v35 = vpop.eup %4298  ;;  %v6083_v1 = vadd.f32 1.0, %v4295_v29  ;;  %v878_v49 = vadd.f32 %v5520_v42, %v6701_v3 }
 0x47f   : > { %v2320_v30 = vsel %vm2319_vm15, %v4283_v34, %v2316_v7  ;;  %v2376_v32 = vadd.f32 %v4287_v28, %v2375_v38  ;;  %v2330_v54 = vmul.f32 %v6042_v15, %v2329_v62  ;;  %v2583_v13 = vmul.f32 %v6065_v35, %v6029_v50  ;;  %v3947_v62 = vld [vmem:[#allocation8 + $0x18] sm:$0xff] }
 0x480   : > { %v2325_v16 = vsel %vm6023_vm10, %v2324_v36, %v2320_v30  ;;  %v2256_v12 = vadd.f32 %v4289_v37, %v2255_v60  ;;  %v2269_v10 = vsub.f32 1.0, %v2268_v6  ;;  %vm2273_vm9 = vweird.f32 %v4297_v20  ;;  %v6092_v57 = vpop.eup %4300  ;;  %3065 = vmatpush.bf16.msrb.mxu1 %v3947_v62 }
 0x481   : > { %2681 = vrot.lane.b32.xlu2 %v2325_v16, %s4573_s30  ;;  %v2380_v17 = vsel %vm2379_vm4, %v4287_v28, %v2376_v32  ;;  %v2331_v48 = vadd.f32 %v6042_v15, %v2330_v54  ;;  %4302 = vrcp.f32 %v6057_v27  ;;  %vm2337_vm10 = vcmp.eq.f32.partialorder %v2336_v46, 8.507059e+37  ;;  %v1710_v32 = vpop.f32.mrf.mxu0 }
 0x482   : > { %v2385_v8 = vsel %vm6034_vm12, %v2384_v51, %v2380_v17  ;;  %v2260_v47 = vsel %vm2259_vm6, %v4289_v37, %v2256_v12  ;;  %v2270_v55 = vmul.f32 %v4297_v20, %v2269_v10  ;;  %v2339_v24 = vor.u32 1.1754944e-38, %v2338_v0  ;;  %v6704_v37 = vld [vmem:[#allocation23_spill] sm:$0xff]  ;;  %v2662_v19 = vpop.permute.xlu2 %2661 }
 0x483   : > { %2689 = vrot.lane.b32.xlu0 %v2385_v8, %s4573_s30  ;;  %v2265_v43 = vsel %vm2262_vm7, %v2264_v63, %v2260_v47  ;;  %v2335_v11 = vsel %vm6077_vm8, %v6042_v15, %v2331_v48  ;;  %v2278_v31 = vand.u32 2147483648, %v6027_v61  ;;  %v2584_v25 = vsub.f32 1.0, %v2583_v13 }
 0x484   : > { %2673 = vrot.lane.b32.xlu1 %v2265_v43, %s4573_s30  ;;  %v2271_v41 = vadd.f32 %v4297_v20, %v2270_v55  ;;  %vm2272_vm11 = vweird.f32 %v6027_v61  ;;  %v2276_v21 = vand.u32 2147483647, %v6027_v61  ;;  %v2523_v34 = vmul.f32 %v6092_v57, %v6046_v59  ;;  %v3946_v55 = vld [vmem:[#allocation8 + $0x10] sm:$0xff] }
 0x485   : > { %v2340_v44 = vsel %vm2337_vm10, %v2339_v24, %v2335_v11  ;;  %vm6101_vm12 = vmor %vm2272_vm11, %vm2273_vm9  ;;  %v2585_v40 = vmul.f32 %v6065_v35, %v2584_v25  ;;  %v2593_v28 = vand.u32 2147483648, %v6029_v50  ;;  %4304 = vrcp.f32 %v6083_v1  ;;  %3066 = vmatpush.bf16.msrb.mxu1 %v3946_v55 }
 0x486   : > { %v2275_v61 = vsel %vm6101_vm12, %v4297_v20, %v2271_v41  ;;  %vm2588_vm14 = vweird.f32 %v6065_v35  ;;  %v2524_v18 = vsub.f32 1.0, %v2523_v34  ;;  %v2279_v36 = vor.u32 1.1754944e-38, %v2278_v31  ;;  %v3945_v41 = vld [vmem:[#allocation8 + $0x8] sm:$0xff] }
 0x487   : > { %v2586_v9 = vadd.f32 %v6065_v35, %v2585_v40  ;;  %v879_v2 = vadd.f32 %v5520_v42, %v6704_v37  ;;  %v4303_v58 = vpop.eup %4302  ;;  %vm2277_vm13 = vcmp.eq.f32.partialorder %v2276_v21, 8.507059e+37  ;;  %vm2587_vm15 = vweird.f32 %v6029_v50 }
 0x488   : > { %v2591_v5 = vand.u32 2147483647, %v6029_v50  ;;  %v2525_v26 = vmul.f32 %v6092_v57, %v2524_v18  ;;  %v2280_v45 = vsel %vm2277_vm13, %v2279_v36, %v2275_v61  ;;  %vm6118_vm2 = vmor %vm2587_vm15, %vm2588_vm14  ;;  %v2594_v4 = vor.u32 1.1754944e-38, %v2593_v28  ;;  %v3944_v36 = vld [vmem:[#allocation8] sm:$0xff] }
 0x489   : > { %2683 = vrot.lane.b32.xlu2 %v2340_v44, %s4573_s30  ;;  %v2598_v53 = vmul.f32 %v4303_v58, %v6057_v27  ;;  %v3837_v14 = vmul.f32 -1.442695, %v878_v49  ;;  %v2590_v42 = vsel %vm6118_vm2, %v6065_v35, %v2586_v9  ;;  %vm2528_vm1 = vweird.f32 %v6092_v57  ;;  %v6178_v31 = vpop.f32.mrf.mxu0  ;;  %3067 = vmatpush.bf16.msrb.mxu1 %v3945_v41 }
 0x48a   : > { %v2526_v7 = vadd.f32 %v6092_v57, %v2525_v26  ;;  %v2531_v50 = vand.u32 2147483647, %v6046_v59  ;;  %v2533_v39 = vand.u32 2147483648, %v6046_v59  ;;  %v3838_v29 = vmul.f32 -1.442695, %v879_v2 }
 0x48b   : > { %v6130_v51 = vpop.eup %4304  ;;  %v2599_v22 = vsub.f32 1.0, %v2598_v53  ;;  %4306 = vpow2.f32 %v3837_v14  ;;  %vm2592_vm3 = vcmp.eq.f32.partialorder %v2591_v5, 8.507059e+37  ;;  %vm2527_vm4 = vweird.f32 %v6046_v59  ;;  %v3950_v53 = vld [vmem:[#allocation8 + $0x30] sm:$0xff] }
 0x48c   : > { %2675 = vrot.lane.b32.xlu1 %v2280_v45, %s4573_s30  ;;  %v2538_v38 = vmul.f32 %v6130_v51, %v6083_v1  ;;  %v2595_v46 = vsel %vm2592_vm3, %v2594_v4, %v2590_v42  ;;  %vm6136_vm5 = vmor %vm2527_vm4, %vm2528_vm1  ;;  %4308 = vpow2.f32 %v3838_v29  ;;  %vm2603_vm6 = vweird.f32 %v4303_v58  ;;  %v3949_v29 = vld [vmem:[#allocation8 + $0x28] sm:$0xff] }
 0x48d   : > { %v2600_v60 = vmul.f32 %v4303_v58, %v2599_v22  ;;  %v2530_v20 = vsel %vm6136_vm5, %v6092_v57, %v2526_v7  ;;  %v896_v59 = vadd.f32 %v5539_v52, %v5073_v56  ;;  %vm2532_vm7 = vcmp.eq.f32.partialorder %v2531_v50, 8.507059e+37  ;;  %3068 = vmatpush.bf16.msrb.mxu1 %v3944_v36  ;;  %v6205_v36 = vpop.f32.mrf.mxu2 }
 0x48e   : > { %v2539_v16 = vsub.f32 1.0, %v2538_v38  ;;  %v2534_v12 = vor.u32 1.1754944e-38, %v2533_v39  ;;  %v2608_v6 = vand.u32 2147483648, %v6057_v27  ;;  %vm2602_vm8 = vweird.f32 %v6057_v27 }
 0x48f   : > { %v2601_v54 = vadd.f32 %v4303_v58, %v2600_v60  ;;  %v2606_v35 = vand.u32 2147483647, %v6057_v27  ;;  %v3855_v63 = vmul.f32 -1.442695, %v896_v59  ;;  %vm6151_vm9 = vmor %vm2602_vm8, %vm2603_vm6  ;;  %vm2543_vm10 = vweird.f32 %v6130_v51 }
 0x490   : > { %v2540_v17 = vmul.f32 %v6130_v51, %v2539_v16  ;;  %v2535_v8 = vsel %vm2532_vm7, %v2534_v12, %v2530_v20  ;;  %v2609_v10 = vor.u32 1.1754944e-38, %v2608_v6  ;;  %v2548_v43 = vand.u32 2147483648, %v6083_v1  ;;  %v3948_v16 = vld [vmem:[#allocation8 + $0x20] sm:$0xff] }
 0x491   : > { %2717 = vrot.lane.b32.xlu2 %v2595_v46, %s4573_s30  ;;  %v4307_v0 = vpop.eup %4306  ;;  %v2605_v56 = vsel %vm6151_vm9, %v4303_v58, %v2601_v54  ;;  %4310 = vpow2.f32 %v3855_v63  ;;  %vm2607_vm11 = vcmp.eq.f32.partialorder %v2606_v35, 8.507059e+37  ;;  %vm2542_vm12 = vweird.f32 %v6083_v1  ;;  %v1715_v42 = vpop.f32.mrf.mxu0 }
 0x492   : > { %v2541_v52 = vadd.f32 %v6130_v51, %v2540_v17  ;;  %v6160_v27 = vadd.f32 1.0, %v4307_v0  ;;  %v4309_v48 = vpop.eup %4308  ;;  %v2546_v13 = vand.u32 2147483647, %v6083_v1  ;;  %v2610_v3 = vsel %vm2607_vm11, %v2609_v10, %v2605_v56  ;;  %vm6168_vm14 = vmor %vm2542_vm12, %vm2543_vm10  ;;  %v3951_v1 = vld [vmem:[#allocation8 + $0x38] sm:$0xff]  ;;  %v1751_v0 = vpop.f32.mrf.mxu1 }
 0x493   : > { %v6172_v11 = vadd.f32 1.0, %v4309_v48  ;;  %v2756_v24 = vmul.f32 %v2662_v19, %v1710_v32  ;;  %v2549_v25 = vor.u32 1.1754944e-38, %v2548_v43  ;;  %2928 = vmatpush.bf16.msrb.mxu0 %v3951_v1 }
 0x494   : > { %2709 = vrot.lane.b32.xlu1 %v2535_v8, %s4573_s30  ;;  %4312 = vrcp.f32 %v6160_v27  ;;  %v2545_v57 = vsel %vm6168_vm14, %v6130_v51, %v2541_v52  ;;  %vm2547_vm13 = vcmp.eq.f32.partialorder %v2546_v13, 8.507059e+37  ;;  %v2353_v5 = vand.u32 2147483648, %v6160_v27  ;;  %v2666_v13 = vpop.permute.xlu2 %2665 }
 0x495   : > { %4314 = vrcp.f32 %v6172_v11  ;;  %v2550_v44 = vsel %vm2547_vm13, %v2549_v25, %v2545_v57  ;;  %v2788_v61 = vpack.c.bf16 %v2756_v24, %v2756_v24  ;;  %vm2347_vm2 = vweird.f32 %v6160_v27 }
 0x496   : > { %v2354_v51 = vor.u32 1.1754944e-38, %v2353_v5  ;;  %v2368_v62 = vand.u32 2147483648, %v6172_v11  ;;  %vm2362_vm5 = vweird.f32 %v6172_v11  ;;  %v2366_v20 = vand.u32 2147483647, %v6172_v11 }
 0x497   : > { %v4311_v21 = vpop.eup %4310  ;;  %v2990_v58 = vunpack.c.l.b16 %v2788_v61  ;;  %2929 = vmatpush.bf16.msrb.mxu0 %v3950_v53  ;;  %v2758_v49 = vmul.f32 %v2666_v13, %v1715_v42 }
 0x498   : > { %v6181_v23 = vadd.f32 1.0, %v4311_v21  ;;  %v2369_v54 = vor.u32 1.1754944e-38, %v2368_v62  ;;  %vm2367_vm7 = vcmp.eq.f32.partialorder %v2366_v20, 8.507059e+37 }
 0x499   : > { %2719 = vrot.lane.b32.xlu2 %v2610_v3, %s4573_s30  ;;  %v1880_v59 = vpop.f32.mrf.mxu0  ;;  %v2790_v25 = vpack.c.bf16 %v2758_v49, %v2758_v49 }
 0x49a   : > { %v4313_v28 = vpop.eup %4312  ;;  %4316 = vrcp.f32 %v6181_v23  ;;  %v2623_v63 = vand.u32 2147483648, %v6181_v23  ;;  %vm2617_vm9 = vweird.f32 %v6181_v23  ;;  %v2621_v8 = vand.u32 2147483647, %v6181_v23  ;;  %v1753_v57 = vpop.f32.mrf.mxu1 }
 0x49b   : > { %v2343_v18 = vmul.f32 %v4313_v28, %v6160_v27  ;;  %v4315_v37 = vpop.eup %4314  ;;  %vm2348_vm15 = vweird.f32 %v4313_v28  ;;  %2930 = vmatpush.bf16.msrb.mxu0 %v3949_v29 }
 0x49c   : > { %v2660_v34 = vpop.permute.xlu1 %2659  ;;  %2711 = vrot.lane.b32.xlu1 %v2550_v44, %s4573_s30  ;;  %v2358_v26 = vmul.f32 %v4315_v37, %v6172_v11  ;;  %vm2349_vm1 = vmor %vm2347_vm2, %vm2348_vm15  ;;  %vm2363_vm4 = vweird.f32 %v4315_v37  ;;  %v2624_v52 = vor.u32 1.1754944e-38, %v2623_v63  ;;  %vm2622_vm11 = vcmp.eq.f32.partialorder %v2621_v8, 8.507059e+37 }
 0x49d   : > { %v2755_v40 = vmul.f32 %v2660_v34, %v6099_v33  ;;  %v2344_v2 = vsub.f32 1.0, %v2343_v18  ;;  %v2351_v33 = vand.u32 2147483647, %v6160_v27  ;;  %vm2364_vm6 = vmor %vm2362_vm5, %vm2363_vm4  ;;  %v2992_v34 = vunpack.c.l.b16 %v2790_v25 }
 0x49e   : > { %v2359_v4 = vsub.f32 1.0, %v2358_v26 }
 0x49f   : > { %v2787_v9 = vpack.c.bf16 %v2755_v40, %v2755_v40  ;;  %v2345_v45 = vmul.f32 %v4313_v28, %v2344_v2  ;;  %vm2352_vm3 = vcmp.eq.f32.partialorder %v2351_v33, 8.507059e+37  ;;  %2931 = vmatpush.bf16.msrb.mxu0 %v3948_v16  ;;  %v2668_v2 = vpop.permute.xlu2 %2667  ;;  %v1796_v33 = vpop.f32.mrf.mxu2 }
 0x4a0   : > { %v4317_v14 = vpop.eup %4316  ;;  %v2360_v39 = vmul.f32 %v4315_v37, %v2359_v4 }
 0x4a1   : > { %v2989_v15 = vunpack.c.l.b16 %v2787_v9  ;;  %v2346_v7 = vadd.f32 %v4313_v28, %v2345_v45  ;;  %v2613_v22 = vmul.f32 %v4317_v14, %v6181_v23  ;;  %vm2618_vm8 = vweird.f32 %v4317_v14  ;;  %v1882_v27 = vpop.f32.mrf.mxu0 }
 0x4a2   : > { %v2361_v30 = vadd.f32 %v4315_v37, %v2360_v39  ;;  %vm2619_vm10 = vmor %vm2617_vm9, %vm2618_vm8  ;;  %v1756_v23 = vpop.f32.mrf.mxu1 }
 0x4a3   : > { %v3005_v50 = vpack.c.b16 %v2990_v58, %v2989_v15  ;;  %v2350_v38 = vsel %vm2349_vm1, %v4313_v28, %v2346_v7  ;;  %v2614_v60 = vsub.f32 1.0, %v2613_v22  ;;  %v2759_v15 = vmul.f32 %v2668_v2, %v1751_v0  ;;  %v6212_v0 = vpop.f32.mrf.mxu3 }
 0x4a4   : > { %v2355_v46 = vsel %vm2352_vm3, %v2354_v51, %v2350_v38  ;;  %v2365_v32 = vsel %vm2364_vm6, %v4315_v37, %v2361_v30 }
 0x4a5   : > { %3896 = vmatmul.msk.bf16.vlgmr.msrb.gmra.mxu1 %vm971_vm0, %v3005_v50  ;;  %2685 = vrot.lane.b32.xlu1 %v2355_v46, %s4573_s30  ;;  %v2615_v12 = vmul.f32 %v4317_v14, %v2614_v60  ;;  %v2370_v35 = vsel %vm2367_vm7, %v2369_v54, %v2365_v32  ;;  %v2791_v7 = vpack.c.bf16 %v2759_v15, %v2759_v15 }
 0x4a7   : > { %v2616_v17 = vadd.f32 %v4317_v14, %v2615_v12  ;;  %v2700_v50 = vpop.permute.xlu2 %2699  ;;  %v2993_v29 = vunpack.c.l.b16 %v2791_v7  ;;  %v6208_v46 = vpop.f32.mrf.mxu2 }
 0x4a9   : > { %v2620_v56 = vsel %vm2619_vm10, %v4317_v14, %v2616_v17  ;;  %v1885_v28 = vpop.f32.mrf.mxu0 }
 0x4aa   : > { %v2625_v10 = vsel %vm2622_vm11, %v2624_v52, %v2620_v56  ;;  %v1758_v61 = vpop.f32.mrf.mxu1  ;;  %v2698_v18 = vpop.permute.xlu0 %2697 }
 0x4ad   : > { %v2692_v6 = vpop.permute.xlu1 %2691  ;;  %2687 = vrot.lane.b32.xlu1 %v2370_v35, %s4573_s30 }
 0x4ae   : > { %v2771_v47 = vmul.f32 %v2692_v6, %v1880_v59 }
 0x4af   : > { %v2672_v62 = vpop.permute.xlu2 %2671  ;;  %v1801_v35 = vpop.f32.mrf.mxu2 }
 0x4b0   : > { %v2803_v43 = vpack.c.bf16 %v2771_v47, %v2771_v47  ;;  %v2761_v52 = vmul.f32 %v2672_v62, %v1756_v23 }
 0x4b1   : > { %v1887_v9 = vpop.f32.mrf.mxu0 }
 0x4b2   : > { %v2852_v11 = vunpack.c.l.b16 %v2803_v43  ;;  %v2774_v37 = vmul.f32 %v2698_v18, %v1887_v9  ;;  %v1923_v5 = vpop.f32.mrf.mxu1  ;;  %v2704_v63 = vpop.permute.xlu0 %2703 }
 0x4b3   : > { %v2775_v60 = vmul.f32 %v2700_v50, %v1923_v5 }
 0x4b5   : > { %2721 = vrot.lane.b32.xlu1 %v2625_v10, %s4573_s30  ;;  %v2807_v16 = vpack.c.bf16 %v2775_v60, %v2775_v60  ;;  %s4502_s30 = sshra.s32 %s3546_s28, 4  ;;  %s4503_s30 = int_to_ptr.hbm [resolvable:$true] %s4502_s30 }
 0x4b6   : > { %v2694_v48 = vpop.permute.xlu1 %2693  ;;  %s4504_s12 = scalar_lea.hbm %s4503_s30, 128  ;;  %p4509_p7 = scmp.lt.s32.totalorder %s4503_s30, %s6547_s7 }
 0x4b7   : > { %v2772_v19 = vmul.f32 %v2694_v48, %v1882_v27  ;;  %v2856_v54 = vunpack.c.l.b16 %v2807_v16  ;;  %v1966_v48 = vpop.f32.mrf.mxu2  ;;  %p4505_p1 = scmp.ne.s32.totalorder %s4503_s30, %s4504_s12  ;;  %p4510_p2 = scmp.lt.s32.totalorder %s4508_s18, %s4504_s12 }
 0x4b9   : > { %v2804_v3 = vpack.c.bf16 %v2772_v19, %v2772_v19  ;;  %v2793_v19 = vpack.c.bf16 %v2761_v52, %v2761_v52  ;;  %p4506_p4 = pnand %p4505_p1, %p4701_p0  ;;  %p4511_p9 = por %p4510_p2, %p4509_p7 }
 0x4ba   : > { %v1925_v39 = vpop.f32.mrf.mxu1  ;;  %v2678_v25 = vpop.permute.xlu0 %2677 }
 0x4bb   : > { %v2853_v55 = vunpack.c.l.b16 %v2804_v3  ;;  %p4507_p8 = pneg %p4506_p4 }
 0x4bd   : > { %v2868_v24 = vpack.c.b16 %v2853_v55, %v2852_v11  ;;  %v1839_v55 = vpop.f32.mrf.mxu3  ;;  %p4512_p10 = pnand %p4511_p9, %p4507_p8 }
 0x4be   : > { %v2664_v1 = vpop.permute.xlu1 %2663  ;;  %v2706_v8 = vpop.permute.xlu2 %2705 }
 0x4bf   : > { %v2757_v41 = vmul.f32 %v2664_v1, %v6178_v31  ;;  %3872 = vmatmul.msk.bf16.vlgmr.msrb.gmra.mxu0 %vm971_vm0, %v2868_v24  ;;  %v2806_v31 = vpack.c.bf16 %v2774_v37, %v2774_v37 }
 0x4c1   : > { %v2789_v21 = vpack.c.bf16 %v2757_v41, %v2757_v41  ;;  %v2855_v4 = vunpack.c.l.b16 %v2806_v31 }
 0x4c2   : > { %v1928_v32 = vpop.f32.mrf.mxu1 }
 0x4c3   : > { %v2991_v44 = vunpack.c.l.b16 %v2789_v21  ;;  %v2777_v47 = vmul.f32 %v2704_v63, %v1928_v32 }
 0x4c5   : > { %v3006_v40 = vpack.c.b16 %v2992_v34, %v2991_v44  ;;  %v2809_v10 = vpack.c.bf16 %v2777_v47, %v2777_v47  ;;  %v1968_v44 = vpop.f32.mrf.mxu2 }
 0x4c6   : > { %v2708_v23 = vpop.permute.xlu2 %2707 }
 0x4c7   : > { %3897 = vmatmul.msk.bf16.gmra.mxu1 %vm971_vm0, %v3006_v40  ;;  %v2858_v11 = vunpack.c.l.b16 %v2809_v10  ;;  %v2779_v18 = vmul.f32 %v2708_v23, %v1966_v48 }
 0x4c9   : > { %v2811_v31 = vpack.c.bf16 %v2779_v18, %v2779_v18 }
 0x4ca   : > { %v1930_v56 = vpop.f32.mrf.mxu1 }
 0x4cb   : > { %v2778_v27 = vmul.f32 %v2706_v8, %v1930_v56 }
 0x4cd   : > { %v2810_v3 = vpack.c.bf16 %v2778_v27, %v2778_v27 }
 0x4cf   : > { %v2859_v1 = vunpack.c.l.b16 %v2810_v3 }
 0x4d1   : > { %v2871_v21 = vpack.c.b16 %v2859_v1, %v2858_v11 }
 0x4d5   : > { %v2696_v58 = vpop.permute.xlu1 %2695 }
 0x4d6   : > { %v2773_v26 = vmul.f32 %v2696_v58, %v1885_v28  ;;  %v6217_v28 = vpop.f32.mrf.mxu3  ;;  %v2680_v58 = vpop.permute.xlu0 %2679 }
 0x4d8   : > { %v2805_v45 = vpack.c.bf16 %v2773_v26, %v2773_v26  ;;  %v1971_v26 = vpop.f32.mrf.mxu2 }
 0x4da   : > { %v2854_v53 = vunpack.c.l.b16 %v2805_v45 }
 0x4db   : > { %v2682_v7 = vpop.permute.xlu2 %2681 }
 0x4dc   : > { %v2869_v14 = vpack.c.b16 %v2855_v4, %v2854_v53 }
 0x4dd   : > { %v2670_v42 = vpop.permute.xlu1 %2669 }
 0x4de   : > { %v2760_v51 = vmul.f32 %v2670_v42, %v1753_v57  ;;  %3873 = vmatmul.msk.bf16.gmra.mxu0 %vm971_vm0, %v2869_v14  ;;  %v2995_v57 = vunpack.c.l.b16 %v2793_v19  ;;  %v2860_v14 = vunpack.c.l.b16 %v2811_v31  ;;  %v1844_v42 = vpop.f32.mrf.mxu3 }
 0x4e0   : > { %v2792_v22 = vpack.c.bf16 %v2760_v51, %v2760_v51 }
 0x4e2   : > { %v2994_v38 = vunpack.c.l.b16 %v2792_v22 }
 0x4e4   : > { %v3007_v30 = vpack.c.b16 %v2994_v38, %v2993_v29  ;;  %v1973_v29 = vpop.f32.mrf.mxu2  ;;  %v2766_v38 = vmul.f32 %v2682_v7, %v1801_v35 }
 0x4e6   : > { %3898 = vmatmul.msk.bf16.gmra.mxu1 %vm971_vm0, %v3007_v30  ;;  %v2009_v60 = vpop.f32.mrf.mxu3  ;;  %v2798_v16 = vpack.c.bf16 %v2766_v38, %v2766_v38 }
 0x4e8   : > { %v2702_v20 = vpop.permute.xlu1 %2701 }
 0x4e9   : > { %v2776_v59 = vmul.f32 %v2702_v20, %v1925_v39  ;;  %v2714_v39 = vpop.permute.xlu0 %2713 }
 0x4ea   : > { %v2782_v30 = vmul.f32 %v2714_v39, %v1973_v29  ;;  %v4353_v29 = vld [vmem:[%s4737_s13 + $0x8] sm:$0xff] }
 0x4eb   : > { %v2808_v12 = vpack.c.bf16 %v2776_v59, %v2776_v59  ;;  %v2684_v59 = vpop.permute.xlu2 %2683 }
 0x4ec   : > { %v2814_v32 = vpack.c.bf16 %v2782_v30, %v2782_v30  ;;  %v2767_v48 = vmul.f32 %v2684_v59, %v6212_v0  ;;  %v4354_v59 = vld [vmem:[%s4737_s13 + $0x10] sm:$0xff] }
 0x4ed   : > { %v2857_v6 = vunpack.c.l.b16 %v2808_v12 }
 0x4ee   : > { %v2863_v63 = vunpack.c.l.b16 %v2814_v32  ;;  %v2011_v56 = vpop.f32.mrf.mxu3  ;;  %v2799_v3 = vpack.c.bf16 %v2767_v48, %v2767_v48 }
 0x4ef   : > { %v2870_v17 = vpack.c.b16 %v2857_v6, %v2856_v54  ;;  %v3000_v6 = vunpack.c.l.b16 %v2798_v16 }
 0x4f0   : > { %v3001_v1 = vunpack.c.l.b16 %v2799_v3 }
 0x4f1   : > { %3874 = vmatmul.msk.bf16.gmra.mxu0 %vm971_vm0, %v2870_v17 }
 0x4f3   : > { %v2718_v35 = vpop.permute.xlu2 %2717 }
 0x4f4   : > { %v2784_v10 = vmul.f32 %v2718_v35, %v2011_v56 }
 0x4f6   : > { %v2674_v43 = vpop.permute.xlu1 %2673  ;;  %v2816_v11 = vpack.c.bf16 %v2784_v10, %v2784_v10 }
 0x4f7   : > { %v2762_v13 = vmul.f32 %v2674_v43, %v1758_v61  ;;  %v2764_v61 = vmul.f32 %v2678_v25, %v1796_v33  ;;  %v2765_v33 = vmul.f32 %v2680_v58, %v6208_v46  ;;  %v2716_v46 = vpop.permute.xlu0 %2715 }
 0x4f8   : > { %v2783_v27 = vmul.f32 %v2716_v46, %v2009_v60  ;;  %v2865_v25 = vunpack.c.l.b16 %v2816_v11 }
 0x4f9   : > { %v2794_v49 = vpack.c.bf16 %v2762_v13, %v2762_v13  ;;  %v2796_v2 = vpack.c.bf16 %v2764_v61, %v2764_v61  ;;  %v2797_v62 = vpack.c.bf16 %v2765_v33, %v2765_v33 }
 0x4fa   : > { %v2815_v13 = vpack.c.bf16 %v2783_v27, %v2783_v27 }
 0x4fb   : > { %v2996_v24 = vunpack.c.l.b16 %v2794_v49  ;;  %v2998_v4 = vunpack.c.l.b16 %v2796_v2  ;;  %v2999_v12 = vunpack.c.l.b16 %v2797_v62  ;;  %v2014_v49 = vpop.f32.mrf.mxu3 }
 0x4fd   : > { %v3008_v41 = vpack.c.b16 %v2996_v24, %v2995_v57  ;;  %v3010_v8 = vpack.c.b16 %v3000_v6, %v2999_v12  ;;  %v2864_v24 = vunpack.c.l.b16 %v2815_v13 }
 0x4fe   : > { %v2676_v34 = vpop.permute.xlu1 %2675 }
 0x4ff   : > { %3899 = vmatmul.msk.bf16.gmra.mxu1 %vm971_vm0, %v3008_v41  ;;  %v2763_v40 = vmul.f32 %v2676_v34, %v6205_v36 }
 0x501   : > { %3875 = vmatmul.msk.bf16.gmra.mxu0 %vm971_vm0, %v2871_v21  ;;  %v2795_v9 = vpack.c.bf16 %v2763_v40, %v2763_v40  ;;  %v2874_v21 = vpack.c.b16 %v2865_v25, %v2864_v24  ;;  %v4358_v24 = vld [vmem:[%s4737_s13 + $0x30] sm:$0xff] }
 0x503   : > { %v2997_v45 = vunpack.c.l.b16 %v2795_v9  ;;  %v2016_v0 = vpop.f32.mrf.mxu3 }
 0x505   : > { %v3009_v50 = vpack.c.b16 %v2998_v4, %v2997_v45  ;;  %v6231_v45 = vld [vmem:[%s6544_s4] ss:$0 sm:$0xff] }
 0x506   : > { %v2710_v37 = vpop.permute.xlu1 %2709 }
 0x507   : > { %v2780_v5 = vmul.f32 %v2710_v37, %v1968_v44  ;;  %v2720_v44 = vpop.permute.xlu2 %2719 }
 0x508   : > { %v2785_v18 = vmul.f32 %v2720_v44, %v2014_v49 }
 0x509   : > { %v2812_v15 = vpack.c.bf16 %v2780_v5, %v2780_v5 }
 0x50a   : > { %v2817_v58 = vpack.c.bf16 %v2785_v18, %v2785_v18  ;;  %v4360_v18 = vld [vmem:[%s4737_s13 + $0x40] sm:$0xff] }
 0x50b   : > { %v2861_v53 = vunpack.c.l.b16 %v2812_v15 }
 0x50d   : > { %v2872_v36 = vpack.c.b16 %v2861_v53, %v2860_v14 }
 0x50e   : > { %v2712_v51 = vpop.permute.xlu1 %2711 }
 0x50f   : > { %3900 = vmatmul.msk.bf16.gmra.mxu1 %vm971_vm0, %v3009_v50  ;;  %v2781_v22 = vmul.f32 %v2712_v51, %v1971_v26  ;;  %v4352_v50 = vld [vmem:[%s4737_s13] sm:$0xff] }
 0x511   : > { %3876 = vmatmul.msk.bf16.gmra.mxu0 %vm971_vm0, %v2872_v36  ;;  %v2813_v20 = vpack.c.bf16 %v2781_v22, %v2781_v22 }
 0x513   : > { %v2862_v54 = vunpack.c.l.b16 %v2813_v20 }
 0x515   : > { %v2873_v47 = vpack.c.b16 %v2863_v63, %v2862_v54 }
 0x517   : > { %v2686_v17 = vpop.permute.xlu1 %2685 }
 0x518   : > { %v2768_v52 = vmul.f32 %v2686_v17, %v1839_v55  ;;  %v2690_v55 = vpop.permute.xlu0 %2689  ;;  %v4355_v17 = vld [vmem:[%s4737_s13 + $0x18] sm:$0xff] }
 0x519   : > { %v2770_v61 = vmul.f32 %v2690_v55, %v1844_v42  ;;  %v4359_v55 = vld [vmem:[%s4737_s13 + $0x38] sm:$0xff] }
 0x51a   : > { %v2800_v43 = vpack.c.bf16 %v2768_v52, %v2768_v52  ;;  %v4356_v52 = vld [vmem:[%s4737_s13 + $0x20] sm:$0xff] }
 0x51b   : > { %v2802_v2 = vpack.c.bf16 %v2770_v61, %v2770_v61 }
 0x51c   : > { %v3002_v57 = vunpack.c.l.b16 %v2800_v43 }
 0x51d   : > { %v3004_v15 = vunpack.c.l.b16 %v2802_v2 }
 0x51e   : > { %v3011_v41 = vpack.c.b16 %v3002_v57, %v3001_v1 }
 0x51f   : > { %3901 = vmatmul.msk.bf16.gmra.mxu1 %vm971_vm0, %v3010_v8  ;;  %v2688_v19 = vpop.permute.xlu1 %2687 }
 0x520   : > { %v2769_v23 = vmul.f32 %v2688_v19, %v6217_v28  ;;  %v2866_v28 = vunpack.c.l.b16 %v2817_v58  ;;  %v4357_v19 = vld [vmem:[%s4737_s13 + $0x28] sm:$0xff] }
 0x521   : > { %3877 = vmatmul.msk.bf16.gmra.mxu0 %vm971_vm0, %v2873_v47 }
 0x522   : > { %v2801_v9 = vpack.c.bf16 %v2769_v23, %v2769_v23  ;;  %v3070_v31 = vpop.f32.mrf.mxu1 }
 0x524   : > { %v3003_v5 = vunpack.c.l.b16 %v2801_v9 }
 0x526   : > { %v3012_v14 = vpack.c.b16 %v3004_v15, %v3003_v5 }
 0x527   : > { %v2722_v34 = vpop.permute.xlu1 %2721 }
 0x528   : > { %v2786_v40 = vmul.f32 %v2722_v34, %v2016_v0 }
 0x52a   : > { %v2818_v37 = vpack.c.bf16 %v2786_v40, %v2786_v40  ;;  %v3072_v51 = vpop.f32.mrf.mxu1 }
 0x52c   : > { %v2867_v26 = vunpack.c.l.b16 %v2818_v37 }
 0x52e   : > { %v2875_v42 = vpack.c.b16 %v2867_v26, %v2866_v28 }
 0x52f   : > { %3902 = vmatmul.msk.bf16.gmra.mxu1 %vm971_vm0, %v3011_v41 }
 0x531   : > { %3878 = vmatmul.msk.bf16.gmra.mxu0 %vm971_vm0, %v2874_v21 }
 0x53c   : > { %v2933_v4 = vpop.f32.mrf.mxu0 }
 0x53d   : > { %v3071_v53 = vadd.f32 %v3070_v31, %v2933_v4  ;;  %v4361_v31 = vld [vmem:[%s4737_s13 + $0x48] sm:$0xff] }
 0x53f   : > { %v3114_v7 = vadd.f32 %v6231_v45, %v3071_v53  ;;  %3903 = vmatmul.msk.bf16.gmra.mxu1 %vm971_vm0, %v3012_v14  ;;  %v4362_v14 = vld [vmem:[%s4737_s13 + $0x50] sm:$0xff] }
 0x541   : > { %3879 = vmatmul.msk.bf16.gmra.mxu0 %vm971_vm0, %v2875_v42  ;;  %v6237_v36 = vadd.f32 %v4352_v50, %v3114_v7 }
 0x543   : > { %3148 = vadd.xlane.f32.xlu0 %v6237_v36 }
 0x544   : > { %v2935_v33 = vpop.f32.mrf.mxu0  ;;  %v3075_v30 = vpop.f32.mrf.mxu1 }
 0x545   : > { %v3073_v39 = vadd.f32 %v3072_v51, %v2935_v33 }
 0x547   : > { %v3115_v22 = vadd.f32 %v6231_v45, %v3073_v39  ;;  %v4574_v39 = vmov 128.0  }
 0x548   : > { %4318 = vrcp.f32 %v4574_v39 }
 0x549   : > { %v6242_v38 = vadd.f32 %v4353_v29, %v3115_v22  ;;  %v4363_v22 = vld [vmem:[%s4737_s13 + $0x58] sm:$0xff] }
 0x54b   : > { %3150 = vadd.xlane.f32.xlu2 %v6242_v38 }
 0x54c   : > { %v3077_v16 = vpop.f32.mrf.mxu1 }
 0x55b   : > { %v2938_v60 = vpop.f32.mrf.mxu0 }
 0x55c   : > { %v3076_v62 = vadd.f32 %v3075_v30, %v2938_v60 }
 0x55e   : > { %v3116_v20 = vadd.f32 %v6231_v45, %v3076_v62 }
 0x560   : > { %v6247_v32 = vadd.f32 %v4354_v59, %v3116_v20  ;;  %v4319_v20 = vpop.eup %4318 }
 0x561   : > { %v3181_v59 = vmul.f32 128.0, %v4319_v20  ;;  %vm3185_vm0 = vweird.f32 %v4319_v20 }
 0x562   : > { %3152 = vadd.xlane.f32.xlu1 %v6247_v32 }
 0x563   : > { %v2940_v12 = vpop.f32.mrf.mxu0  ;;  %v3080_v8 = vpop.f32.mrf.mxu1 }
 0x564   : > { %v3078_v54 = vadd.f32 %v3077_v16, %v2940_v12  ;;  %v4364_v12 = vld [vmem:[%s4737_s13 + $0x60] sm:$0xff] }
 0x566   : > { %v3117_v6 = vadd.f32 %v6231_v45, %v3078_v54 }
 0x568   : > { %v6252_v63 = vadd.f32 %v4355_v17, %v3117_v6  ;;  %v3182_v6 = vsub.f32 1.0, %v3181_v59 }
 0x56a   : > { %3154 = vadd.xlane.f32.xlu0 %v6252_v63 }
 0x56b   : > { %v3082_v35 = vpop.f32.mrf.mxu1 }
 0x56e   : > { %v2943_v47 = vpop.f32.mrf.mxu0 }
 0x56f   : > { %v3081_v56 = vadd.f32 %v3080_v8, %v2943_v47  ;;  %v3183_v8 = vmul.f32 %v4319_v20, %v3182_v6 }
 0x571   : > { %v3118_v46 = vadd.f32 %v6231_v45, %v3081_v56 }
 0x573   : > { %v6257_v27 = vadd.f32 %v4356_v52, %v3118_v46  ;;  %v3184_v46 = vadd.f32 %v4319_v20, %v3183_v8 }
 0x575   : > { %3156 = vadd.xlane.f32.xlu2 %v6257_v27 }
 0x576   : > { %v2945_v48 = vpop.f32.mrf.mxu0 }
 0x577   : > { %v3083_v10 = vadd.f32 %v3082_v35, %v2945_v48  ;;  %v6301_v48 = vsel %vm3185_vm0, %v4319_v20, %v3184_v46 }
 0x579   : > { %v3119_v43 = vadd.f32 %v6231_v45, %v3083_v10 }
 0x57b   : > { %v6262_v13 = vadd.f32 %v4357_v19, %v3119_v43  ;;  %v4365_v43 = vld [vmem:[%s4737_s13 + $0x68] sm:$0xff] }
 0x57c   : > { %v3085_v3 = vpop.f32.mrf.mxu1 }
 0x57d   : > { %3158 = vadd.xlane.f32.xlu1 %v6262_v13 }
 0x57e   : > { %v2948_v49 = vpop.f32.mrf.mxu0 }
 0x57f   : > { %v3086_v11 = vadd.f32 %v3085_v3, %v2948_v49 }
 0x581   : > { %v3120_v57 = vadd.f32 %v6231_v45, %v3086_v11 }
 0x583   : > { %v6267_v1 = vadd.f32 %v4358_v24, %v3120_v57 }
 0x584   : > { %v3087_v25 = vpop.f32.mrf.mxu1 }
 0x585   : > { %3160 = vadd.xlane.f32.xlu0 %v6267_v1 }
 0x586   : > { %v2950_v41 = vpop.f32.mrf.mxu0 }
 0x587   : > { %v3088_v21 = vadd.f32 %v3087_v25, %v2950_v41 }
 0x589   : > { %v3121_v34 = vadd.f32 %v6231_v45, %v3088_v21 }
 0x58b   : > { %v6272_v0 = vadd.f32 %v4359_v55, %v3121_v34  ;;  %v4366_v34 = vld [vmem:[%s4737_s13 + $0x70] sm:$0xff] }
 0x58c   : > { %v3090_v44 = vpop.f32.mrf.mxu1 }
 0x58d   : > { %3162 = vadd.xlane.f32.xlu2 %v6272_v0 }
 0x58e   : > { %v2953_v23 = vpop.f32.mrf.mxu0 }
 0x58f   : > { %v3091_v40 = vadd.f32 %v3090_v44, %v2953_v23 }
 0x591   : > { %v3122_v61 = vadd.f32 %v6231_v45, %v3091_v40 }
 0x593   : > { %v6277_v9 = vadd.f32 %v4360_v18, %v3122_v61 }
 0x594   : > { %v3092_v37 = vpop.f32.mrf.mxu1 }
 0x595   : > { %3164 = vadd.xlane.f32.xlu1 %v6277_v9 }
 0x596   : > { %v2955_v2 = vpop.f32.mrf.mxu0 }
 0x597   : > { %v3093_v58 = vadd.f32 %v3092_v37, %v2955_v2  ;;  %v4367_v37 = vld [vmem:[%s4737_s13 + $0x78] sm:$0xff]  ;;  %s3530_s13 = scalar_lea.sflag [#allocation4], %s4731_s10 }
 0x599   : > { %v3123_v5 = vadd.f32 %v6231_v45, %v3093_v58 }
 0x59b   : > { %v6282_v26 = vadd.f32 %v4361_v31, %v3123_v5 }
 0x59c   : > { %v3095_v15 = vpop.f32.mrf.mxu1 }
 0x59d   : > { %3166 = vadd.xlane.f32.xlu0 %v6282_v26 }
 0x59e   : > { %v2958_v4 = vpop.f32.mrf.mxu0 }
 0x59f   : > { %v3096_v28 = vadd.f32 %v3095_v15, %v2958_v4 }
 0x5a1   : > { %v3124_v53 = vadd.f32 %v6231_v45, %v3096_v28 }
 0x5a3   : > { %v6287_v42 = vadd.f32 %v4362_v14, %v3124_v53 }
 0x5a4   : > { %v3097_v7 = vpop.f32.mrf.mxu1 }
 0x5a5   : > { %3168 = vadd.xlane.f32.xlu2 %v6287_v42 }
 0x5a6   : > { %v2960_v50 = vpop.f32.mrf.mxu0 }
 0x5a7   : > { %v3098_v51 = vadd.f32 %v3097_v7, %v2960_v50 }
 0x5a9   : > { %v3125_v33 = vadd.f32 %v6231_v45, %v3098_v51 }
 0x5ab   : > { %v6292_v29 = vadd.f32 %v4363_v22, %v3125_v33 }
 0x5ac   : > { %v3100_v30 = vpop.f32.mrf.mxu1 }
 0x5ad   : > { %3170 = vadd.xlane.f32.xlu1 %v6292_v29 }
 0x5ae   : > { %v2963_v60 = vpop.f32.mrf.mxu0 }
 0x5af   : > { %v3101_v62 = vadd.f32 %v3100_v30, %v2963_v60 }
 0x5b1   : > { %v3126_v16 = vadd.f32 %v6231_v45, %v3101_v62 }
 0x5b3   : > { %v6297_v54 = vadd.f32 %v4364_v12, %v3126_v16 }
 0x5b4   : > { %v3102_v17 = vpop.f32.mrf.mxu1 }
 0x5b5   : > { %3172 = vadd.xlane.f32.xlu0 %v6297_v54 }
 0x5b6   : > { %v2965_v47 = vpop.f32.mrf.mxu0  ;;  %v3149_v35 = vpop.xlane.xlu0 %3148 }
 0x5b7   : > { %v3103_v56 = vadd.f32 %v3102_v17, %v2965_v47  ;;  %v3187_v10 = vmul.f32 %v6301_v48, %v3149_v35 }
 0x5b9   : > { %v3127_v52 = vadd.f32 %v6231_v45, %v3103_v56  ;;  %v6309_v49 = vsub.f32 %v6237_v36, %v3187_v10 }
 0x5bb   : > { %v6305_v19 = vadd.f32 %v4365_v43, %v3127_v52  ;;  %v3219_v41 = vmul.f32 %v6309_v49, %v6309_v49 }
 0x5bc   : > { %v3105_v3 = vpop.f32.mrf.mxu1 }
 0x5bd   : > { %3174 = vadd.xlane.f32.xlu2 %v6305_v19 }
 0x5be   : > { %v2968_v11 = vpop.f32.mrf.mxu0  ;;  %v3151_v57 = vpop.xlane.xlu2 %3150 }
 0x5bf   : > { %v3106_v24 = vadd.f32 %v3105_v3, %v2968_v11  ;;  %v3188_v21 = vmul.f32 %v6301_v48, %v3151_v57 }
 0x5c1   : > { %v3128_v25 = vadd.f32 %v6231_v45, %v3106_v24  ;;  %v6320_v36 = vsub.f32 %v6242_v38, %v3188_v21 }
 0x5c3   : > { %v6316_v55 = vadd.f32 %v4366_v34, %v3128_v25  ;;  %v3220_v18 = vmul.f32 %v6320_v36, %v6320_v36 }
 0x5c4   : > { %v3107_v44 = vpop.f32.mrf.mxu1 }
 0x5c5   : > { %3176 = vadd.xlane.f32.xlu1 %v6316_v55  ;;  %3235 = vadd.xlane.f32.xlu2 %v3219_v41 }
 0x5c6   : > { %v2970_v23 = vpop.f32.mrf.mxu0 }
 0x5c7   : > { %v3108_v40 = vadd.f32 %v3107_v44, %v2970_v23 }
 0x5c9   : > { %v3129_v61 = vadd.f32 %v6231_v45, %v3108_v40 }
 0x5cb   : > { %v6326_v2 = vadd.f32 %v4367_v37, %v3129_v61 }
 0x5cd   : > { %3178 = vadd.xlane.f32.xlu0 %v6326_v2  ;;  %3237 = vadd.xlane.f32.xlu1 %v3220_v18 }
 0x5d5   : > { %v3153_v58 = vpop.xlane.xlu1 %3152 }
 0x5d6   : > { %v3189_v5 = vmul.f32 %v6301_v48, %v3153_v58 }
 0x5d8   : > { %v6331_v38 = vsub.f32 %v6247_v32, %v3189_v5 }
 0x5da   : > { %v3221_v31 = vmul.f32 %v6331_v38, %v6331_v38 }
 0x5dc   : > { %3239 = vadd.xlane.f32.xlu0 %v3221_v31 }
 0x5dd   : > { %v3155_v45 = vpop.xlane.xlu0 %3154 }
 0x5de   : > { %v3190_v15 = vmul.f32 %v6301_v48, %v3155_v45 }
 0x5e0   : > { %v6337_v4 = vsub.f32 %v6252_v63, %v3190_v15 }
 0x5e2   : > { %v3222_v28 = vmul.f32 %v6337_v4, %v6337_v4 }
 0x5e4   : > { %3241 = vadd.xlane.f32.xlu2 %v3222_v28 }
 0x5e8   : > { %v3157_v53 = vpop.xlane.xlu2 %3156 }
 0x5e9   : > { %v3191_v14 = vmul.f32 %v6301_v48, %v3157_v53 }
 0x5eb   : > { %v6343_v32 = vsub.f32 %v6257_v27, %v3191_v14 }
 0x5ed   : > { %v3223_v7 = vmul.f32 %v6343_v32, %v6343_v32 }
 0x5ef   : > { %3243 = vadd.xlane.f32.xlu1 %v3223_v7 }
 0x5f0   : > { %v3159_v50 = vpop.xlane.xlu1 %3158 }
 0x5f1   : > { %v3192_v51 = vmul.f32 %v6301_v48, %v3159_v50 }
 0x5f3   : > { %v6349_v63 = vsub.f32 %v6262_v13, %v3192_v51 }
 0x5f5   : > { %v3224_v33 = vmul.f32 %v6349_v63, %v6349_v63 }
 0x5f7   : > { %3245 = vadd.xlane.f32.xlu0 %v3224_v33 }
 0x5f8   : > { %v3161_v39 = vpop.xlane.xlu0 %3160 }
 0x5f9   : > { %v3193_v22 = vmul.f32 %v6301_v48, %v3161_v39  ;;  %v6423_v39 = vld [vmem:[%s6546_s6] ss:$0 sm:$0xff] }
 0x5fb   : > { %v6355_v27 = vsub.f32 %v6267_v1, %v3193_v22 }
 0x5fd   : > { %v3225_v30 = vmul.f32 %v6355_v27, %v6355_v27 }
 0x5ff   : > { %3247 = vadd.xlane.f32.xlu2 %v3225_v30 }
 0x600   : > { %v3163_v60 = vpop.xlane.xlu2 %3162 }
 0x601   : > { %v3194_v62 = vmul.f32 %v6301_v48, %v3163_v60 }
 0x603   : > { %v6361_v13 = vsub.f32 %v6272_v0, %v3194_v62 }
 0x605   : > { %v3226_v20 = vmul.f32 %v6361_v13, %v6361_v13 }
 0x607   : > { %3249 = vadd.xlane.f32.xlu1 %v3226_v20 }
 0x608   : > { %v3165_v16 = vpop.xlane.xlu1 %3164 }
 0x609   : > { %v3195_v59 = vmul.f32 %v6301_v48, %v3165_v16 }
 0x60b   : > { %v6367_v1 = vsub.f32 %v6277_v9, %v3195_v59 }
 0x60d   : > { %v3227_v12 = vmul.f32 %v6367_v1, %v6367_v1 }
 0x60f   : > { %3251 = vadd.xlane.f32.xlu0 %v3227_v12 }
 0x610   : > { %v3167_v6 = vpop.xlane.xlu0 %3166 }
 0x611   : > { %v3196_v17 = vmul.f32 %v6301_v48, %v3167_v6 }
 0x613   : > { %v6373_v0 = vsub.f32 %v6282_v26, %v3196_v17 }
 0x615   : > { %v3228_v8 = vmul.f32 %v6373_v0, %v6373_v0 }
 0x617   : > { %3253 = vadd.xlane.f32.xlu2 %v3228_v8 }
 0x618   : > { %v3169_v47 = vpop.xlane.xlu2 %3168 }
 0x619   : > { %v3197_v56 = vmul.f32 %v6301_v48, %v3169_v47 }
 0x61b   : > { %v6379_v9 = vsub.f32 %v6287_v42, %v3197_v56 }
 0x61d   : > { %v3229_v46 = vmul.f32 %v6379_v9, %v6379_v9 }
 0x61f   : > { %3255 = vadd.xlane.f32.xlu1 %v3229_v46 }
 0x620   : > { %v3171_v35 = vpop.xlane.xlu1 %3170 }
 0x621   : > { %v3198_v52 = vmul.f32 %v6301_v48, %v3171_v35 }
 0x623   : > { %v6385_v26 = vsub.f32 %v6292_v29, %v3198_v52 }
 0x625   : > { %v3230_v10 = vmul.f32 %v6385_v26, %v6385_v26 }
 0x627   : > { %3257 = vadd.xlane.f32.xlu0 %v3230_v10 }
 0x628   : > { %v3173_v43 = vpop.xlane.xlu0 %3172 }
 0x629   : > { %v3199_v3 = vmul.f32 %v6301_v48, %v3173_v43 }
 0x62b   : > { %v6391_v42 = vsub.f32 %v6297_v54, %v3199_v3 }
 0x62d   : > { %v3231_v11 = vmul.f32 %v6391_v42, %v6391_v42 }
 0x62f   : > { %3259 = vadd.xlane.f32.xlu2 %v3231_v11 }
 0x630   : > { %v3175_v57 = vpop.xlane.xlu2 %3174 }
 0x631   : > { %v3200_v24 = vmul.f32 %v6301_v48, %v3175_v57 }
 0x633   : > { %v6397_v29 = vsub.f32 %v6305_v19, %v3200_v24 }
 0x635   : > { %v3232_v25 = vmul.f32 %v6397_v29, %v6397_v29 }
 0x637   : > { %3261 = vadd.xlane.f32.xlu1 %v3232_v25 }
 0x638   : > { %v3177_v41 = vpop.xlane.xlu1 %3176  ;;  %v3236_v21 = vpop.xlane.xlu2 %3235 }
 0x639   : > { %v3201_v34 = vmul.f32 %v6301_v48, %v3177_v41  ;;  %v3267_v54 = vmul.f32 %v3236_v21, %v6301_v48 }
 0x63b   : > { %v6404_v44 = vsub.f32 %v6316_v55, %v3201_v34  ;;  %v3283_v23 = vadd.f32 1e-05, %v3267_v54 }
 0x63d   : > { %v3233_v40 = vmul.f32 %v6404_v44, %v6404_v44  ;;  %4320 = vrsqrt.f32 %v3283_v23  ;;  %vm3305_vm14 = vweird.f32 %v3283_v23 }
 0x63f   : > { %3263 = vadd.xlane.f32.xlu0 %v3233_v40 }
 0x640   : > { %v3179_v19 = vpop.xlane.xlu0 %3178  ;;  %v3238_v61 = vpop.xlane.xlu1 %3237 }
 0x641   : > { %v3202_v18 = vmul.f32 %v6301_v48, %v3179_v19  ;;  %v3268_v37 = vmul.f32 %v3238_v61, %v6301_v48 }
 0x643   : > { %v4321_v58 = vpop.eup %4320  ;;  %v6411_v5 = vsub.f32 %v6326_v2, %v3202_v18  ;;  %v3284_v31 = vadd.f32 1e-05, %v3268_v37  ;;  %v6418_v2 = vld [vmem:[%s6545_s5] ss:$0 sm:$0xff] }
 0x644   : > { %v3300_v45 = vmul.f32 %v4321_v58, %v3283_v23  ;;  %vm3306_vm12 = vweird.f32 %v4321_v58 }
 0x645   : > { %v3234_v55 = vmul.f32 %v6411_v5, %v6411_v5  ;;  %4322 = vrsqrt.f32 %v3284_v31  ;;  %vm3307_vm13 = vmor %vm3305_vm14, %vm3306_vm12  ;;  %vm3315_vm2 = vweird.f32 %v3284_v31 }
 0x646   : > { %v3301_v15 = vmul.f32 %v4321_v58, %v3300_v45 }
 0x647   : > { %3265 = vadd.xlane.f32.xlu2 %v3234_v55 }
 0x648   : > { %v3302_v28 = vmul.f32 0.5, %v3301_v15 }
 0x64a   : > { %v3303_v53 = vsub.f32 1.5, %v3302_v28 }
 0x64b   : > { %v4323_v14 = vpop.eup %4322 }
 0x64c   : > { %v3304_v7 = vmul.f32 %v4321_v58, %v3303_v53  ;;  %v3310_v50 = vmul.f32 %v4323_v14, %v3284_v31  ;;  %vm3316_vm15 = vweird.f32 %v4323_v14 }
 0x64d   : > { %vm3317_vm1 = vmor %vm3315_vm2, %vm3316_vm15 }
 0x64e   : > { %v3308_v51 = vsel %vm3307_vm13, %v4321_v58, %v3304_v7  ;;  %v3311_v33 = vmul.f32 %v4323_v14, %v3310_v50 }
 0x64f   : > { %v3459_v22 = vmul.f32 %v3308_v51, %v6309_v49  ;;  %v3240_v30 = vpop.xlane.xlu0 %3239 }
 0x650   : > { %v3312_v60 = vmul.f32 0.5, %v3311_v33  ;;  %v3269_v62 = vmul.f32 %v3240_v30, %v6301_v48 }
 0x651   : > { %v3478_v20 = vmul.f32 %v6418_v2, %v3459_v22 }
 0x652   : > { %v3313_v16 = vsub.f32 1.5, %v3312_v60  ;;  %v3285_v59 = vadd.f32 1e-05, %v3269_v62 }
 0x653   : > { %v3497_v12 = vadd.f32 %v6423_v39, %v3478_v20 }
 0x654   : > { %v3314_v6 = vmul.f32 %v4323_v14, %v3313_v16  ;;  %4324 = vrsqrt.f32 %v3285_v59  ;;  %vm3325_vm4 = vweird.f32 %v3285_v59 }
 0x655   : > { %3513 = vst [vmem:[%s6431_s11] sm:$0xff] %v3497_v12 }
 0x656   : > { %v3318_v49 = vsel %vm3317_vm1, %v4323_v14, %v3314_v6 }
 0x657   : > { %v3460_v17 = vmul.f32 %v3318_v49, %v6320_v36  ;;  %v3242_v8 = vpop.xlane.xlu2 %3241 }
 0x658   : > { %v3270_v47 = vmul.f32 %v3242_v8, %v6301_v48 }
 0x659   : > { %v3479_v56 = vmul.f32 %v6418_v2, %v3460_v17 }
 0x65a   : > { %v4325_v46 = vpop.eup %4324  ;;  %v3286_v35 = vadd.f32 1e-05, %v3270_v47 }
 0x65b   : > { %v3498_v52 = vadd.f32 %v6423_v39, %v3479_v56  ;;  %v3320_v10 = vmul.f32 %v4325_v46, %v3285_v59  ;;  %vm3326_vm3 = vweird.f32 %v4325_v46 }
 0x65c   : > { %4326 = vrsqrt.f32 %v3286_v35  ;;  %vm3327_vm5 = vmor %vm3325_vm4, %vm3326_vm3  ;;  %vm3335_vm7 = vweird.f32 %v3286_v35 }
 0x65d   : > { %3514 = vst [vmem:[%s6431_s11 + $0x8] sm:$0xff] %v3498_v52  ;;  %v3321_v43 = vmul.f32 %v4325_v46, %v3320_v10 }
 0x65f   : > { %v3322_v3 = vmul.f32 0.5, %v3321_v43 }
 0x661   : > { %v3323_v11 = vsub.f32 1.5, %v3322_v3 }
 0x662   : > { %v4327_v57 = vpop.eup %4326  ;;  %v3244_v24 = vpop.xlane.xlu1 %3243 }
 0x663   : > { %v3324_v25 = vmul.f32 %v4325_v46, %v3323_v11  ;;  %v3330_v36 = vmul.f32 %v4327_v57, %v3286_v35  ;;  %v3271_v41 = vmul.f32 %v3244_v24, %v6301_v48  ;;  %vm3336_vm6 = vweird.f32 %v4327_v57 }
 0x664   : > { %vm3337_vm8 = vmor %vm3335_vm7, %vm3336_vm6 }
 0x665   : > { %v3328_v21 = vsel %vm3327_vm5, %v4325_v46, %v3324_v25  ;;  %v3331_v34 = vmul.f32 %v4327_v57, %v3330_v36  ;;  %v3287_v54 = vadd.f32 1e-05, %v3271_v41 }
 0x666   : > { %v3461_v23 = vmul.f32 %v3328_v21, %v6331_v38 }
 0x667   : > { %v3332_v40 = vmul.f32 0.5, %v3331_v34  ;;  %4328 = vrsqrt.f32 %v3287_v54  ;;  %vm3345_vm10 = vweird.f32 %v3287_v54 }
 0x668   : > { %v3480_v19 = vmul.f32 %v6418_v2, %v3461_v23 }
 0x669   : > { %v3333_v61 = vsub.f32 1.5, %v3332_v40 }
 0x66a   : > { %v3499_v18 = vadd.f32 %v6423_v39, %v3480_v19  ;;  %v3246_v37 = vpop.xlane.xlu0 %3245 }
 0x66b   : > { %v3334_v58 = vmul.f32 %v4327_v57, %v3333_v61  ;;  %v3272_v31 = vmul.f32 %v3246_v37, %v6301_v48 }
 0x66c   : > { %3515 = vst [vmem:[%s6431_s11 + $0x10] sm:$0xff] %v3499_v18 }
 0x66d   : > { %v4329_v45 = vpop.eup %4328  ;;  %v3338_v55 = vsel %vm3337_vm8, %v4327_v57, %v3334_v58  ;;  %v3288_v15 = vadd.f32 1e-05, %v3272_v31 }
 0x66e   : > { %v3462_v38 = vmul.f32 %v3338_v55, %v6337_v4  ;;  %v3340_v28 = vmul.f32 %v4329_v45, %v3287_v54  ;;  %vm3346_vm9 = vweird.f32 %v4329_v45 }
 0x66f   : > { %4330 = vrsqrt.f32 %v3288_v15  ;;  %vm3347_vm11 = vmor %vm3345_vm10, %vm3346_vm9  ;;  %vm3355_vm12 = vweird.f32 %v3288_v15 }
 0x670   : > { %v3481_v53 = vmul.f32 %v6418_v2, %v3462_v38  ;;  %v3341_v14 = vmul.f32 %v4329_v45, %v3340_v28 }
 0x672   : > { %v3500_v7 = vadd.f32 %v6423_v39, %v3481_v53  ;;  %v3342_v50 = vmul.f32 0.5, %v3341_v14  ;;  %v3248_v51 = vpop.xlane.xlu2 %3247 }
 0x673   : > { %v3273_v33 = vmul.f32 %v3248_v51, %v6301_v48 }
 0x674   : > { %3516 = vst [vmem:[%s6431_s11 + $0x18] sm:$0xff] %v3500_v7  ;;  %v3343_v22 = vsub.f32 1.5, %v3342_v50 }
 0x675   : > { %v4331_v30 = vpop.eup %4330  ;;  %v3289_v60 = vadd.f32 1e-05, %v3273_v33 }
 0x676   : > { %v3344_v62 = vmul.f32 %v4329_v45, %v3343_v22  ;;  %v3350_v20 = vmul.f32 %v4331_v30, %v3288_v15  ;;  %vm3356_vm0 = vweird.f32 %v4331_v30 }
 0x677   : > { %4332 = vrsqrt.f32 %v3289_v60  ;;  %vm3357_vm14 = vmor %vm3355_vm12, %vm3356_vm0  ;;  %vm3365_vm15 = vweird.f32 %v3289_v60 }
 0x678   : > { %v3348_v4 = vsel %vm3347_vm11, %v4329_v45, %v3344_v62  ;;  %v3351_v16 = vmul.f32 %v4331_v30, %v3350_v20 }
 0x679   : > { %v3463_v59 = vmul.f32 %v3348_v4, %v6343_v32 }
 0x67a   : > { %v3352_v12 = vmul.f32 0.5, %v3351_v16  ;;  %v3250_v6 = vpop.xlane.xlu1 %3249 }
 0x67b   : > { %v3482_v49 = vmul.f32 %v6418_v2, %v3463_v59  ;;  %v3274_v17 = vmul.f32 %v3250_v6, %v6301_v48 }
 0x67c   : > { %v3353_v8 = vsub.f32 1.5, %v3352_v12 }
 0x67d   : > { %v4333_v47 = vpop.eup %4332  ;;  %v3501_v56 = vadd.f32 %v6423_v39, %v3482_v49  ;;  %v3290_v46 = vadd.f32 1e-05, %v3274_v17 }
 0x67e   : > { %v3354_v35 = vmul.f32 %v4331_v30, %v3353_v8  ;;  %v3360_v52 = vmul.f32 %v4333_v47, %v3289_v60  ;;  %vm3366_vm13 = vweird.f32 %v4333_v47 }
 0x67f   : > { %3517 = vst [vmem:[%s6431_s11 + $0x20] sm:$0xff] %v3501_v56  ;;  %4334 = vrsqrt.f32 %v3290_v46  ;;  %vm3367_vm2 = vmor %vm3365_vm15, %vm3366_vm13  ;;  %vm3375_vm3 = vweird.f32 %v3290_v46 }
 0x680   : > { %v3358_v32 = vsel %vm3357_vm14, %v4331_v30, %v3354_v35  ;;  %v3361_v10 = vmul.f32 %v4333_v47, %v3360_v52 }
 0x681   : > { %v3464_v43 = vmul.f32 %v3358_v32, %v6349_v63 }
 0x682   : > { %v3362_v3 = vmul.f32 0.5, %v3361_v10  ;;  %v3252_v11 = vpop.xlane.xlu0 %3251 }
 0x683   : > { %v3483_v57 = vmul.f32 %v6418_v2, %v3464_v43  ;;  %v3275_v24 = vmul.f32 %v3252_v11, %v6301_v48 }
 0x684   : > { %v3363_v25 = vsub.f32 1.5, %v3362_v3 }
 0x685   : > { %v4335_v36 = vpop.eup %4334  ;;  %v3502_v41 = vadd.f32 %v6423_v39, %v3483_v57  ;;  %v3291_v21 = vadd.f32 1e-05, %v3275_v24 }
 0x686   : > { %v3364_v34 = vmul.f32 %v4333_v47, %v3363_v25  ;;  %v3370_v54 = vmul.f32 %v4335_v36, %v3290_v46  ;;  %vm3376_vm1 = vweird.f32 %v4335_v36 }
 0x687   : > { %3518 = vst [vmem:[%s6431_s11 + $0x28] sm:$0xff] %v3502_v41  ;;  %4336 = vrsqrt.f32 %v3291_v21  ;;  %vm3377_vm4 = vmor %vm3375_vm3, %vm3376_vm1  ;;  %vm3385_vm6 = vweird.f32 %v3291_v21 }
 0x688   : > { %v3368_v63 = vsel %vm3367_vm2, %v4333_v47, %v3364_v34  ;;  %v3371_v23 = vmul.f32 %v4335_v36, %v3370_v54 }
 0x689   : > { %v3465_v40 = vmul.f32 %v3368_v63, %v6355_v27 }
 0x68a   : > { %v3372_v19 = vmul.f32 0.5, %v3371_v23  ;;  %v3254_v61 = vpop.xlane.xlu2 %3253 }
 0x68b   : > { %v3484_v18 = vmul.f32 %v6418_v2, %v3465_v40  ;;  %v3276_v37 = vmul.f32 %v3254_v61, %v6301_v48 }
 0x68c   : > { %v3373_v58 = vsub.f32 1.5, %v3372_v19 }
 0x68d   : > { %v4337_v31 = vpop.eup %4336  ;;  %v3503_v45 = vadd.f32 %v6423_v39, %v3484_v18  ;;  %v3292_v55 = vadd.f32 1e-05, %v3276_v37 }
 0x68e   : > { %v3374_v15 = vmul.f32 %v4335_v36, %v3373_v58  ;;  %v3380_v38 = vmul.f32 %v4337_v31, %v3291_v21  ;;  %vm3386_vm5 = vweird.f32 %v4337_v31 }
 0x68f   : > { %3519 = vst [vmem:[%s6431_s11 + $0x30] sm:$0xff] %v3503_v45  ;;  %4338 = vrsqrt.f32 %v3292_v55  ;;  %vm3387_vm7 = vmor %vm3385_vm6, %vm3386_vm5  ;;  %vm3395_vm9 = vweird.f32 %v3292_v55 }
 0x690   : > { %v3378_v27 = vsel %vm3377_vm4, %v4335_v36, %v3374_v15  ;;  %v3381_v28 = vmul.f32 %v4337_v31, %v3380_v38 }
 0x691   : > { %v3466_v53 = vmul.f32 %v3378_v27, %v6361_v13 }
 0x692   : > { %v3382_v14 = vmul.f32 0.5, %v3381_v28  ;;  %v3256_v7 = vpop.xlane.xlu1 %3255 }
 0x693   : > { %v3485_v50 = vmul.f32 %v6418_v2, %v3466_v53  ;;  %v3277_v51 = vmul.f32 %v3256_v7, %v6301_v48 }
 0x694   : > { %v3383_v33 = vsub.f32 1.5, %v3382_v14 }
 0x695   : > { %v4339_v22 = vpop.eup %4338  ;;  %v3504_v30 = vadd.f32 %v6423_v39, %v3485_v50  ;;  %v3293_v60 = vadd.f32 1e-05, %v3277_v51 }
 0x696   : > { %v3384_v62 = vmul.f32 %v4337_v31, %v3383_v33  ;;  %v3390_v20 = vmul.f32 %v4339_v22, %v3292_v55  ;;  %vm3396_vm8 = vweird.f32 %v4339_v22 }
 0x697   : > { %3520 = vst [vmem:[%s6431_s11 + $0x38] sm:$0xff] %v3504_v30  ;;  %4340 = vrsqrt.f32 %v3293_v60  ;;  %vm3397_vm10 = vmor %vm3395_vm9, %vm3396_vm8  ;;  %vm3405_vm0 = vweird.f32 %v3293_v60 }
 0x698   : > { %v3388_v13 = vsel %vm3387_vm7, %v4337_v31, %v3384_v62  ;;  %v3391_v4 = vmul.f32 %v4339_v22, %v3390_v20 }
 0x699   : > { %v3467_v16 = vmul.f32 %v3388_v13, %v6367_v1 }
 0x69a   : > { %v3392_v59 = vmul.f32 0.5, %v3391_v4  ;;  %v3258_v12 = vpop.xlane.xlu0 %3257 }
 0x69b   : > { %v3486_v6 = vmul.f32 %v6418_v2, %v3467_v16  ;;  %v3278_v49 = vmul.f32 %v3258_v12, %v6301_v48 }
 0x69c   : > { %v3393_v17 = vsub.f32 1.5, %v3392_v59 }
 0x69d   : > { %v4341_v8 = vpop.eup %4340  ;;  %v3505_v47 = vadd.f32 %v6423_v39, %v3486_v6  ;;  %v3294_v56 = vadd.f32 1e-05, %v3278_v49 }
 0x69e   : > { %v3394_v46 = vmul.f32 %v4339_v22, %v3393_v17  ;;  %v3400_v35 = vmul.f32 %v4341_v8, %v3293_v60  ;;  %vm3406_vm11 = vweird.f32 %v4341_v8 }
 0x69f   : > { %3521 = vst [vmem:[%s6431_s11 + $0x40] sm:$0xff] %v3505_v47  ;;  %4342 = vrsqrt.f32 %v3294_v56  ;;  %vm3407_vm12 = vmor %vm3405_vm0, %vm3406_vm11  ;;  %vm3415_vm13 = vweird.f32 %v3294_v56 }
 0x6a0   : > { %v3398_v1 = vsel %vm3397_vm10, %v4339_v22, %v3394_v46  ;;  %v3401_v52 = vmul.f32 %v4341_v8, %v3400_v35 }
 0x6a1   : > { %v3468_v32 = vmul.f32 %v3398_v1, %v6373_v0 }
 0x6a2   : > { %v3402_v10 = vmul.f32 0.5, %v3401_v52  ;;  %v3260_v43 = vpop.xlane.xlu2 %3259 }
 0x6a3   : > { %v3487_v3 = vmul.f32 %v6418_v2, %v3468_v32  ;;  %v3279_v11 = vmul.f32 %v3260_v43, %v6301_v48 }
 0x6a4   : > { %v3403_v57 = vsub.f32 1.5, %v3402_v10 }
 0x6a5   : > { %v4343_v24 = vpop.eup %4342  ;;  %v3506_v25 = vadd.f32 %v6423_v39, %v3487_v3  ;;  %v3295_v36 = vadd.f32 1e-05, %v3279_v11 }
 0x6a6   : > { %v3404_v41 = vmul.f32 %v4341_v8, %v3403_v57  ;;  %v3410_v21 = vmul.f32 %v4343_v24, %v3294_v56  ;;  %vm3416_vm14 = vweird.f32 %v4343_v24 }
 0x6a7   : > { %3522 = vst [vmem:[%s6431_s11 + $0x48] sm:$0xff] %v3506_v25  ;;  %4344 = vrsqrt.f32 %v3295_v36  ;;  %vm3417_vm15 = vmor %vm3415_vm13, %vm3416_vm14  ;;  %vm3425_vm1 = vweird.f32 %v3295_v36 }
 0x6a8   : > { %v3408_v0 = vsel %vm3407_vm12, %v4341_v8, %v3404_v41  ;;  %v3411_v34 = vmul.f32 %v4343_v24, %v3410_v21 }
 0x6a9   : > { %v3469_v54 = vmul.f32 %v3408_v0, %v6379_v9 }
 0x6aa   : > { %v3412_v63 = vmul.f32 0.5, %v3411_v34  ;;  %v3262_v23 = vpop.xlane.xlu1 %3261 }
 0x6ab   : > { %v3488_v40 = vmul.f32 %v6418_v2, %v3469_v54  ;;  %v3280_v19 = vmul.f32 %v3262_v23, %v6301_v48 }
 0x6ac   : > { %v3413_v61 = vsub.f32 1.5, %v3412_v63 }
 0x6ad   : > { %v4345_v18 = vpop.eup %4344  ;;  %v3507_v37 = vadd.f32 %v6423_v39, %v3488_v40  ;;  %v3296_v58 = vadd.f32 1e-05, %v3280_v19 }
 0x6ae   : > { %v3414_v31 = vmul.f32 %v4343_v24, %v3413_v61  ;;  %v3420_v45 = vmul.f32 %v4345_v18, %v3295_v36  ;;  %vm3426_vm2 = vweird.f32 %v4345_v18 }
 0x6af   : > { %3523 = vst [vmem:[%s6431_s11 + $0x50] sm:$0xff] %v3507_v37  ;;  %4346 = vrsqrt.f32 %v3296_v58  ;;  %vm3427_vm3 = vmor %vm3425_vm1, %vm3426_vm2  ;;  %vm3435_vm5 = vweird.f32 %v3296_v58 }
 0x6b0   : > { %v3418_v9 = vsel %vm3417_vm15, %v4343_v24, %v3414_v31  ;;  %v3421_v55 = vmul.f32 %v4345_v18, %v3420_v45 }
 0x6b1   : > { %v3470_v15 = vmul.f32 %v3418_v9, %v6385_v26 }
 0x6b2   : > { %v3422_v38 = vmul.f32 0.5, %v3421_v55  ;;  %v3264_v27 = vpop.xlane.xlu0 %3263 }
 0x6b3   : > { %v3489_v28 = vmul.f32 %v6418_v2, %v3470_v15  ;;  %v3281_v53 = vmul.f32 %v3264_v27, %v6301_v48 }
 0x6b4   : > { %v3423_v14 = vsub.f32 1.5, %v3422_v38 }
 0x6b5   : > { %v4347_v7 = vpop.eup %4346  ;;  %v3508_v50 = vadd.f32 %v6423_v39, %v3489_v28  ;;  %v3297_v51 = vadd.f32 1e-05, %v3281_v53 }
 0x6b6   : > { %v3424_v33 = vmul.f32 %v4345_v18, %v3423_v14  ;;  %v3430_v22 = vmul.f32 %v4347_v7, %v3296_v58  ;;  %vm3436_vm4 = vweird.f32 %v4347_v7 }
 0x6b7   : > { %3524 = vst [vmem:[%s6431_s11 + $0x58] sm:$0xff] %v3508_v50  ;;  %4348 = vrsqrt.f32 %v3297_v51  ;;  %vm3437_vm6 = vmor %vm3435_vm5, %vm3436_vm4  ;;  %vm3445_vm8 = vweird.f32 %v3297_v51 }
 0x6b8   : > { %v3428_v26 = vsel %vm3427_vm3, %v4345_v18, %v3424_v33  ;;  %v3431_v30 = vmul.f32 %v4347_v7, %v3430_v22 }
 0x6b9   : > { %v3471_v60 = vmul.f32 %v3428_v26, %v6391_v42 }
 0x6ba   : > { %v3432_v62 = vmul.f32 0.5, %v3431_v30  ;;  %v3266_v20 = vpop.xlane.xlu2 %3265 }
 0x6bb   : > { %v3490_v13 = vmul.f32 %v6418_v2, %v3471_v60  ;;  %v3282_v4 = vmul.f32 %v3266_v20, %v6301_v48 }
 0x6bc   : > { %v3433_v16 = vsub.f32 1.5, %v3432_v62 }
 0x6bd   : > { %v4349_v59 = vpop.eup %4348  ;;  %v3509_v12 = vadd.f32 %v6423_v39, %v3490_v13  ;;  %v3298_v6 = vadd.f32 1e-05, %v3282_v4 }
 0x6be   : > { %v3434_v49 = vmul.f32 %v4347_v7, %v3433_v16  ;;  %v3440_v17 = vmul.f32 %v4349_v59, %v3297_v51  ;;  %vm3446_vm7 = vweird.f32 %v4349_v59 }
 0x6bf   : > { %3525 = vst [vmem:[%s6431_s11 + $0x60] sm:$0xff] %v3509_v12  ;;  %4350 = vrsqrt.f32 %v3298_v6  ;;  %vm3447_vm9 = vmor %vm3445_vm8, %vm3446_vm7  ;;  %vm3455_vm11 = vweird.f32 %v3298_v6 }
 0x6c0   : > { %v3438_v42 = vsel %vm3437_vm6, %v4347_v7, %v3434_v49  ;;  %v3441_v8 = vmul.f32 %v4349_v59, %v3440_v17 }
 0x6c1   : > { %v3472_v47 = vmul.f32 %v3438_v42, %v6397_v29 }
 0x6c2   : > { %v3442_v56 = vmul.f32 0.5, %v3441_v8 }
 0x6c3   : > { %v3491_v48 = vmul.f32 %v6418_v2, %v3472_v47 }
 0x6c4   : > { %v3443_v46 = vsub.f32 1.5, %v3442_v56 }
 0x6c5   : > { %v4351_v35 = vpop.eup %4350  ;;  %v3510_v1 = vadd.f32 %v6423_v39, %v3491_v48 }
 0x6c6   : > { %v3444_v52 = vmul.f32 %v4349_v59, %v3443_v46  ;;  %v3450_v32 = vmul.f32 %v4351_v35, %v3298_v6  ;;  %vm3456_vm10 = vweird.f32 %v4351_v35 }
 0x6c7   : > { %3526 = vst [vmem:[%s6431_s11 + $0x68] sm:$0xff] %v3510_v1  ;;  %vm3457_vm0 = vmor %vm3455_vm11, %vm3456_vm10 }
 0x6c8   : > { %v3448_v10 = vsel %vm3447_vm9, %v4349_v59, %v3444_v52  ;;  %v3451_v43 = vmul.f32 %v4351_v35, %v3450_v32 }
 0x6c9   : > { %v3473_v29 = vmul.f32 %v3448_v10, %v6404_v44 }
 0x6ca   : > { %v3452_v3 = vmul.f32 0.5, %v3451_v43 }
 0x6cb   : > { %v3492_v11 = vmul.f32 %v6418_v2, %v3473_v29 }
 0x6cc   : > { %v3453_v57 = vsub.f32 1.5, %v3452_v3 }
 0x6cd   : > { %v3511_v24 = vadd.f32 %v6423_v39, %v3492_v11 }
 0x6ce   : > { %v3454_v25 = vmul.f32 %v4351_v35, %v3453_v57 }
 0x6cf   : > { %3527 = vst [vmem:[%s6431_s11 + $0x70] sm:$0xff] %v3511_v24 }
 0x6d0   : > { %v3458_v44 = vsel %vm3457_vm0, %v4351_v35, %v3454_v25 }
 0x6d1   : > { %v3474_v36 = vmul.f32 %v3458_v44, %v6411_v5 }
 0x6d3   : > { %v3493_v41 = vmul.f32 %v6418_v2, %v3474_v36 }
 0x6d5   : > { %v3512_v21 = vadd.f32 %v6423_v39, %v3493_v41 }
 0x6d7   : > { %3528 = vst [vmem:[%s6431_s11 + $0x78] sm:$0xff] %v3512_v21 }
 0x6d8   : > { %4515 = shalt.err (!%p4512_p10)
}
 0x6d9   : > { %s4575_s10 = smov 128   ;;  %s4576_s11 = smov 8  }
 0x6da   : > { %3984 = dma.vmem_to_hbm [thread:$0]  (%p4701_p0), %s3544_s20, 2048, %s3546_s28, %s3530_s13, %s4575_s10, %s4575_s10, %s4576_s11  }
 0x6db PF: > { %p4011_p11 = scmp.ge.s32.totalorder %s4562_s27, 2  ;;  %s3560_s14 = sand.u32 1, %s4550_s24  }
 0x6dc   : > { %s3561_s9 = scalar_lea.sflag [#allocation4], %s3560_s14 }
 0x6dd   : > { %p4001_p12 = pnand %p4011_p11, %p4652_p6 }
 0x6df   : > { %p4002_p13 = pneg %p4001_p12 }
 0x6e1   : > { %4545 = dma.done.wait (%p4002_p13), %s3561_s9, 2048  }
 0x6e2   : > { %4547 = vsyncadd (%p4002_p13), %s3561_s9, 4294965248  ;;  %p22_p3 = scmp.ge.s32.totalorder %s4688_s21, 6   ;;  %s6713_s24 = smov %s4554_s25 }
 0x6e3   : > { %s6714_s25 = smov %s4558_s26  ;;  %s6715_s26 = smov %s4697_s23 }
 0x6e4   : > { %s6716_s27 = smov %s4688_s21  ;;  %24 = sbr.rel (!%p22_p3) target bundleno = 9 (0x9), region = 106 }
 0x6e9   :  { %3567 = vsyncpa [#allocation3], 1 }
 0x6ea   :  { %3569 = vsyncpa [#allocation3 + $0x1], 1 }
 0x6eb   :  { %3570 = vsyncpa [#allocation6], 1 }
 0x6ec   :  { %3571 = vsyncpa [#allocation9], 1 }
 0x6ed   :  { %3572 = vsyncpa [#allocation4], 1 }
 0x6ee   :  { %3574 = vsyncpa [#allocation4 + $0x1], 1 }

</bundles_post_ra>
